<compile_context>
chip_gen: v5e
topology: v5e:2x2
jax: 0.10.0
libtpu: 0.0.40
codegen_flags: <defaults>
</compile_context>

<pallas_src>
import functools
import math

import numpy as np
import jax
import jax.numpy as jnp
from jax.experimental import pallas as pl
from jax.experimental.pallas import tpu as pltpu


def _round_up(v, m):
    return ((v + m - 1) // m) * m


def _masked_log_softmax(logits, num_classes):
    """log_softmax over the first num_classes lanes of a 128-padded class axis."""
    col = jax.lax.broadcasted_iota(jnp.int32, logits.shape, 1)
    valid = col < num_classes
    m = jnp.max(jnp.where(valid, logits, -jnp.inf), axis=-1, keepdims=True)
    z = logits - m
    lse = jnp.log(jnp.sum(jnp.where(valid, jnp.exp(z), 0.0),
                          axis=-1, keepdims=True))
    return z - lse


# ---------------------------------------------------------------------------
# Small-graph path: whole forward in one VMEM-resident kernel (no grid).
# ---------------------------------------------------------------------------
def chebnet_fused_kernel(lhat_ref, x_ref, w10_ref, w11_ref, b1_ref,
                         w20_ref, w21_ref, b2_ref, out_ref, *, num_classes):
    lhat = lhat_ref[...]                                    # bf16 [np, np]
    x = x_ref[...]                                          # bf16 [np, f]
    # ChebConv-1, K=2:  h = T0(x)@W10 + T1(x)@W11 + b1 ;  T0=x, T1 = L_hat @ x
    t1 = jnp.dot(lhat, x, preferred_element_type=jnp.float32)
    h = (jnp.dot(x.astype(jnp.float32), w10_ref[...],
                 preferred_element_type=jnp.float32)
         + jnp.dot(t1, w11_ref[...], preferred_element_type=jnp.float32)
         + b1_ref[...])
    h = jnp.maximum(h, 0.0)                                 # F.relu
    # TODO(synk): train-mode F.dropout(p=0.5) would need pltpu.prng_* masking;
    # eval-mode dropout is the identity.
    lh = jnp.dot(lhat, h.astype(jnp.bfloat16),
                 preferred_element_type=jnp.float32)
    logits = (jnp.dot(h, w20_ref[...], preferred_element_type=jnp.float32)
              + jnp.dot(lh, w21_ref[...], preferred_element_type=jnp.float32)
              + b2_ref[...])
    out_ref[...] = _masked_log_softmax(logits, num_classes)


# ---------------------------------------------------------------------------
# Large-graph path: two tiled, pipelined kernels.
# ---------------------------------------------------------------------------
def cheb_layer1_kernel(lhat_ref, x_ref, w10_ref, w11_ref, b1_ref, h_ref,
                       acc_ref, *, tile_m, tile_k):
    """ChebConv-1 (K=2) + ReLU.  Grid = (row blocks i, reduction blocks k).

    Accumulates T1 = L_hat @ x over k; at the last k applies W10/W11 + b1 +
    ReLU and emits h (bf16, hidden-wide) -- the only intermediate hitting HBM.
    x is a single VMEM-resident block (constant index_map), sliced in-kernel.
    """
    i = pl.program_id(0)
    k = pl.program_id(1)

    @pl.when(k == 0)
    def _():
        acc_ref[...] = jnp.zeros_like(acc_ref)

    xk = x_ref[pl.ds(pl.multiple_of(k * tile_k, tile_k), tile_k), :]
    acc_ref[...] += jnp.dot(lhat_ref[...], xk,
                            preferred_element_type=jnp.float32)

    @pl.when(k == pl.num_programs(1) - 1)
    def _():
        xi = x_ref[pl.ds(pl.multiple_of(i * tile_m, tile_m), tile_m), :]
        h = (jnp.dot(xi.astype(jnp.float32), w10_ref[...],
                     preferred_element_type=jnp.float32)
             + jnp.dot(acc_ref[...], w11_ref[...],
                       preferred_element_type=jnp.float32)
             + b1_ref[...])
        # F.relu; eval-mode dropout is the identity (see fused kernel TODO).
        h_ref[...] = jnp.maximum(h, 0.0).astype(h_ref.dtype)


def cheb_layer2_kernel(lhat_ref, hk_ref, hi_ref, w20_ref, w21_ref, b2_ref,
                       out_ref, acc_ref, *, num_classes):
    """ChebConv-2 (K=2) + masked log_softmax.

    logits = h @ W20 + (L_hat @ h) @ W21 + b2.  The N^2 matmul accumulates
    acc = L_hat @ h (only hidden=32 wide); W20/W21/b2/log_softmax run once per
    row block at finalize, off the reduction critical path.
    """
    k = pl.program_id(1)

    @pl.when(k == 0)
    def _():
        acc_ref[...] = jnp.zeros_like(acc_ref)

    acc_ref[...] += jnp.dot(lhat_ref[...], hk_ref[...],
                            preferred_element_type=jnp.float32)

    @pl.when(k == pl.num_programs(1) - 1)
    def _():
        logits = (jnp.dot(hi_ref[...].astype(jnp.float32), w20_ref[...],
                          preferred_element_type=jnp.float32)
                  + jnp.dot(acc_ref[...], w21_ref[...],
                            preferred_element_type=jnp.float32)
                  + b2_ref[...])
        out_ref[...] = _masked_log_softmax(logits, num_classes)


# ---------------------------------------------------------------------------
# Per-graph preparation (hoisted out of the forward pass).
# ---------------------------------------------------------------------------
def prepare_chebnet_graph(lhat, x, *, tile_m=512, tile_k=2048,
                          fused_max_nodes=2048):
    """One-time (per graph) pad + bf16 cast of L_hat and x.

    Call this ONCE per graph and reuse the result across forward calls; this
    removes a full extra HBM pass over the [N, N] operator from every call.
    """
    n, f = x.shape
    assert lhat.shape == (n, n)
    fused = n <= fused_max_nodes

    if fused:
        # Whole operator stays resident in VMEM; pad to MXU/lane friendly 128.
        npad_r = npad_c = npad_x = _round_up(n, 128)
    else:
        # Independent row / column padding of the quadratic operand.
        npad_r = _round_up(n, tile_m)
        npad_c = _round_up(n, tile_k)
        npad_x = max(npad_r, npad_c)

    lhat_p = jnp.zeros((npad_r, npad_c), jnp.bfloat16).at[:n, :n].set(
        lhat.astype(jnp.bfloat16))
    x_p = jnp.zeros((npad_x, f), jnp.bfloat16).at[:n, :].set(
        x.astype(jnp.bfloat16))

    return dict(lhat=lhat_p, x=x_p, n=n, f=f, fused=fused,
                tile_m=tile_m, tile_k=tile_k,
                npad_r=npad_r, npad_c=npad_c, npad_x=npad_x)


def chebnet_forward_prepared(prep, params):
    """ChebNet forward pass on a prepared graph; returns [N, C] log-probs."""
    w10, w11, b1, w20, w21, b2 = params
    n, f = prep["n"], prep["f"]
    hdim = w10.shape[1]
    c = w20.shape[1]
    cpad = _round_up(c, 128)                                 # lane-dense classes

    # Weights change during training -> (re)pad per call (tiny arrays).
    w10f = jnp.asarray(w10, jnp.float32)
    w11f = jnp.asarray(w11, jnp.float32)
    b1f = jnp.asarray(b1, jnp.float32).reshape(1, hdim)
    w20_p = jnp.zeros((hdim, cpad), jnp.float32).at[:, :c].set(
        jnp.asarray(w20, jnp.float32))
    w21_p = jnp.zeros((hdim, cpad), jnp.float32).at[:, :c].set(
        jnp.asarray(w21, jnp.float32))
    b2_p = jnp.zeros((1, cpad), jnp.float32).at[:, :c].set(
        jnp.asarray(b2, jnp.float32).reshape(1, c))

    lhat_p, x_p = prep["lhat"], prep["x"]

    if prep["fused"]:
        npad = prep["npad_r"]
        cost = pl.CostEstimate(
            flops=int(2 * npad * npad * (f + hdim)
                      + 2 * npad * hdim * (2 * f + 2 * cpad)),
            transcendentals=int(npad * (cpad + 1)),
            bytes_accessed=int(lhat_p.size * 2 + x_p.size * 2
                               + npad * cpad * 4))
        out_padded = pl.pallas_call(
            functools.partial(chebnet_fused_kernel, num_classes=c),
            out_shape=jax.ShapeDtypeStruct((npad, cpad), jnp.float32),
            compiler_params=pltpu.CompilerParams(vmem_limit_bytes=32 * 1024 * 1024),
            cost_estimate=cost,
        )(lhat_p, x_p, w10f, w11f, b1f, w20_p, w21_p, b2_p)
        return out_padded[:n, :c]

    # ---- Tiled path ---------------------------------------------------------
    tile_m, tile_k = prep["tile_m"], prep["tile_k"]
    npad_r, npad_c, npad_x = prep["npad_r"], prep["npad_c"], prep["npad_x"]
    grid = (npad_r // tile_m, npad_c // tile_k)

    cparams = pltpu.CompilerParams(
        dimension_semantics=("parallel", "arbitrary"),
        vmem_limit_bytes=48 * 1024 * 1024)

    # ---- Layer 1: h = relu(ChebConv1(x))  (h is the only HBM intermediate).
    l1_cost = pl.CostEstimate(
        flops=int(2 * npad_r * npad_c * f + 4 * npad_r * f * hdim),
        transcendentals=0,
        bytes_accessed=int(lhat_p.size * 2 + x_p.size * 2 + npad_r * hdim * 2))
    h = pl.pallas_call(
        functools.partial(cheb_layer1_kernel, tile_m=tile_m, tile_k=tile_k),
        out_shape=jax.ShapeDtypeStruct((npad_r, hdim), jnp.bfloat16),
        grid_spec=pltpu.PrefetchScalarGridSpec(
            num_scalar_prefetch=0,
            grid=grid,
            in_specs=[
                pl.BlockSpec((tile_m, tile_k), lambda i, k: (i, k)),   # L_hat
                pl.BlockSpec((npad_x, f), lambda i, k: (0, 0)),        # x (resident)
                pl.BlockSpec((f, hdim), lambda i, k: (0, 0)),          # W10
                pl.BlockSpec((f, hdim), lambda i, k: (0, 0)),          # W11
                pl.BlockSpec((1, hdim), lambda i, k: (0, 0)),          # b1
            ],
            out_specs=pl.BlockSpec((tile_m, hdim), lambda i, k: (i, 0)),
            scratch_shapes=[pltpu.VMEM((tile_m, f), jnp.float32)],
        ),
        compiler_params=cparams,
        cost_estimate=l1_cost,
    )(lhat_p, x_p, w10f, w11f, b1f)

    # Independent padding can make the reduction extent (npad_c) exceed the row
    # extent (npad_r); zero-fill the extra h rows so the layer-2 k-blocks read
    # well-defined zeros (they multiply zero L_hat columns anyway).
    if npad_x > npad_r:
        h = jnp.concatenate(
            [h, jnp.zeros((npad_x - npad_r, hdim), h.dtype)], axis=0)

    # ---- Layer 2: logits = h@W20 + (L_hat@h)@W21 + b2 ; masked log_softmax.
    l2_cost = pl.CostEstimate(
        flops=int(2 * npad_r * npad_c * hdim + 4 * npad_r * hdim * cpad),
        transcendentals=int(npad_r * (cpad + 1)),
        bytes_accessed=int(lhat_p.size * 2 + h.size * 2 + npad_r * cpad * 4))
    out_padded = pl.pallas_call(
        functools.partial(cheb_layer2_kernel, num_classes=c),
        out_shape=jax.ShapeDtypeStruct((npad_r, cpad), jnp.float32),
        grid_spec=pltpu.PrefetchScalarGridSpec(
            num_scalar_prefetch=0,
            grid=grid,
            in_specs=[
                pl.BlockSpec((tile_m, tile_k), lambda i, k: (i, k)),   # L_hat
                pl.BlockSpec((tile_k, hdim), lambda i, k: (k, 0)),     # h (k blk)
                pl.BlockSpec((tile_m, hdim), lambda i, k: (i, 0)),     # h (i blk)
                pl.BlockSpec((hdim, cpad), lambda i, k: (0, 0)),       # W20 (pad)
                pl.BlockSpec((hdim, cpad), lambda i, k: (0, 0)),       # W21 (pad)
                pl.BlockSpec((1, cpad), lambda i, k: (0, 0)),          # b2  (pad)
            ],
            out_specs=pl.BlockSpec((tile_m, cpad), lambda i, k: (i, 0)),
            scratch_shapes=[pltpu.VMEM((tile_m, hdim), jnp.float32)],
        ),
        compiler_params=cparams,
        cost_estimate=l2_cost,
    )(lhat_p, h, h, w20_p, w21_p, b2_p)

    return out_padded[:n, :c]


def chebnet_forward(lhat, x, params, **prepare_kwargs):
    """One-shot convenience wrapper (prefer prepare + forward_prepared when the
    graph is reused across calls)."""
    prep = prepare_chebnet_graph(lhat, x, **prepare_kwargs)
    return chebnet_forward_prepared(prep, params)


def scaled_chebyshev_operator(edge_index, num_nodes):
    """Dense L_hat = -D^{-1/2} A D^{-1/2} (PyG ChebConv sym norm, lambda_max=2,
    self-loops removed before normalization)."""
    row, col = edge_index
    a = jnp.zeros((num_nodes, num_nodes), jnp.float32).at[row, col].add(1.0)
    a = a * (1.0 - jnp.eye(num_nodes, dtype=jnp.float32))  # remove self loops
    deg = a.sum(axis=1)
    dinv = jnp.where(deg > 0, 1.0 / jnp.sqrt(deg), 0.0)
    return -(dinv[:, None] * a * dinv[None, :])


if __name__ == "__main__":
    key = jax.random.PRNGKey(0)
    N, F_IN, HIDDEN, NUM_CLASSES = 300, 8, 32, 4
    k_x, k_w10, k_w11, k_w20, k_w21 = jax.random.split(key, 5)

    # node features (data.x)
    x = jax.random.normal(k_x, (N, F_IN), jnp.float32)

    # edge_index: ring graph, both edge directions (data.edge_index)
    src = np.arange(N, dtype=np.int32)
    dst = ((src + 1) % N).astype(np.int32)
    edge_index = jnp.asarray(
        np.stack([np.concatenate([src, dst]), np.concatenate([dst, src])]),
        jnp.int32)

    lhat = scaled_chebyshev_operator(edge_index, N)

    # deterministic glorot-uniform weights, zero biases (PyG ChebConv init)
    def glorot(k, shape):
        lim = float(np.sqrt(6.0 / (shape[0] + shape[1])))
        return jax.random.uniform(k, shape, jnp.float32, -lim, lim)

    w10 = glorot(k_w10, (F_IN, HIDDEN))
    w11 = glorot(k_w11, (F_IN, HIDDEN))
    b1 = jnp.zeros((1, HIDDEN), jnp.float32)
    w20 = glorot(k_w20, (HIDDEN, NUM_CLASSES))
    w21 = glorot(k_w21, (HIDDEN, NUM_CLASSES))
    b2 = jnp.zeros((1, NUM_CLASSES), jnp.float32)
    params = (w10, w11, b1, w20, w21, b2)

    # Per-graph preparation (pad + bf16 cast) is hoisted: done ONCE, reused
    # across forward calls.  N=300 takes the single fused VMEM-resident kernel.
    prep_fused = prepare_chebnet_graph(lhat, x)
    out = jax.block_until_ready(chebnet_forward_prepared(prep_fused, params))

    # Also exercise the tiled large-graph path with demo-sized tiles
    # (tile_k != tile_m exercises the independent row/col padding + h zero-fill).
    prep_tiled = prepare_chebnet_graph(lhat, x, tile_m=128, tile_k=256,
                                       fused_max_nodes=0)
    out_tiled = jax.block_until_ready(
        chebnet_forward_prepared(prep_tiled, params))

    # pure-JAX f32 reference of the original PyTorch forward
    tx1 = lhat @ x
    h_ref = jnp.maximum(x @ w10 + tx1 @ w11 + b1, 0.0)
    logits_ref = h_ref @ w20 + (lhat @ h_ref) @ w21 + b2
    ref = jax.nn.log_softmax(logits_ref, axis=1)

    for o in (out, out_tiled):
        assert o.shape == (N, NUM_CLASSES)
        assert bool(jnp.all(jnp.isfinite(o)))
        # log_softmax rows should exponentiate to probability vectors
        assert bool(jnp.allclose(jnp.sum(jnp.exp(o), axis=1), 1.0, atol=1e-3))
        # bf16 feeds => loose tolerance vs f32 reference
        assert float(jnp.max(jnp.abs(o - ref))) < 0.3, "mismatch vs f32 reference"

    print("KERNEL_OK")
</pallas_src>

<mosaic_0001>
module attributes {stable_mosaic.version = 11 : i64} {
  func.func @chebnet_fused_kernel(%arg0: memref<384x384xbf16, #tpu.memory_space<vmem>>, %arg1: memref<384x8xbf16, #tpu.memory_space<vmem>>, %arg2: memref<8x32xf32, #tpu.memory_space<vmem>>, %arg3: memref<8x32xf32, #tpu.memory_space<vmem>>, %arg4: memref<1x32xf32, #tpu.memory_space<vmem>>, %arg5: memref<32x128xf32, #tpu.memory_space<vmem>>, %arg6: memref<32x128xf32, #tpu.memory_space<vmem>>, %arg7: memref<1x128xf32, #tpu.memory_space<vmem>>, %arg8: memref<384x128xf32, #tpu.memory_space<vmem>>) attributes {dimension_semantics = [], scalar_prefetch = 0 : i64, scratch_operands = 0 : i64, tpu.core_type = #tpu.core_type<tc>} {
    %c0 = arith.constant 0 : index
    %c0_0 = arith.constant 0 : index
    %0 = vector.load %arg0[%c0, %c0_0] : memref<384x384xbf16, #tpu.memory_space<vmem>>, vector<384x384xbf16>
    %c0_1 = arith.constant 0 : index
    %c0_2 = arith.constant 0 : index
    %1 = vector.load %arg1[%c0_1, %c0_2] : memref<384x8xbf16, #tpu.memory_space<vmem>>, vector<384x8xbf16>
    %cst = arith.constant dense<0.000000e+00> : vector<384x8xf32>
    %2 = tpu.matmul %0, %1, %cst {dimension_numbers = #tpu.dot_dimension_numbers<[1], [0], [0], [1], [0, 0, 1, 1], [], []>} : vector<384x384xbf16>, vector<384x8xbf16>, vector<384x8xf32> -> vector<384x8xf32>
    %3 = arith.extf %1 : vector<384x8xbf16> to vector<384x8xf32>
    %c0_3 = arith.constant 0 : index
    %c0_4 = arith.constant 0 : index
    %4 = vector.load %arg2[%c0_3, %c0_4] : memref<8x32xf32, #tpu.memory_space<vmem>>, vector<8x32xf32>
    %cst_5 = arith.constant dense<0.000000e+00> : vector<384x32xf32>
    %5 = tpu.matmul %3, %4, %cst_5 {dimension_numbers = #tpu.dot_dimension_numbers<[1], [0], [0], [1], [0, 0, 1, 1], [], []>} : vector<384x8xf32>, vector<8x32xf32>, vector<384x32xf32> -> vector<384x32xf32>
    %c0_6 = arith.constant 0 : index
    %c0_7 = arith.constant 0 : index
    %6 = vector.load %arg3[%c0_6, %c0_7] : memref<8x32xf32, #tpu.memory_space<vmem>>, vector<8x32xf32>
    %cst_8 = arith.constant dense<0.000000e+00> : vector<384x32xf32>
    %7 = tpu.matmul %2, %6, %cst_8 {dimension_numbers = #tpu.dot_dimension_numbers<[1], [0], [0], [1], [0, 0, 1, 1], [], []>} : vector<384x8xf32>, vector<8x32xf32>, vector<384x32xf32> -> vector<384x32xf32>
    %8 = arith.addf %5, %7 : vector<384x32xf32>
    %c0_9 = arith.constant 0 : index
    %c0_10 = arith.constant 0 : index
    %9 = vector.load %arg4[%c0_9, %c0_10] : memref<1x32xf32, #tpu.memory_space<vmem>>, vector<1x32xf32>
    %10 = vector.broadcast %9 : vector<1x32xf32> to vector<384x32xf32>
    %11 = arith.addf %8, %10 : vector<384x32xf32>
    %cst_11 = arith.constant 0.000000e+00 : f32
    %12 = vector.broadcast %cst_11 : f32 to vector<384x32xf32>
    %13 = arith.maximumf %11, %12 : vector<384x32xf32>
    %14 = arith.truncf %13 : vector<384x32xf32> to vector<384x32xbf16>
    %cst_12 = arith.constant dense<0.000000e+00> : vector<384x32xf32>
    %15 = tpu.matmul %0, %14, %cst_12 {dimension_numbers = #tpu.dot_dimension_numbers<[1], [0], [0], [1], [0, 0, 1, 1], [], []>} : vector<384x384xbf16>, vector<384x32xbf16>, vector<384x32xf32> -> vector<384x32xf32>
    %c0_13 = arith.constant 0 : index
    %c0_14 = arith.constant 0 : index
    %16 = vector.load %arg5[%c0_13, %c0_14] : memref<32x128xf32, #tpu.memory_space<vmem>>, vector<32x128xf32>
    %cst_15 = arith.constant dense<0.000000e+00> : vector<384x128xf32>
    %17 = tpu.matmul %13, %16, %cst_15 {dimension_numbers = #tpu.dot_dimension_numbers<[1], [0], [0], [1], [0, 0, 1, 1], [], []>} : vector<384x32xf32>, vector<32x128xf32>, vector<384x128xf32> -> vector<384x128xf32>
    %c0_16 = arith.constant 0 : index
    %c0_17 = arith.constant 0 : index
    %18 = vector.load %arg6[%c0_16, %c0_17] : memref<32x128xf32, #tpu.memory_space<vmem>>, vector<32x128xf32>
    %cst_18 = arith.constant dense<0.000000e+00> : vector<384x128xf32>
    %19 = tpu.matmul %15, %18, %cst_18 {dimension_numbers = #tpu.dot_dimension_numbers<[1], [0], [0], [1], [0, 0, 1, 1], [], []>} : vector<384x32xf32>, vector<32x128xf32>, vector<384x128xf32> -> vector<384x128xf32>
    %20 = arith.addf %17, %19 : vector<384x128xf32>
    %c0_19 = arith.constant 0 : index
    %c0_20 = arith.constant 0 : index
    %21 = vector.load %arg7[%c0_19, %c0_20] : memref<1x128xf32, #tpu.memory_space<vmem>>, vector<1x128xf32>
    %22 = vector.broadcast %21 : vector<1x128xf32> to vector<384x128xf32>
    %23 = arith.addf %20, %22 : vector<384x128xf32>
    %24 = tpu.iota {dimensions = array<i32: 1>} : vector<384x128xi32>
    %c4_i32 = arith.constant 4 : i32
    %25 = vector.broadcast %c4_i32 : i32 to vector<384x128xi32>
    %26 = arith.cmpi slt, %24, %25 : vector<384x128xi32>
    %cst_21 = arith.constant 0xFF800000 : f32
    %27 = vector.broadcast %cst_21 : f32 to vector<384x128xf32>
    %28 = arith.select %26, %23, %27 : vector<384x128xi1>, vector<384x128xf32>
    %cst_22 = arith.constant dense<0xFF800000> : vector<384xf32>
    %29 = vector.multi_reduction <maximumf>, %28, %cst_22 [1] : vector<384x128xf32> to vector<384xf32>
    %30 = vector.shape_cast %29 : vector<384xf32> to vector<384x1xf32>
    %31 = vector.broadcast %30 : vector<384x1xf32> to vector<384x128xf32>
    %32 = arith.subf %23, %31 : vector<384x128xf32>
    %33 = math.exp %32 : vector<384x128xf32>
    %cst_23 = arith.constant 0.000000e+00 : f32
    %34 = vector.broadcast %cst_23 : f32 to vector<384x128xf32>
    %35 = arith.select %26, %33, %34 : vector<384x128xi1>, vector<384x128xf32>
    %cst_24 = arith.constant dense<0.000000e+00> : vector<384xf32>
    %36 = vector.multi_reduction <add>, %35, %cst_24 [1] : vector<384x128xf32> to vector<384xf32>
    %37 = vector.shape_cast %36 : vector<384xf32> to vector<384x1xf32>
    %38 = math.log %37 : vector<384x1xf32>
    %39 = vector.broadcast %38 : vector<384x1xf32> to vector<384x128xf32>
    %40 = arith.subf %32, %39 : vector<384x128xf32>
    %c0_25 = arith.constant 0 : index
    %c0_26 = arith.constant 0 : index
    %41 = vector.load %arg8[%c0_25, %c0_26] : memref<384x128xf32, #tpu.memory_space<vmem>>, vector<384x128xf32>
    tpu.vector_store %arg8[%c0_25, %c0_26], %40 {strides = array<i32>} : memref<384x128xf32, #tpu.memory_space<vmem>>, vector<384x128xf32>,
    return
  }
}

</mosaic_0001>

<bundles_post_ra>
// kernel: tpu_custom_call.1
= control target key start
LH: loop header
LB: loop body
LE: loop exit
PB: predicated region body
PF: predicated region fallthrough
CT: control target
= control target key end

     0   :  { %13 = vsyncpa [#allocation3], 0  ;;  %s6960_s0 = inlined_call_operand.hbm [shape: bf16[384,384], index: 0, kind: input, shape index: {}]   ;;  %s6961_s1 = inlined_call_operand.vmem [shape: bf16[384,8], index: 1, kind: input, shape index: {}]   ;;  %s6962_s2 = inlined_call_operand.vmem [shape: f32[8,32], index: 2, kind: input, shape index: {}]   ;;  %s6963_s3 = inlined_call_operand.vmem [shape: f32[8,32], index: 3, kind: input, shape index: {}]   ;;  %s6964_s4 = inlined_call_operand.vmem [shape: f32[1,32], index: 4, kind: input, shape index: {}]   ;;  %s6965_s5 = inlined_call_operand.vmem [shape: f32[32,128], index: 5, kind: input, shape index: {}]   ;;  %s6966_s6 = inlined_call_operand.vmem [shape: f32[32,128], index: 6, kind: input, shape index: {}]   ;;  %s6967_s7 = inlined_call_operand.vmem [shape: f32[1,128], index: 7, kind: input, shape index: {}]   ;;  %s6968_s8 = inlined_call_operand.hbm [shape: f32[384,128], index: 8, kind: output, shape index: {}]  }
   0x1   :  { %14 = vsyncpa [#allocation4], 0  ;;  %s19_s29 = sshll.u32 %s6960_s0, 4  ;;  %s4532_s30 = smov [#allocation2]   ;;  %s20_s29 = int_to_ptr.hbm [resolvable:$true] %s19_s29 }
   0x2   :  { %s21_s9 = sshll.u32 %s4532_s30, 4  ;;  %s4533_s10 = smov 192   ;;  %s22_s9 = int_to_ptr.vmem [resolvable:$true] %s21_s9 }
   0x3   :  { %s4534_s11 = smov 12  }
   0x4   :  { %27 = dma.hbm_to_vmem [thread:$0]  %s20_s29, 9216, %s22_s9, [#allocation3], %s4533_s10, %s4533_s10, %s4534_s11  }
   0x5   :  { %4528 = dma.done.wait [#allocation3], 9216  }
   0x6   :  { %4529 = vsyncadd [#allocation3], 4294958080  ;;  %v4249_v0 = vld [vmem:[%s6961_s1 + $0x38] sm:$0xff]  ;;  %v4248_v2 = vld [vmem:[%s6961_s1 + $0x30] sm:$0xff]  ;;  %vm1155_vm0 = vcmask 64512   ;;  %vm2285_vm1 = vcmask 261120  }
   0x7   :  { %v4265_v1 = vld [vmem:[%s6961_s1 + $0xb8] sm:$0xff]  ;;  %4266 = vmatpush.bf16.msra.mxu1 %v4249_v0  ;;  %v4264_v3 = vld [vmem:[%s6961_s1 + $0xb0] sm:$0xff]  ;;  %718 = vmatpush.bf16.msra.mxu0 %v4249_v0  ;;  %v4247_v4 = vld [vmem:[%s6961_s1 + $0x28] sm:$0xff]  ;;  %s3581_s11 = sshll.u32 %s6968_s8, 4  ;;  %s4536_s12 = smov 128   ;;  %s3582_s11 = int_to_ptr.hbm [resolvable:$true] %s3581_s11 }
   0x8   :  { %976 = vmatpush.bf16.msra.mxu2 %v4265_v1  ;;  %v4263_v5 = vld [vmem:[%s6961_s1 + $0xa8] sm:$0xff]  ;;  %v4246_v6 = vld [vmem:[%s6961_s1 + $0x20] sm:$0xff]  ;;  %v4245_v8 = vld [vmem:[%s6961_s1 + $0x18] sm:$0xff]  ;;  %s4537_s13 = smov 8  }
   0x9   :  { %v4262_v7 = vld [vmem:[%s6961_s1 + $0xa0] sm:$0xff]  ;;  %v4261_v9 = vld [vmem:[%s6961_s1 + $0x98] sm:$0xff]  ;;  %v4244_v10 = vld [vmem:[%s6961_s1 + $0x10] sm:$0xff] }
   0xa   :  { %v4260_v11 = vld [vmem:[%s6961_s1 + $0x90] sm:$0xff]  ;;  %v4243_v12 = vld [vmem:[%s6961_s1 + $0x8] sm:$0xff]  ;;  %v4242_v14 = vld [vmem:[%s6961_s1] sm:$0xff] }
   0xb   :  { %4267 = vmatpush.bf16.msra.mxu1 %v4248_v2  ;;  %719 = vmatpush.bf16.msra.mxu0 %v4248_v2  ;;  %v4259_v13 = vld [vmem:[%s6961_s1 + $0x88] sm:$0xff]  ;;  %v4258_v15 = vld [vmem:[%s6961_s1 + $0x80] sm:$0xff]  ;;  %v4172_v19 = vld [vmem:[#allocation2 + $0x10] sm:$0xf0] }
   0xc   :  { %977 = vmatpush.bf16.msra.mxu2 %v4264_v3  ;;  %v3740_v16 = vld [vmem:[#allocation2 + $0x120] sm:$0xf]  ;;  %v4207_v17 = vld [vmem:[#allocation2 + $0x128] sm:$0xf0]  ;;  %v3604_v18 = vld [vmem:[#allocation2 + $0x8] sm:$0xf] }
   0xd   :  { %v4634_v20 = vor.u32 %v4207_v17, %v3740_v16  ;;  %v4636_v21 = vor.u32 %v4172_v19, %v3604_v18  ;;  %v3752_v22 = vld [vmem:[#allocation2 + $0x138] sm:$0xf]  ;;  %v4210_v23 = vld [vmem:[#allocation2 + $0x140] sm:$0xf0]  ;;  %v3616_v24 = vld [vmem:[#allocation2 + $0x20] sm:$0xf] }
   0xe   :  { %v4175_v25 = vld [vmem:[#allocation2 + $0x28] sm:$0xf0]  ;;  %v4640_v26 = vor.u32 %v4210_v23, %v3752_v22  ;;  %v3764_v28 = vld [vmem:[#allocation2 + $0x150] sm:$0xf]  ;;  %v4213_v29 = vld [vmem:[#allocation2 + $0x158] sm:$0xf0] }
   0xf   :  { %4268 = vmatpush.bf16.msra.mxu1 %v4247_v4  ;;  %720 = vmatpush.bf16.msra.mxu0 %v4247_v4  ;;  %7121 = vst [vmem:[#allocation8_spill] sm:$0xff] %v4634_v20  ;;  %v4642_v27 = vor.u32 %v4175_v25, %v3616_v24  ;;  %v3628_v30 = vld [vmem:[#allocation2 + $0x38] sm:$0xf]  ;;  %v4178_v31 = vld [vmem:[#allocation2 + $0x40] sm:$0xf0]  ;;  %v4646_v32 = vor.u32 %v4213_v29, %v3764_v28  ;;  %v4252_v25 = vld [vmem:[%s6961_s1 + $0x50] sm:$0xff] }
  0x10   :  { %978 = vmatpush.bf16.msra.mxu2 %v4263_v5  ;;  %7122 = vst [vmem:[#allocation9_spill] sm:$0xff] %v4636_v21  ;;  %v4648_v33 = vor.u32 %v4178_v31, %v3628_v30  ;;  %v3776_v34 = vld [vmem:[#allocation2 + $0x168] sm:$0xf]  ;;  %v4216_v35 = vld [vmem:[#allocation2 + $0x170] sm:$0xf0]  ;;  %v4254_v17 = vld [vmem:[%s6961_s1 + $0x60] sm:$0xff] }
  0x11   :  { %7123 = vst [vmem:[#allocation10_spill] sm:$0xff] %v4640_v26  ;;  %v3640_v36 = vld [vmem:[#allocation2 + $0x50] sm:$0xf]  ;;  %v4181_v37 = vld [vmem:[#allocation2 + $0x58] sm:$0xf0]  ;;  %v4652_v38 = vor.u32 %v4216_v35, %v3776_v34  ;;  %v4251_v31 = vld [vmem:[%s6961_s1 + $0x48] sm:$0xff] }
  0x12   :  { %7124 = vst [vmem:[#allocation11_spill] sm:$0xff] %v4642_v27  ;;  %v4654_v39 = vor.u32 %v4181_v37, %v3640_v36  ;;  %v3788_v40 = vld [vmem:[#allocation2 + $0x180] sm:$0xf]  ;;  %v4219_v41 = vld [vmem:[#allocation2 + $0x188] sm:$0xf0]  ;;  %v4253_v23 = vld [vmem:[%s6961_s1 + $0x58] sm:$0xff] }
  0x13   :  { %4269 = vmatpush.bf16.msra.mxu1 %v4246_v6  ;;  %721 = vmatpush.bf16.msra.mxu0 %v4246_v6  ;;  %7125 = vst [vmem:[#allocation12_spill] sm:$0xff] %v4646_v32  ;;  %v3652_v42 = vld [vmem:[#allocation2 + $0x68] sm:$0xf]  ;;  %v4184_v43 = vld [vmem:[#allocation2 + $0x70] sm:$0xf0]  ;;  %v4658_v44 = vor.u32 %v4219_v41, %v3788_v40 }
  0x14   :  { %979 = vmatpush.bf16.msra.mxu2 %v4262_v7  ;;  %7126 = vst [vmem:[#allocation13_spill] sm:$0xff] %v4648_v33  ;;  %v4660_v45 = vor.u32 %v4184_v43, %v3652_v42  ;;  %v3800_v46 = vld [vmem:[#allocation2 + $0x198] sm:$0xf]  ;;  %v4222_v47 = vld [vmem:[#allocation2 + $0x1a0] sm:$0xf0] }
  0x15   :  { %7127 = vst [vmem:[#allocation14_spill] sm:$0xff] %v4652_v38  ;;  %v3664_v48 = vld [vmem:[#allocation2 + $0x80] sm:$0xf]  ;;  %v4187_v49 = vld [vmem:[#allocation2 + $0x88] sm:$0xf0]  ;;  %v4664_v50 = vor.u32 %v4222_v47, %v3800_v46  ;;  %v4257_v7 = vld [vmem:[%s6961_s1 + $0x78] sm:$0xff] }
  0x16   :  { %7128 = vst [vmem:[#allocation15_spill] sm:$0xff] %v4654_v39  ;;  %v4666_v51 = vor.u32 %v4187_v49, %v3664_v48  ;;  %v3812_v52 = vld [vmem:[#allocation2 + $0x1b0] sm:$0xf]  ;;  %v4225_v53 = vld [vmem:[#allocation2 + $0x1b8] sm:$0xf0]  ;;  %v4250_v42 = vld [vmem:[%s6961_s1 + $0x40] sm:$0xff] }
  0x17   :  { %4270 = vmatpush.bf16.msra.mxu1 %v4245_v8  ;;  %722 = vmatpush.bf16.msra.mxu0 %v4245_v8  ;;  %7129 = vst [vmem:[#allocation16_spill] sm:$0xff] %v4658_v44  ;;  %v3676_v54 = vld [vmem:[#allocation2 + $0x98] sm:$0xf]  ;;  %v4190_v55 = vld [vmem:[#allocation2 + $0xa0] sm:$0xf0]  ;;  %v4670_v56 = vor.u32 %v4225_v53, %v3812_v52 }
  0x18   :  { %980 = vmatpush.bf16.msra.mxu2 %v4261_v9  ;;  %7130 = vst [vmem:[#allocation17_spill] sm:$0xff] %v4660_v45  ;;  %v4672_v57 = vor.u32 %v4190_v55, %v3676_v54  ;;  %v3824_v58 = vld [vmem:[#allocation2 + $0x1c8] sm:$0xf]  ;;  %v4228_v59 = vld [vmem:[#allocation2 + $0x1d0] sm:$0xf0] }
  0x19   :  { %7131 = vst [vmem:[#allocation18_spill] sm:$0xff] %v4664_v50  ;;  %v3688_v60 = vld [vmem:[#allocation2 + $0xb0] sm:$0xf]  ;;  %v4193_v61 = vld [vmem:[#allocation2 + $0xb8] sm:$0xf0]  ;;  %v4676_v62 = vor.u32 %v4228_v59, %v3824_v58 }
  0x1a   :  { %7132 = vst [vmem:[#allocation19_spill] sm:$0xff] %v4666_v51  ;;  %v4678_v63 = vor.u32 %v4193_v61, %v3688_v60  ;;  %v3836_v0 = vld [vmem:[#allocation2 + $0x1e0] sm:$0xf]  ;;  %v4231_v1 = vld [vmem:[#allocation2 + $0x1e8] sm:$0xf0]  ;;  %v4256_v9 = vld [vmem:[%s6961_s1 + $0x70] sm:$0xff] }
  0x1b   :  { %4271 = vmatpush.bf16.msra.mxu1 %v4244_v10  ;;  %723 = vmatpush.bf16.msra.mxu0 %v4244_v10  ;;  %7133 = vst [vmem:[#allocation20_spill] sm:$0xff] %v4670_v56  ;;  %v3700_v2 = vld [vmem:[#allocation2 + $0xc8] sm:$0xf]  ;;  %v4196_v3 = vld [vmem:[#allocation2 + $0xd0] sm:$0xf0]  ;;  %v4682_v4 = vor.u32 %v4231_v1, %v3836_v0 }
  0x1c   :  { %981 = vmatpush.bf16.msra.mxu2 %v4260_v11  ;;  %7134 = vst [vmem:[#allocation21_spill] sm:$0xff] %v4672_v57  ;;  %v4684_v5 = vor.u32 %v4196_v3, %v3700_v2  ;;  %v4255_v11 = vld [vmem:[%s6961_s1 + $0x68] sm:$0xff]  ;;  %v3596_v29 = vld [vmem:[#allocation2] sm:$0xf]  ;;  %v3860_v35 = vld [vmem:[#allocation2 + $0x210] sm:$0xf] }
  0x1d   :  { %7135 = vst [vmem:[#allocation22_spill] sm:$0xff] %v4676_v62  ;;  %v4171_v30 = vld [vmem:[#allocation2 + $0x8] sm:$0xf0]  ;;  %v4237_v36 = vld [vmem:[#allocation2 + $0x218] sm:$0xf0] }
  0x1e   :  { %7136 = vst [vmem:[#allocation23_spill] sm:$0xff] %v4678_v63  ;;  %v4729_v34 = vor.u32 %v4171_v30, %v3596_v29  ;;  %v3724_v37 = vld [vmem:[#allocation2 + $0xf8] sm:$0xf]  ;;  %v4202_v40 = vld [vmem:[#allocation2 + $0x100] sm:$0xf0]  ;;  %v4737_v43 = vor.u32 %v4237_v36, %v3860_v35 }
  0x1f   :  { %4272 = vmatpush.bf16.msra.mxu1 %v4243_v12  ;;  %724 = vmatpush.bf16.msra.mxu0 %v4243_v12  ;;  %7137 = vst [vmem:[#allocation24_spill] sm:$0xff] %v4682_v4  ;;  %v3848_v12 = vld [vmem:[#allocation2 + $0x1f8] sm:$0xf]  ;;  %v4739_v46 = vor.u32 %v4202_v40, %v3724_v37  ;;  %v4174_v53 = vld [vmem:[#allocation2 + $0x20] sm:$0xf0] }
  0x20   :  { %982 = vmatpush.bf16.msra.mxu2 %v4259_v13  ;;  %7138 = vst [vmem:[#allocation25_spill] sm:$0xff] %v4684_v5  ;;  %v4234_v13 = vld [vmem:[#allocation2 + $0x200] sm:$0xf0]  ;;  %v3608_v52 = vld [vmem:[#allocation2 + $0x18] sm:$0xf] }
  0x21   :  { %v4708_v18 = vor.u32 %v4234_v13, %v3848_v12  ;;  %7141 = vst [vmem:[#allocation28_spill] sm:$0xff] %v4729_v34  ;;  %v4749_v54 = vor.u32 %v4174_v53, %v3608_v52  ;;  %v3872_v55 = vld [vmem:[#allocation2 + $0x228] sm:$0xf]  ;;  %v4240_v58 = vld [vmem:[#allocation2 + $0x230] sm:$0xf0] }
  0x22   :  { %7142 = vst [vmem:[#allocation29_spill] sm:$0xff] %v4737_v43  ;;  %v3736_v59 = vld [vmem:[#allocation2 + $0x110] sm:$0xf]  ;;  %v4205_v60 = vld [vmem:[#allocation2 + $0x118] sm:$0xf0]  ;;  %v4754_v0 = vor.u32 %v4240_v58, %v3872_v55 }
  0x23   :  { %4273 = vmatpush.bf16.msra.mxu1 %v4242_v14  ;;  %725 = vmatpush.bf16.msra.mxu0 %v4242_v14  ;;  %v3712_v14 = vld [vmem:[#allocation2 + $0xe0] sm:$0xf]  ;;  %7139 = vst [vmem:[#allocation26_spill] sm:$0xff] %v4708_v18  ;;  %v4756_v1 = vor.u32 %v4205_v60, %v3736_v59  ;;  %v4170_v13 = vld [vmem:[#allocation2 + $0x4] sm:$0xf] }
  0x24   :  { %983 = vmatpush.bf16.msra.mxu2 %v4258_v15  ;;  %v4199_v15 = vld [vmem:[#allocation2 + $0xe8] sm:$0xf0]  ;;  %7143 = vst [vmem:[#allocation30_spill] sm:$0xff] %v4739_v46  ;;  %v3632_v36 = vld [vmem:[#allocation2 + $0x48] sm:$0xf] }
  0x25   :  { %v4710_v19 = vor.u32 %v4199_v15, %v3712_v14  ;;  %7144 = vst [vmem:[#allocation31_spill] sm:$0xff] %v4749_v54  ;;  %v3598_v14 = vld [vmem:[#allocation2 + $0xc] sm:$0xf0]  ;;  %v3748_v15 = vld [vmem:[#allocation2 + $0x128] sm:$0xf] }
  0x26   :  { %786 = vmatmul.bf16.vlgmr.msra.gmra.mxu1 %v4634_v20  ;;  %726 = vmatmul.bf16.vlgmr.msra.gmra.mxu0 %v4729_v34  ;;  %7145 = vst [vmem:[#allocation32_spill] sm:$0xff] %v4754_v0  ;;  %v4180_v37 = vld [vmem:[#allocation2 + $0x50] sm:$0xf0]  ;;  %v3610_v52 = vld [vmem:[#allocation2 + $0x24] sm:$0xf0] }
  0x27   :  { %984 = vmatmul.bf16.vlgmr.msra.gmra.mxu2 %v4636_v21  ;;  %847 = vmatpush.bf16.msrb.mxu1 %v4257_v7  ;;  %7140 = vst [vmem:[#allocation27_spill] sm:$0xff] %v4710_v19  ;;  %v4783_v40 = vor.u32 %v4180_v37, %v3632_v36  ;;  %v3760_v53 = vld [vmem:[#allocation2 + $0x140] sm:$0xf]  ;;  %v4211_v55 = vld [vmem:[#allocation2 + $0x148] sm:$0xf0] }
  0x28   :  { %7146 = vst [vmem:[#allocation33_spill] sm:$0xff] %v4756_v1  ;;  %v4790_v60 = vor.u32 %v4211_v55, %v3760_v53  ;;  %v4176_v36 = vld [vmem:[#allocation2 + $0x34] sm:$0xf]  ;;  %v3622_v37 = vld [vmem:[#allocation2 + $0x3c] sm:$0xf0] }
  0x29   :  { %7154 = vst [vmem:[#allocation41_spill] sm:$0xff] %v4783_v40  ;;  %v4805_v55 = vor.u32 %v4176_v36, %v3622_v37  ;;  %v3634_v36 = vld [vmem:[#allocation2 + $0x54] sm:$0xf0]  ;;  %v3784_v37 = vld [vmem:[#allocation2 + $0x170] sm:$0xf] }
  0x2a   :  { %7156 = vst [vmem:[#allocation43_spill] sm:$0xff] %v4790_v60  ;;  %v3692_v21 = vld [vmem:[#allocation2 + $0xc0] sm:$0xf]  ;;  %v3704_v20 = vld [vmem:[#allocation2 + $0xd8] sm:$0xf] }
  0x2b   :  { %848 = vmatpush.bf16.msrb.mxu1 %v4256_v9  ;;  %v3620_v9 = vld [vmem:[#allocation2 + $0x30] sm:$0xf]  ;;  %7160 = vst [vmem:[#allocation47_spill] sm:$0xff] %v4805_v55 }
  0x2f   :  { %849 = vmatpush.bf16.msrb.mxu1 %v4255_v11  ;;  %v4177_v11 = vld [vmem:[#allocation2 + $0x38] sm:$0xf0] }
  0x30   :  { %v4766_v12 = vor.u32 %v4177_v11, %v3620_v9 }
  0x32   :  { %7149 = vst [vmem:[#allocation36_spill] sm:$0xff] %v4766_v12 }
  0x33   :  { %850 = vmatpush.bf16.msrb.mxu1 %v4254_v17  ;;  %v4208_v17 = vld [vmem:[#allocation2 + $0x130] sm:$0xf0] }
  0x34   :  { %v4773_v29 = vor.u32 %v4208_v17, %v3748_v15  ;;  %v4183_v15 = vld [vmem:[#allocation2 + $0x68] sm:$0xf0] }
  0x36   :  { %791 = vmatmul.bf16.gmra.mxu1 %v4640_v26  ;;  %731 = vmatmul.bf16.gmra.mxu0 %v4749_v54  ;;  %7151 = vst [vmem:[#allocation38_spill] sm:$0xff] %v4773_v29  ;;  %v4204_v54 = vld [vmem:[#allocation2 + $0x110] sm:$0xf0] }
  0x37   :  { %989 = vmatmul.bf16.gmra.mxu2 %v4642_v27  ;;  %851 = vmatpush.bf16.msrb.mxu1 %v4253_v23 }
  0x3b   :  { %852 = vmatpush.bf16.msrb.mxu1 %v4252_v25  ;;  %v4771_v25 = vor.u32 %v4170_v13, %v3598_v14  ;;  %v3644_v14 = vld [vmem:[#allocation2 + $0x60] sm:$0xf] }
  0x3c   :  { %v4800_v17 = vor.u32 %v4183_v15, %v3644_v14 }
  0x3d   :  { %7150 = vst [vmem:[#allocation37_spill] sm:$0xff] %v4771_v25 }
  0x3e   :  { %7159 = vst [vmem:[#allocation46_spill] sm:$0xff] %v4800_v17 }
  0x3f   :  { %853 = vmatpush.bf16.msrb.mxu1 %v4251_v31 }
  0x43   :  { %854 = vmatpush.bf16.msrb.mxu1 %v4250_v42  ;;  %v4173_v42 = vld [vmem:[#allocation2 + $0x1c] sm:$0xf] }
  0x44   :  { %v4788_v59 = vor.u32 %v4173_v42, %v3610_v52  ;;  %v3772_v42 = vld [vmem:[#allocation2 + $0x158] sm:$0xf]  ;;  %v4214_v52 = vld [vmem:[#allocation2 + $0x160] sm:$0xf0] }
  0x46   :  { %796 = vmatmul.bf16.gmra.mxu1 %v4646_v32  ;;  %736 = vmatmul.bf16.gmra.mxu0 %v4766_v12  ;;  %7155 = vst [vmem:[#allocation42_spill] sm:$0xff] %v4788_v59 }
  0x47   :  { %994 = vmatmul.bf16.gmra.mxu2 %v4648_v33 }
  0x56   :  { %801 = vmatmul.bf16.gmra.mxu1 %v4652_v38  ;;  %741 = vmatmul.bf16.gmra.mxu0 %v4783_v40 }
  0x57   :  { %999 = vmatmul.bf16.gmra.mxu2 %v4654_v39  ;;  %v4192_v39 = vld [vmem:[#allocation2 + $0xb0] sm:$0xf0] }
  0x66   :  { %806 = vmatmul.bf16.gmra.mxu1 %v4658_v44  ;;  %746 = vmatmul.bf16.gmra.mxu0 %v4800_v17  ;;  %v4195_v44 = vld [vmem:[#allocation2 + $0xc8] sm:$0xf0] }
  0x67   :  { %1004 = vmatmul.bf16.gmra.mxu2 %v4660_v45  ;;  %v4868_v38 = vor.u32 %v4195_v44, %v3692_v21 }
  0x69   :  { %7179 = vst [vmem:[#allocation66_spill] sm:$0xff] %v4868_v38 }
  0x76   :  { %811 = vmatmul.bf16.gmra.mxu1 %v4664_v50 }
  0x77   :  { %1009 = vmatmul.bf16.gmra.mxu2 %v4666_v51 }
  0x86   :  { %816 = vmatmul.bf16.gmra.mxu1 %v4670_v56 }
  0x87   :  { %1014 = vmatmul.bf16.gmra.mxu2 %v4672_v57  ;;  %v3668_v57 = vld [vmem:[#allocation2 + $0x90] sm:$0xf] }
  0x96   :  { %821 = vmatmul.bf16.gmra.mxu1 %v4676_v62 }
  0x97   :  { %1019 = vmatmul.bf16.gmra.mxu2 %v4678_v63 }
  0xa3   :  { %v4686_v6 = vpop.f32.mrf.mxu1 }
  0xa6   :  { %826 = vmatmul.bf16.gmra.mxu1 %v4682_v4 }
  0xa7   :  { %1024 = vmatmul.bf16.gmra.mxu2 %v4684_v5  ;;  %v4179_v5 = vld [vmem:[#allocation2 + $0x4c] sm:$0xf] }
  0xa8   :  { %v4822_v63 = vor.u32 %v4179_v5, %v3634_v36  ;;  %v3646_v5 = vld [vmem:[#allocation2 + $0x6c] sm:$0xf0]  ;;  %v3796_v36 = vld [vmem:[#allocation2 + $0x188] sm:$0xf] }
  0xaa   :  { %v4693_v8 = vpop.f32.mrf.mxu2  ;;  %7165 = vst [vmem:[#allocation52_spill] sm:$0xff] %v4822_v63 }
  0xab   :  { %v4698_v10 = vpop.f32.mrf.mxu1 }
  0xb2   :  { %v4703_v16 = vpop.f32.mrf.mxu2 }
  0xb3   :  { %v4712_v22 = vpop.f32.mrf.mxu1 }
  0xb6   :  { %831 = vmatmul.bf16.gmra.mxu1 %v4708_v18  ;;  %v4182_v18 = vld [vmem:[#allocation2 + $0x64] sm:$0xf] }
  0xb7   :  { %1029 = vmatmul.bf16.gmra.mxu2 %v4710_v19 }
  0xba   :  { %v4719_v24 = vpop.f32.mrf.mxu2 }
  0xbb   :  { %v4724_v28 = vpop.f32.mrf.mxu1 }
  0xc2   :  { %v4732_v41 = vpop.f32.mrf.mxu2 }
  0xc3   :  { %v4741_v47 = vpop.f32.mrf.mxu1 }
  0xc6   :  { %836 = vmatmul.bf16.gmra.mxu1 %v4737_v43  ;;  %v4189_v43 = vld [vmem:[#allocation2 + $0x98] sm:$0xf0] }
  0xc7   :  { %1034 = vmatmul.bf16.gmra.mxu2 %v4739_v46  ;;  %v4186_v46 = vld [vmem:[#allocation2 + $0x80] sm:$0xf0]  ;;  %v4834_v51 = vor.u32 %v4189_v43, %v3668_v57  ;;  %v3680_v43 = vld [vmem:[#allocation2 + $0xa8] sm:$0xf] }
  0xc8   :  { %v4849_v62 = vor.u32 %v4192_v39, %v3680_v43 }
  0xc9   :  { %7169 = vst [vmem:[#allocation56_spill] sm:$0xff] %v4834_v51 }
  0xca   :  { %v4745_v48 = vpop.f32.mrf.mxu2  ;;  %7174 = vst [vmem:[#allocation61_spill] sm:$0xff] %v4849_v62 }
  0xcb   :  { %v4747_v49 = vpop.f32.mrf.mxu1 }
  0xd2   :  { %v4752_v61 = vpop.f32.mrf.mxu2 }
  0xd3   :  { %v4758_v2 = vpop.f32.mrf.mxu1 }
  0xd4   :  { %7147 = vst [vmem:[#allocation34_spill] sm:$0xff] %v4758_v2 }
  0xd6   :  { %841 = vmatmul.bf16.gmra.mxu1 %v4754_v0 }
  0xd7   :  { %1039 = vmatmul.bf16.gmra.mxu2 %v4756_v1  ;;  %v3656_v1 = vld [vmem:[#allocation2 + $0x78] sm:$0xf] }
  0xd8   :  { %v4817_v19 = vor.u32 %v4186_v46, %v3656_v1 }
  0xda   :  { %v4762_v3 = vpop.f32.mrf.mxu2  ;;  %7164 = vst [vmem:[#allocation51_spill] sm:$0xff] %v4817_v19  ;;  %751 = vmatmul.bf16.gmra.mxu0 %v4817_v19  ;;  %v4232_v19 = vld [vmem:[#allocation2 + $0x1f0] sm:$0xf0] }
  0xdb   :  { %v4764_v7 = vpop.f32.mrf.mxu1 }
  0xdc   :  { %7148 = vst [vmem:[#allocation35_spill] sm:$0xff] %v4764_v7 }
  0xe2   :  { %v4769_v23 = vpop.f32.mrf.mxu2 }
  0xe3   :  { %v4775_v30 = vpop.f32.mrf.mxu1 }
  0xe4   :  { %7152 = vst [vmem:[#allocation39_spill] sm:$0xff] %v4775_v30 }
  0xe6   :  { %855 = vmatmul.bf16.vlgmr.msrb.gmra.mxu1 %v4771_v25 }
  0xe7   :  { %1044 = vmatmul.bf16.gmra.mxu2 %v4773_v29  ;;  %v4807_v29 = vor.u32 %v4214_v52, %v3772_v42  ;;  %v4217_v42 = vld [vmem:[#allocation2 + $0x178] sm:$0xf0] }
  0xe8   :  { %v4824_v0 = vor.u32 %v4217_v42, %v3784_v37  ;;  %v4220_v37 = vld [vmem:[#allocation2 + $0x190] sm:$0xf0]  ;;  %v4837_v42 = vor.u32 %v4182_v18, %v3646_v5  ;;  %v4185_v18 = vld [vmem:[#allocation2 + $0x7c] sm:$0xf]  ;;  %v3658_v5 = vld [vmem:[#allocation2 + $0x84] sm:$0xf0] }
  0xe9   :  { %7161 = vst [vmem:[#allocation48_spill] sm:$0xff] %v4807_v29  ;;  %v4839_v45 = vor.u32 %v4220_v37, %v3796_v36  ;;  %v3808_v36 = vld [vmem:[#allocation2 + $0x1a0] sm:$0xf]  ;;  %v4223_v37 = vld [vmem:[#allocation2 + $0x1a8] sm:$0xf0]  ;;  %v4854_v56 = vor.u32 %v4185_v18, %v3658_v5 }
  0xea   :  { %v4779_v31 = vpop.f32.mrf.mxu2  ;;  %7166 = vst [vmem:[#allocation53_spill] sm:$0xff] %v4824_v0  ;;  %756 = vmatmul.bf16.gmra.mxu0 %v4834_v51  ;;  %v4856_v27 = vor.u32 %v4223_v37, %v3808_v36  ;;  %v4188_v18 = vld [vmem:[#allocation2 + $0x94] sm:$0xf]  ;;  %v3670_v5 = vld [vmem:[#allocation2 + $0x9c] sm:$0xf0] }
  0xeb   :  { %v4781_v35 = vpop.f32.mrf.mxu1  ;;  %7170 = vst [vmem:[#allocation57_spill] sm:$0xff] %v4837_v42  ;;  %v3820_v36 = vld [vmem:[#allocation2 + $0x1b8] sm:$0xf]  ;;  %v4226_v37 = vld [vmem:[#allocation2 + $0x1c0] sm:$0xf0] }
  0xec   :  { %7153 = vst [vmem:[#allocation40_spill] sm:$0xff] %v4781_v35  ;;  %v3742_v35 = vld [vmem:[#allocation2 + $0x12c] sm:$0xf0] }
  0xed   :  { %7171 = vst [vmem:[#allocation58_spill] sm:$0xff] %v4839_v45 }
  0xee   :  { %7175 = vst [vmem:[#allocation62_spill] sm:$0xff] %v4854_v56 }
  0xef   :  { %7176 = vst [vmem:[#allocation63_spill] sm:$0xff] %v4856_v27 }
  0xf2   :  { %v4786_v58 = vpop.f32.mrf.mxu2 }
  0xf3   :  { %v4792_v9 = vpop.f32.mrf.mxu1 }
  0xf4   :  { %7157 = vst [vmem:[#allocation44_spill] sm:$0xff] %v4792_v9  ;;  %v4206_v9 = vld [vmem:[#allocation2 + $0x124] sm:$0xf] }
  0xf5   :  { %v4968_v7 = vor.u32 %v4206_v9, %v3742_v35  ;;  %v3754_v35 = vld [vmem:[#allocation2 + $0x144] sm:$0xf0] }
  0xf6   :  { %860 = vmatmul.bf16.gmra.mxu1 %v4788_v59  ;;  %v4229_v59 = vld [vmem:[#allocation2 + $0x1d8] sm:$0xf0] }
  0xf7   :  { %1049 = vmatmul.bf16.gmra.mxu2 %v4790_v60  ;;  %7199 = vst [vmem:[#allocation86_spill] sm:$0xff] %v4968_v7 }
  0xfa   :  { %v4796_v11 = vpop.f32.mrf.mxu2  ;;  %761 = vmatmul.bf16.gmra.mxu0 %v4849_v62 }
  0xfb   :  { %v4798_v13 = vpop.f32.mrf.mxu1 }
  0xfc   :  { %7158 = vst [vmem:[#allocation45_spill] sm:$0xff] %v4798_v13 }
 0x102   :  { %v4803_v53 = vpop.f32.mrf.mxu2 }
 0x103   :  { %v4809_v60 = vpop.f32.mrf.mxu1 }
 0x104   :  { %7162 = vst [vmem:[#allocation49_spill] sm:$0xff] %v4809_v60 }
 0x106   :  { %865 = vmatmul.bf16.gmra.mxu1 %v4805_v55 }
 0x107   :  { %1054 = vmatmul.bf16.gmra.mxu2 %v4807_v29 }
 0x10a   :  { %v4813_v14 = vpop.f32.mrf.mxu2  ;;  %766 = vmatmul.bf16.gmra.mxu0 %v4868_v38 }
 0x10b   :  { %v4815_v15 = vpop.f32.mrf.mxu1 }
 0x10c   :  { %7163 = vst [vmem:[#allocation50_spill] sm:$0xff] %v4815_v15 }
 0x112   :  { %v4820_v52 = vpop.f32.mrf.mxu2 }
 0x113   :  { %v4826_v29 = vpop.f32.mrf.mxu1 }
 0x114   :  { %7167 = vst [vmem:[#allocation54_spill] sm:$0xff] %v4826_v29 }
 0x116   :  { %870 = vmatmul.bf16.gmra.mxu1 %v4822_v63  ;;  %v4198_v63 = vld [vmem:[#allocation2 + $0xe0] sm:$0xf0] }
 0x117   :  { %1059 = vmatmul.bf16.gmra.mxu2 %v4824_v0 }
 0x11a   :  { %v4830_v46 = vpop.f32.mrf.mxu2 }
 0x11b   :  { %v4832_v1 = vpop.f32.mrf.mxu1 }
 0x11c   :  { %7168 = vst [vmem:[#allocation55_spill] sm:$0xff] %v4832_v1 }
 0x122   :  { %v4843_v0 = vpop.f32.mrf.mxu2 }
 0x123   :  { %v4841_v4 = vpop.f32.mrf.mxu1 }
 0x124   :  { %7172 = vst [vmem:[#allocation59_spill] sm:$0xff] %v4841_v4 }
 0x126   :  { %875 = vmatmul.bf16.gmra.mxu1 %v4837_v42 }
 0x127   :  { %1064 = vmatmul.bf16.gmra.mxu2 %v4839_v45  ;;  %v4866_v45 = vpop.f32.mrf.mxu0 }
 0x12a   :  { %v4851_v33 = vpop.f32.mrf.mxu2 }
 0x12b   :  { %v4847_v57 = vpop.f32.mrf.mxu1 }
 0x12c   :  { %7173 = vst [vmem:[#allocation60_spill] sm:$0xff] %v4847_v57  ;;  %v4238_v57 = vld [vmem:[#allocation2 + $0x220] sm:$0xf0] }
 0x12f   :  { %v4879_v42 = vpop.f32.mrf.mxu0 }
 0x132   :  { %v4862_v39 = vpop.f32.mrf.mxu2 }
 0x133   :  { %v4858_v50 = vpop.f32.mrf.mxu1 }
 0x134   :  { %7177 = vst [vmem:[#allocation64_spill] sm:$0xff] %v4858_v50  ;;  %v3868_v50 = vld [vmem:[#allocation2 + $0x218] sm:$0xf] }
 0x136   :  { %880 = vmatmul.bf16.gmra.mxu1 %v4854_v56  ;;  %v4873_v56 = vor.u32 %v4188_v18, %v3670_v5  ;;  %v4889_v18 = vor.u32 %v4198_v63, %v3704_v20  ;;  %v4191_v5 = vld [vmem:[#allocation2 + $0xac] sm:$0xf]  ;;  %v3716_v63 = vld [vmem:[#allocation2 + $0xf0] sm:$0xf] }
 0x137   :  { %1069 = vmatmul.bf16.gmra.mxu2 %v4856_v27  ;;  %v4875_v27 = vor.u32 %v4226_v37, %v3820_v36  ;;  %v4885_v44 = vpop.f32.mrf.mxu0  ;;  %v3682_v36 = vld [vmem:[#allocation2 + $0xb4] sm:$0xf0]  ;;  %v3832_v37 = vld [vmem:[#allocation2 + $0x1d0] sm:$0xf] }
 0x138   :  { %7180 = vst [vmem:[#allocation67_spill] sm:$0xff] %v4873_v56  ;;  %771 = vmatmul.bf16.gmra.mxu0 %v4889_v18  ;;  %v4892_v25 = vor.u32 %v4191_v5, %v3682_v36  ;;  %v3694_v36 = vld [vmem:[#allocation2 + $0xcc] sm:$0xf0] }
 0x139   :  { %7181 = vst [vmem:[#allocation68_spill] sm:$0xff] %v4875_v27 }
 0x13a   :  { %v4871_v32 = vpop.f32.mrf.mxu2  ;;  %7184 = vst [vmem:[#allocation71_spill] sm:$0xff] %v4889_v18  ;;  %v4201_v18 = vld [vmem:[#allocation2 + $0xf8] sm:$0xf0] }
 0x13b   :  { %v4864_v43 = vpop.f32.mrf.mxu1  ;;  %7185 = vst [vmem:[#allocation72_spill] sm:$0xff] %v4892_v25  ;;  %v4906_v51 = vor.u32 %v4201_v18, %v3716_v63 }
 0x13c   :  { %7178 = vst [vmem:[#allocation65_spill] sm:$0xff] %v4864_v43  ;;  %v3718_v43 = vld [vmem:[#allocation2 + $0xfc] sm:$0xf0] }
 0x13d   :  { %7189 = vst [vmem:[#allocation76_spill] sm:$0xff] %v4906_v51 }
 0x13f   :  { %v4898_v38 = vpop.f32.mrf.mxu0 }
 0x142   :  { %v4887_v55 = vpop.f32.mrf.mxu2 }
 0x143   :  { %v4877_v26 = vpop.f32.mrf.mxu1 }
 0x144   :  { %7182 = vst [vmem:[#allocation69_spill] sm:$0xff] %v4877_v26  ;;  %v4200_v26 = vld [vmem:[#allocation2 + $0xf4] sm:$0xf] }
 0x146   :  { %885 = vmatmul.bf16.gmra.mxu1 %v4873_v56  ;;  %v4894_v56 = vor.u32 %v4229_v59, %v3832_v37  ;;  %v4194_v59 = vld [vmem:[#allocation2 + $0xc4] sm:$0xf]  ;;  %v3844_v37 = vld [vmem:[#allocation2 + $0x1e8] sm:$0xf] }
 0x147   :  { %1074 = vmatmul.bf16.gmra.mxu2 %v4875_v27  ;;  %v4908_v5 = vpop.f32.mrf.mxu0  ;;  %v4913_v40 = vor.u32 %v4194_v59, %v3694_v36  ;;  %v3706_v59 = vld [vmem:[#allocation2 + $0xe4] sm:$0xf0]  ;;  %v4235_v36 = vld [vmem:[#allocation2 + $0x208] sm:$0xf0] }
 0x148   :  { %7186 = vst [vmem:[#allocation73_spill] sm:$0xff] %v4894_v56  ;;  %776 = vmatmul.bf16.gmra.mxu0 %v4906_v51  ;;  %v3728_v51 = vld [vmem:[#allocation2 + $0x108] sm:$0xf] }
 0x149   :  { %7190 = vst [vmem:[#allocation77_spill] sm:$0xff] %v4913_v40  ;;  %v4923_v34 = vor.u32 %v4204_v54, %v3728_v51 }
 0x14a   :  { %v4900_v62 = vpop.f32.mrf.mxu2 }
 0x14b   :  { %v4883_v21 = vpop.f32.mrf.mxu1  ;;  %7192 = vst [vmem:[#allocation79_spill] sm:$0xff] %v4923_v34 }
 0x14c   :  { %7183 = vst [vmem:[#allocation70_spill] sm:$0xff] %v4883_v21 }
 0x14f   :  { %v4919_v18 = vpop.f32.mrf.mxu0 }
 0x152   :  { %v4911_v17 = vpop.f32.mrf.mxu2 }
 0x153   :  { %v4896_v27 = vpop.f32.mrf.mxu1 }
 0x154   :  { %7187 = vst [vmem:[#allocation74_spill] sm:$0xff] %v4896_v27 }
 0x156   :  { %890 = vmatmul.bf16.gmra.mxu1 %v4892_v25  ;;  %v4915_v25 = vor.u32 %v4232_v19, %v3844_v37  ;;  %v3856_v19 = vld [vmem:[#allocation2 + $0x200] sm:$0xf] }
 0x157   :  { %1079 = vmatmul.bf16.gmra.mxu2 %v4894_v56  ;;  %v4926_v37 = vpop.f32.mrf.mxu0 }
 0x158   :  { %7191 = vst [vmem:[#allocation78_spill] sm:$0xff] %v4915_v25  ;;  %781 = vmatmul.bf16.gmra.mxu0 %v4923_v34 }
 0x15a   :  { %v4921_v63 = vpop.f32.mrf.mxu2 }
 0x15b   :  { %v4904_v20 = vpop.f32.mrf.mxu1 }
 0x15c   :  { %7188 = vst [vmem:[#allocation75_spill] sm:$0xff] %v4904_v20  ;;  %v4197_v20 = vld [vmem:[#allocation2 + $0xdc] sm:$0xf] }
 0x15f   :  { %v4936_v54 = vpop.f32.mrf.mxu0 }
 0x162   :  { %v4932_v21 = vpop.f32.mrf.mxu2 }
 0x163   :  { %v856_v56 = vpop.f32.mrf.mxu1 }
 0x164   :  { %v857_v30 = vadd.f32 %v856_v56, %v4866_v45  ;;  %v4209_v56 = vld [vmem:[#allocation2 + $0x13c] sm:$0xf] }
 0x166   :  { %895 = vmatmul.bf16.gmra.mxu1 %v4913_v40  ;;  %v4928_v40 = vor.u32 %v4197_v20, %v3706_v59  ;;  %v4940_v20 = vor.u32 %v4200_v26, %v3718_v43  ;;  %v4942_v59 = vor.u32 %v4238_v57, %v3868_v50  ;;  %v4203_v26 = vld [vmem:[#allocation2 + $0x10c] sm:$0xf]  ;;  %v3730_v43 = vld [vmem:[#allocation2 + $0x114] sm:$0xf0]  ;;  %v3880_v50 = vld [vmem:[#allocation2 + $0x230] sm:$0xf] }
 0x167   :  { %1084 = vmatmul.bf16.gmra.mxu2 %v4915_v25  ;;  %v4930_v25 = vor.u32 %v4235_v36, %v3856_v19  ;;  %v1154_v36 = vld [vmem:[%s6963_s3] sm:$0xff]  ;;  %v4241_v57 = vld [vmem:[#allocation2 + $0x238] sm:$0xf0]  ;;  %v4957_v15 = vor.u32 %v4203_v26, %v3730_v43 }
 0x168   :  { %7193 = vst [vmem:[#allocation80_spill] sm:$0xff] %v4928_v40  ;;  %1315 = vmatpush.msrb.mxu2 %v1154_v36  ;;  %4274 = vmatpush.msra.mxu3 %v1154_v36  ;;  %v4959_v60 = vor.u32 %v4241_v57, %v3880_v50  ;;  %v986_v50 = vadd.f32 %v4693_v8, %v857_v30 }
 0x169   :  { %7194 = vst [vmem:[#allocation81_spill] sm:$0xff] %v4930_v25  ;;  %v4985_v30 = vor.u32 %v4209_v56, %v3754_v35 }
 0x16a   :  { %v4938_v34 = vpop.f32.mrf.mxu2  ;;  %7195 = vst [vmem:[#allocation82_spill] sm:$0xff] %v4940_v20 }
 0x16b   :  { %v858_v12 = vpop.f32.mrf.mxu1  ;;  %7196 = vst [vmem:[#allocation83_spill] sm:$0xff] %v4942_v59 }
 0x16c   :  { %7197 = vst [vmem:[#allocation84_spill] sm:$0xff] %v4957_v15 }
 0x16d   :  { %7198 = vst [vmem:[#allocation85_spill] sm:$0xff] %v4959_v60 }
 0x16e   :  { %7200 = vst [vmem:[#allocation87_spill] sm:$0xff] %v4985_v30 }
 0x173   :  { %v861_v27 = vpop.f32.mrf.mxu1 }
 0x174   :  { %v862_v9 = vadd.f32 %v861_v27, %v4885_v44  ;;  %v3766_v44 = vld [vmem:[#allocation2 + $0x15c] sm:$0xf0] }
 0x176   :  { %900 = vmatmul.bf16.gmra.mxu1 %v4928_v40  ;;  %v4947_v40 = vpop.f32.mrf.mxu0 }
 0x177   :  { %1089 = vmatmul.bf16.gmra.mxu2 %v4930_v25  ;;  %v4951_v25 = vpop.f32.mrf.mxu2 }
 0x17b   :  { %v863_v51 = vpop.f32.mrf.mxu1 }
 0x17e   :  { %v4953_v1 = vpop.f32.mrf.mxu0 }
 0x17f   :  { %v4955_v29 = vpop.f32.mrf.mxu2 }
 0x183   :  { %v866_v19 = vpop.f32.mrf.mxu1 }
 0x184   :  { %v867_v56 = vadd.f32 %v866_v19, %v4908_v5 }
 0x186   :  { %905 = vmatmul.bf16.gmra.mxu1 %v4940_v20 }
 0x187   :  { %1094 = vmatmul.bf16.gmra.mxu2 %v4942_v59  ;;  %v4963_v59 = vpop.f32.mrf.mxu0  ;;  %v4965_v13 = vpop.f32.mrf.mxu2 }
 0x18b   :  { %v868_v4 = vpop.f32.mrf.mxu1 }
 0x18f   :  { %v4970_v43 = vpop.f32.mrf.mxu0  ;;  %v4973_v57 = vpop.f32.mrf.mxu2 }
 0x193   :  { %v871_v36 = vpop.f32.mrf.mxu1 }
 0x196   :  { %910 = vmatmul.bf16.gmra.mxu1 %v4957_v15 }
 0x197   :  { %1099 = vmatmul.bf16.gmra.mxu2 %v4959_v60  ;;  %v859_v60 = vadd.f32 %v858_v12, %v4879_v42  ;;  %v4979_v45 = vpop.f32.mrf.mxu0  ;;  %v4983_v8 = vpop.f32.mrf.mxu2  ;;  %v864_v12 = vadd.f32 %v863_v51, %v4898_v38  ;;  %v4212_v42 = vld [vmem:[#allocation2 + $0x154] sm:$0xf]  ;;  %v869_v38 = vadd.f32 %v868_v4, %v4919_v18 }
 0x198   :  { %v5000_v35 = vor.u32 %v4212_v42, %v3766_v44 }
 0x199   :  { %v988_v2 = vadd.f32 %v4703_v16, %v859_v60  ;;  %v993_v27 = vadd.f32 %v4732_v41, %v864_v12  ;;  %v998_v5 = vadd.f32 %v4752_v61, %v869_v38  ;;  %v4215_v12 = vld [vmem:[#allocation2 + $0x16c] sm:$0xf] }
 0x19a   :  { %7201 = vst [vmem:[#allocation88_spill] sm:$0xff] %v5000_v35 }
 0x19b   :  { %v873_v20 = vpop.f32.mrf.mxu1 }
 0x19c   :  { %v874_v4 = vadd.f32 %v873_v20, %v4936_v54 }
 0x19e   :  { %v1003_v38 = vadd.f32 %v4769_v23, %v874_v4  ;;  %v4221_v4 = vld [vmem:[#allocation2 + $0x19c] sm:$0xf] }
 0x19f   :  { %v4990_v16 = vpop.f32.mrf.mxu0 }
 0x1a3   :  { %v876_v26 = vpop.f32.mrf.mxu1 }
 0x1a6   :  { %915 = vmatmul.bf16.gmra.mxu1 %v4968_v7 }
 0x1a7   :  { %3978 = vmatmul.msk.f32.vlgmr.msrb.gmra.mxu2 %vm1155_vm0, %v986_v50  ;;  %v991_v50 = vadd.f32 %v4719_v24, %v862_v9  ;;  %v4998_v24 = vpop.f32.mrf.mxu0 }
 0x1ab   :  { %v878_v15 = vpop.f32.mrf.mxu1 }
 0x1ac   :  { %v879_v23 = vadd.f32 %v878_v15, %v4953_v1 }
 0x1af   :  { %3979 = vmatmul.msk.f32.gmra.mxu2 %vm1155_vm0, %v988_v2  ;;  %v4993_v2 = vpop.f32.mrf.mxu2  ;;  %v5008_v51 = vpop.f32.mrf.mxu0 }
 0x1b3   :  { %v881_v7 = vpop.f32.mrf.mxu1 }
 0x1b6   :  { %920 = vmatmul.bf16.gmra.mxu1 %v4985_v30 }
 0x1b7   :  { %3980 = vmatmul.msk.f32.gmra.mxu2 %vm1155_vm0, %v991_v50  ;;  %v996_v50 = vadd.f32 %v4745_v48, %v867_v56  ;;  %v5003_v30 = vpop.f32.mrf.mxu2  ;;  %v872_v48 = vadd.f32 %v871_v36, %v4926_v37  ;;  %v4218_v36 = vld [vmem:[#allocation2 + $0x184] sm:$0xf] }
 0x1b9   :  { %v1001_v56 = vadd.f32 %v4762_v3, %v872_v48  ;;  %v3790_v3 = vld [vmem:[#allocation2 + $0x18c] sm:$0xf0] }
 0x1bb   :  { %v883_v60 = vpop.f32.mrf.mxu1 }
 0x1bf   :  { %3981 = vmatmul.msk.f32.gmra.mxu2 %vm1155_vm0, %v993_v27  ;;  %v5011_v19 = vpop.f32.mrf.mxu2  ;;  %v3778_v27 = vld [vmem:[#allocation2 + $0x174] sm:$0xf0] }
 0x1c0   :  { %v5015_v42 = vor.u32 %v4215_v12, %v3778_v27  ;;  %v5034_v27 = vor.u32 %v4218_v36, %v3790_v3 }
 0x1c2   :  { %7202 = vst [vmem:[#allocation89_spill] sm:$0xff] %v5015_v42 }
 0x1c3   :  { %v886_v9 = vpop.f32.mrf.mxu1  ;;  %7203 = vst [vmem:[#allocation90_spill] sm:$0xff] %v5034_v27 }
 0x1c6   :  { %925 = vmatmul.bf16.gmra.mxu1 %v5000_v35 }
 0x1c7   :  { %3982 = vmatmul.msk.f32.gmra.mxu2 %vm1155_vm0, %v996_v50  ;;  %v5018_v50 = vpop.f32.mrf.mxu0  ;;  %v5023_v61 = vpop.f32.mrf.mxu2 }
 0x1cb   :  { %v888_v41 = vpop.f32.mrf.mxu1 }
 0x1cf   :  { %3983 = vmatmul.msk.f32.gmra.mxu2 %vm1155_vm0, %v998_v5  ;;  %v5029_v37 = vpop.f32.mrf.mxu0  ;;  %v877_v5 = vadd.f32 %v876_v26, %v4947_v40  ;;  %v5032_v12 = vpop.f32.mrf.mxu2  ;;  %v1008_v40 = vadd.f32 %v4786_v58, %v879_v23  ;;  %v884_v58 = vadd.f32 %v883_v60, %v4970_v43  ;;  %v4224_v23 = vld [vmem:[#allocation2 + $0x1b4] sm:$0xf]  ;;  %v889_v60 = vadd.f32 %v888_v41, %v4990_v16 }
 0x1d1   :  { %v1006_v54 = vadd.f32 %v4779_v31, %v877_v5  ;;  %v882_v31 = vadd.f32 %v881_v7, %v4963_v59  ;;  %v1013_v7 = vadd.f32 %v4803_v53, %v884_v58 }
 0x1d3   :  { %v891_v44 = vpop.f32.mrf.mxu1  ;;  %v1011_v15 = vadd.f32 %v4796_v11, %v882_v31  ;;  %v887_v11 = vadd.f32 %v886_v9, %v4979_v45  ;;  %v1018_v45 = vadd.f32 %v4820_v52, %v889_v60 }
 0x1d5   :  { %v1016_v43 = vadd.f32 %v4813_v14, %v887_v11  ;;  %v892_v14 = vadd.f32 %v891_v44, %v4998_v24 }
 0x1d6   :  { %930 = vmatmul.bf16.gmra.mxu1 %v5015_v42 }
 0x1d7   :  { %3984 = vmatmul.msk.f32.gmra.mxu2 %vm1155_vm0, %v1001_v56  ;;  %v5042_v20 = vpop.f32.mrf.mxu0  ;;  %v5047_v26 = vpop.f32.mrf.mxu2  ;;  %v1021_v41 = vadd.f32 %v4830_v46, %v892_v14 }
 0x1db   :  { %v5025_v18 = vpop.f32.mrf.mxu1 }
 0x1df   :  { %3985 = vmatmul.msk.f32.gmra.mxu2 %vm1155_vm0, %v1003_v38  ;;  %v3802_v38 = vld [vmem:[#allocation2 + $0x1a4] sm:$0xf0]  ;;  %v5053_v3 = vpop.f32.mrf.mxu0  ;;  %v5058_v1 = vpop.f32.mrf.mxu2 }
 0x1e0   :  { %v5051_v36 = vor.u32 %v4221_v4, %v3802_v38 }
 0x1e2   :  { %7204 = vst [vmem:[#allocation91_spill] sm:$0xff] %v5051_v36 }
 0x1e3   :  { %v5036_v48 = vpop.f32.mrf.mxu1 }
 0x1e6   :  { %935 = vmatmul.bf16.gmra.mxu1 %v5034_v27 }
 0x1e7   :  { %3986 = vmatmul.msk.f32.gmra.mxu2 %vm1155_vm0, %v1006_v54  ;;  %v5066_v59 = vpop.f32.mrf.mxu0  ;;  %v5070_v4 = vpop.f32.mrf.mxu2 }
 0x1eb   :  { %v5044_v56 = vpop.f32.mrf.mxu1 }
 0x1ef   :  { %3987 = vmatmul.msk.f32.gmra.mxu2 %vm1155_vm0, %v1008_v40  ;;  %v3814_v40 = vld [vmem:[#allocation2 + $0x1bc] sm:$0xf0]  ;;  %v779_v53 = vpop.f32.mrf.mxu0 }
 0x1f0   :  { %v5072_v38 = vor.u32 %v4224_v23, %v3814_v40  ;;  %v4227_v23 = vld [vmem:[#allocation2 + $0x1cc] sm:$0xf]  ;;  %v3826_v40 = vld [vmem:[#allocation2 + $0x1d4] sm:$0xf0] }
 0x1f2   :  { %7205 = vst [vmem:[#allocation92_spill] sm:$0xff] %v5072_v38 }
 0x1f3   :  { %v5055_v5 = vpop.f32.mrf.mxu1 }
 0x1f6   :  { %940 = vmatmul.bf16.gmra.mxu1 %v5051_v36 }
 0x1f7   :  { %3988 = vmatmul.msk.f32.gmra.mxu2 %vm1155_vm0, %v1011_v15  ;;  %v5080_v15 = vpop.f32.mrf.mxu2  ;;  %v782_v11 = vpop.f32.mrf.mxu0 }
 0x1fb   :  { %v5063_v54 = vpop.f32.mrf.mxu1 }
 0x1ff   :  { %3989 = vmatmul.msk.f32.gmra.mxu2 %vm1155_vm0, %v1013_v7  ;;  %v784_v24 = vpop.f32.mrf.mxu0 }
 0x203   :  { %v5074_v31 = vpop.f32.mrf.mxu1 }
 0x206   :  { %945 = vmatmul.bf16.gmra.mxu1 %v5072_v38  ;;  %v5090_v38 = vpop.f32.mrf.mxu2 }
 0x207   :  { %3990 = vmatmul.msk.f32.gmra.mxu2 %vm1155_vm0, %v1016_v43  ;;  %v5087_v43 = vor.u32 %v4227_v23, %v3826_v40 }
 0x209   :  { %7206 = vst [vmem:[#allocation93_spill] sm:$0xff] %v5087_v43 }
 0x20b   :  { %v908_v58 = vpop.f32.mrf.mxu1 }
 0x20c   :  { %v909_v9 = vadd.f32 %v908_v58, %v779_v53 }
 0x20e   :  { %v1038_v7 = vadd.f32 %v4911_v17, %v909_v9  ;;  %v894_v17 = vadd.f32 %v5025_v18, %v5008_v51  ;;  %v5099_v46 = vpop.f32.mrf.mxu2  ;;  %v3838_v9 = vld [vmem:[#allocation2 + $0x1ec] sm:$0xf0] }
 0x20f   :  { %3991 = vmatmul.msk.f32.gmra.mxu2 %vm1155_vm0, %v1018_v45 }
 0x210   :  { %3999 = vmatmul.msk.f32.vlgmr.msra.gmra.mxu3 %vm1155_vm0, %v1038_v7  ;;  %v1023_v60 = vadd.f32 %v4843_v0, %v894_v17  ;;  %v897_v7 = vadd.f32 %v5036_v48, %v5018_v50  ;;  %v3862_v17 = vld [vmem:[#allocation2 + $0x21c] sm:$0xf0] }
 0x212   :  { %v1026_v23 = vadd.f32 %v4851_v33, %v897_v7 }
 0x213   :  { %v911_v16 = vpop.f32.mrf.mxu1 }
 0x214   :  { %v912_v52 = vadd.f32 %v911_v16, %v782_v11  ;;  %v3850_v11 = vld [vmem:[#allocation2 + $0x204] sm:$0xf0]  ;;  %v902_v16 = vadd.f32 %v5055_v5, %v5042_v20  ;;  %v904_v20 = vadd.f32 %v5063_v54, %v5053_v3 }
 0x216   :  { %v1041_v53 = vadd.f32 %v4921_v63, %v912_v52  ;;  %950 = vmatmul.bf16.gmra.mxu1 %v5087_v43  ;;  %v4230_v63 = vld [vmem:[#allocation2 + $0x1e4] sm:$0xf]  ;;  %v5115_v14 = vpop.f32.mrf.mxu2  ;;  %v1033_v52 = vadd.f32 %v4887_v55, %v904_v20 }
 0x217   :  { %3992 = vmatmul.msk.f32.gmra.mxu2 %vm1155_vm0, %v1021_v41  ;;  %v5106_v51 = vor.u32 %v4230_v63, %v3838_v9  ;;  %v7211_v63 = vld [vmem:[#allocation34_spill] sm:$0xff] }
 0x218   :  { %4000 = vmatmul.msk.f32.gmra.mxu3 %vm1155_vm0, %v1041_v53 }
 0x219   :  { %7207 = vst [vmem:[#allocation94_spill] sm:$0xff] %v5106_v51 }
 0x21b   :  { %v913_v44 = vpop.f32.mrf.mxu1 }
 0x21c   :  { %v914_v58 = vadd.f32 %v913_v44, %v784_v24  ;;  %v907_v24 = vadd.f32 %v5074_v31, %v5066_v59 }
 0x21e   :  { %v1043_v45 = vadd.f32 %v4932_v21, %v914_v58  ;;  %v899_v21 = vadd.f32 %v5044_v56, %v5029_v37  ;;  %v5125_v37 = vpop.f32.mrf.mxu2  ;;  %v1036_v55 = vadd.f32 %v4900_v62, %v907_v24  ;;  %v4239_v58 = vld [vmem:[#allocation2 + $0x22c] sm:$0xf] }
 0x21f   :  { %3993 = vmatmul.msk.f32.gmra.mxu2 %vm1155_vm0, %v1023_v60 }
 0x220   :  { %4001 = vmatmul.msk.f32.gmra.mxu3 %vm1155_vm0, %v1043_v45  ;;  %v1028_v48 = vadd.f32 %v4862_v39, %v899_v21  ;;  %v1031_v39 = vadd.f32 %v4871_v32, %v902_v16  ;;  %v3874_v45 = vld [vmem:[#allocation2 + $0x234] sm:$0xf0] }
 0x221   :  { %v5159_v62 = vor.u32 %v4239_v58, %v3874_v45 }
 0x223   :  { %v916_v18 = vpop.f32.mrf.mxu1  ;;  %7210 = vst [vmem:[#allocation97_spill] sm:$0xff] %v5159_v62 }
 0x224   :  { %v917_v0 = vadd.f32 %v916_v18, %v4686_v6  ;;  %v7212_v18 = vld [vmem:[#allocation35_spill] sm:$0xff] }
 0x226   :  { %v1046_v40 = vadd.f32 %v4938_v34, %v917_v0  ;;  %955 = vmatmul.bf16.gmra.mxu1 %v5106_v51  ;;  %v4233_v34 = vld [vmem:[#allocation2 + $0x1fc] sm:$0xf]  ;;  %v5138_v53 = vpop.f32.mrf.mxu2 }
 0x227   :  { %3994 = vmatmul.msk.f32.gmra.mxu2 %vm1155_vm0, %v1026_v23  ;;  %v5127_v56 = vor.u32 %v4233_v34, %v3850_v11  ;;  %v7213_v0 = vld [vmem:[#allocation39_spill] sm:$0xff]  ;;  %v7215_v34 = vld [vmem:[#allocation44_spill] sm:$0xff] }
 0x228   :  { %4002 = vmatmul.msk.f32.gmra.mxu3 %vm1155_vm0, %v1046_v40 }
 0x229   :  { %7208 = vst [vmem:[#allocation95_spill] sm:$0xff] %v5127_v56 }
 0x22b   :  { %v918_v50 = vpop.f32.mrf.mxu1 }
 0x22c   :  { %v919_v33 = vadd.f32 %v918_v50, %v4698_v10 }
 0x22e   :  { %v1048_v6 = vadd.f32 %v4951_v25, %v919_v33  ;;  %v5150_v60 = vpop.f32.mrf.mxu2 }
 0x22f   :  { %3995 = vmatmul.msk.f32.gmra.mxu2 %vm1155_vm0, %v1028_v48 }
 0x230   :  { %4003 = vmatmul.msk.f32.gmra.mxu3 %vm1155_vm0, %v1048_v6 }
 0x233   :  { %v921_v41 = vpop.f32.mrf.mxu1 }
 0x234   :  { %v922_v10 = vadd.f32 %v921_v41, %v4712_v22  ;;  %v7216_v41 = vld [vmem:[#allocation45_spill] sm:$0xff] }
 0x236   :  { %v1051_v25 = vadd.f32 %v4955_v29, %v922_v10  ;;  %960 = vmatmul.bf16.gmra.mxu1 %v5127_v56  ;;  %v4236_v29 = vld [vmem:[#allocation2 + $0x214] sm:$0xf] }
 0x237   :  { %3996 = vmatmul.msk.f32.gmra.mxu2 %vm1155_vm0, %v1031_v39  ;;  %v5146_v3 = vor.u32 %v4236_v29, %v3862_v17 }
 0x238   :  { %4004 = vmatmul.msk.f32.gmra.mxu3 %vm1155_vm0, %v1051_v25  ;;  %v7217_v25 = vld [vmem:[#allocation49_spill] sm:$0xff] }
 0x239   :  { %7209 = vst [vmem:[#allocation96_spill] sm:$0xff] %v5146_v3 }
 0x23b   :  { %v923_v5 = vpop.f32.mrf.mxu1 }
 0x23c   :  { %v924_v32 = vadd.f32 %v923_v5, %v4724_v28 }
 0x23e   :  { %v1053_v22 = vadd.f32 %v4965_v13, %v924_v32 }
 0x23f   :  { %3997 = vmatmul.msk.f32.gmra.mxu2 %vm1155_vm0, %v1033_v52  ;;  %v7218_v52 = vld [vmem:[#allocation50_spill] sm:$0xff] }
 0x240   :  { %4005 = vmatmul.msk.f32.gmra.mxu3 %vm1155_vm0, %v1053_v22 }
 0x243   :  { %v926_v54 = vpop.f32.mrf.mxu1 }
 0x244   :  { %v927_v44 = vadd.f32 %v926_v54, %v4741_v47 }
 0x246   :  { %v1056_v28 = vadd.f32 %v4973_v57, %v927_v44  ;;  %965 = vmatmul.bf16.gmra.mxu1 %v5146_v3 }
 0x247   :  { %3998 = vmatmul.msk.f32.gmra.mxu2 %vm1155_vm0, %v1036_v55  ;;  %v7220_v55 = vld [vmem:[#allocation55_spill] sm:$0xff] }
 0x248   :  { %4006 = vmatmul.msk.f32.gmra.mxu3 %vm1155_vm0, %v1056_v28 }
 0x24b   :  { %v928_v13 = vpop.f32.mrf.mxu1 }
 0x24c   :  { %v929_v59 = vadd.f32 %v928_v13, %v4747_v49 }
 0x24e   :  { %v1058_v31 = vadd.f32 %v4983_v8, %v929_v59  ;;  %v7221_v59 = vld [vmem:[#allocation59_spill] sm:$0xff] }
 0x250   :  { %4007 = vmatmul.msk.f32.gmra.mxu3 %vm1155_vm0, %v1058_v31 }
 0x253   :  { %v931_v47 = vpop.f32.mrf.mxu1 }
 0x254   :  { %v932_v57 = vadd.f32 %v931_v47, %v7211_v63  ;;  %v7222_v47 = vld [vmem:[#allocation60_spill] sm:$0xff] }
 0x256   :  { %v1061_v9 = vadd.f32 %v4993_v2, %v932_v57  ;;  %970 = vmatmul.bf16.gmra.mxu1 %v5159_v62  ;;  %v7214_v2 = vld [vmem:[#allocation40_spill] sm:$0xff] }
 0x258   :  { %4008 = vmatmul.msk.f32.gmra.mxu3 %vm1155_vm0, %v1061_v9 }
 0x25b   :  { %v933_v7 = vpop.f32.mrf.mxu1 }
 0x25c   :  { %v934_v49 = vadd.f32 %v933_v7, %v7212_v18  ;;  %v7223_v7 = vld [vmem:[#allocation64_spill] sm:$0xff] }
 0x25e   :  { %v1063_v8 = vadd.f32 %v5003_v30, %v934_v49 }
 0x260   :  { %4009 = vmatmul.msk.f32.gmra.mxu3 %vm1155_vm0, %v1063_v8 }
 0x263   :  { %v936_v23 = vpop.f32.mrf.mxu1 }
 0x264   :  { %v937_v40 = vadd.f32 %v936_v23, %v7213_v0  ;;  %v7224_v23 = vld [vmem:[#allocation65_spill] sm:$0xff] }
 0x266   :  { %v1066_v21 = vadd.f32 %v5011_v19, %v937_v40 }
 0x268   :  { %4010 = vmatmul.msk.f32.gmra.mxu3 %vm1155_vm0, %v1066_v21 }
 0x26b   :  { %v938_v50 = vpop.f32.mrf.mxu1 }
 0x26c   :  { %v939_v48 = vadd.f32 %v938_v50, %v7214_v2  ;;  %v1153_v50 = vld [vmem:[%s6962_s2] sm:$0xff]  ;;  %v7225_v2 = vld [vmem:[#allocation69_spill] sm:$0xff] }
 0x26d   :  { %1620 = vmatpush.msrb.mxu3 %v1153_v50 }
 0x26e   :  { %v1068_v33 = vadd.f32 %v5023_v61, %v939_v48 }
 0x270   :  { %4011 = vmatmul.msk.f32.gmra.mxu3 %vm1155_vm0, %v1068_v33  ;;  %v1097_v33 = vpop.f32.mrf.mxu2 }
 0x273   :  { %v941_v6 = vpop.f32.mrf.mxu1 }
 0x274   :  { %v942_v11 = vadd.f32 %v941_v6, %v7215_v34 }
 0x276   :  { %v1071_v30 = vadd.f32 %v5032_v12, %v942_v11 }
 0x278   :  { %4012 = vmatmul.msk.f32.gmra.mxu3 %vm1155_vm0, %v1071_v30 }
 0x27b   :  { %v943_v16 = vpop.f32.mrf.mxu1 }
 0x27c   :  { %v944_v39 = vadd.f32 %v943_v16, %v7216_v41  ;;  %v1100_v16 = vpop.f32.mrf.mxu2 }
 0x27e   :  { %v1073_v19 = vadd.f32 %v5047_v26, %v944_v39  ;;  %v7219_v26 = vld [vmem:[#allocation54_spill] sm:$0xff] }
 0x280   :  { %4013 = vmatmul.msk.f32.gmra.mxu3 %vm1155_vm0, %v1073_v19  ;;  %v7227_v19 = vld [vmem:[#allocation74_spill] sm:$0xff] }
 0x283   :  { %v946_v10 = vpop.f32.mrf.mxu1 }
 0x284   :  { %v947_v20 = vadd.f32 %v946_v10, %v7217_v25 }
 0x286   :  { %v1076_v61 = vadd.f32 %v5058_v1, %v947_v20 }
 0x288   :  { %4014 = vmatmul.msk.f32.gmra.mxu3 %vm1155_vm0, %v1076_v61  ;;  %v7228_v61 = vld [vmem:[#allocation75_spill] sm:$0xff] }
 0x28b   :  { %v948_v5 = vpop.f32.mrf.mxu1 }
 0x28c   :  { %v949_v32 = vadd.f32 %v948_v5, %v7218_v52  ;;  %v1102_v52 = vpop.f32.mrf.mxu2 }
 0x28e   :  { %v1078_v12 = vadd.f32 %v5070_v4, %v949_v32 }
 0x290   :  { %4015 = vmatmul.msk.f32.gmra.mxu3 %vm1155_vm0, %v1078_v12  ;;  %v142_v12 = vld [vmem:[%s6961_s1] sm:$0xff]  }
 0x293   :  { %v951_v22 = vpop.f32.mrf.mxu1  ;;  %v5186_v29 = vpop.f32.mrf.mxu3 }
 0x294   :  { %v952_v17 = vadd.f32 %v951_v22, %v7219_v26  ;;  %v1105_v26 = vunpack.c.l.bf16 %v142_v12 }
 0x296   :  { %v1081_v24 = vadd.f32 %v5080_v15, %v952_v17 }
 0x298   :  { %4016 = vmatmul.msk.f32.gmra.mxu3 %vm1155_vm0, %v1081_v24  ;;  %v1106_v24 = vunpack.c.h.bf16 %v142_v12 }
 0x29b   :  { %v953_v54 = vpop.f32.mrf.mxu1  ;;  %v5191_v1 = vpop.f32.mrf.mxu3 }
 0x29c   :  { %v954_v44 = vadd.f32 %v953_v54, %v7220_v55  ;;  %v144_v54 = vld [vmem:[%s6961_s1 + $0x8] sm:$0xff]  }
 0x29e   :  { %v1083_v28 = vadd.f32 %v5090_v38, %v954_v44  ;;  %v1107_v44 = vunpack.c.l.bf16 %v144_v54 }
 0x2a0   :  { %4017 = vmatmul.msk.f32.gmra.mxu3 %vm1155_vm0, %v1083_v28 }
 0x2a3   :  { %v956_v4 = vpop.f32.mrf.mxu1  ;;  %v5196_v13 = vpop.f32.mrf.mxu3 }
 0x2a4   :  { %v957_v31 = vadd.f32 %v956_v4, %v7221_v59  ;;  %v1108_v4 = vunpack.c.h.bf16 %v144_v54  ;;  %v146_v59 = vld [vmem:[%s6961_s1 + $0x10] sm:$0xff]  }
 0x2a6   :  { %v1086_v58 = vadd.f32 %v5099_v46, %v957_v31 }
 0x2a8   :  { %4018 = vmatmul.msk.f32.gmra.mxu3 %vm1155_vm0, %v1086_v58  ;;  %v1109_v58 = vunpack.c.l.bf16 %v146_v59 }
 0x2ab   :  { %v958_v15 = vpop.f32.mrf.mxu1  ;;  %v5201_v45 = vpop.f32.mrf.mxu3 }
 0x2ac   :  { %v959_v63 = vadd.f32 %v958_v15, %v7222_v47  ;;  %v1110_v47 = vunpack.c.h.bf16 %v146_v59 }
 0x2ae   :  { %v1088_v57 = vadd.f32 %v5115_v14, %v959_v63  ;;  %v148_v63 = vld [vmem:[%s6961_s1 + $0x18] sm:$0xff]  }
 0x2b0   :  { %4019 = vmatmul.msk.f32.gmra.mxu3 %vm1155_vm0, %v1088_v57 }
 0x2b3   :  { %v961_v38 = vpop.f32.mrf.mxu1  ;;  %v5206_v9 = vpop.f32.mrf.mxu3 }
 0x2b4   :  { %v962_v18 = vadd.f32 %v961_v38, %v7223_v7  ;;  %v1111_v38 = vunpack.c.l.bf16 %v148_v63 }
 0x2b6   :  { %v1091_v49 = vadd.f32 %v5125_v37, %v962_v18  ;;  %v1112_v18 = vunpack.c.h.bf16 %v148_v63 }
 0x2b8   :  { %4020 = vmatmul.msk.f32.gmra.mxu3 %vm1155_vm0, %v1091_v49  ;;  %v150_v49 = vld [vmem:[%s6961_s1 + $0x20] sm:$0xff]  }
 0x2bb   :  { %v963_v46 = vpop.f32.mrf.mxu1  ;;  %v5211_v8 = vpop.f32.mrf.mxu3 }
 0x2bc   :  { %v964_v0 = vadd.f32 %v963_v46, %v7224_v23  ;;  %v1113_v23 = vunpack.c.l.bf16 %v150_v49 }
 0x2be   :  { %v1093_v40 = vadd.f32 %v5138_v53, %v964_v0  ;;  %v7226_v53 = vld [vmem:[#allocation70_spill] sm:$0xff] }
 0x2c0   :  { %4021 = vmatmul.msk.f32.gmra.mxu3 %vm1155_vm0, %v1093_v40  ;;  %v1114_v40 = vunpack.c.h.bf16 %v150_v49 }
 0x2c3   :  { %v966_v14 = vpop.f32.mrf.mxu1  ;;  %v5216_v21 = vpop.f32.mrf.mxu3 }
 0x2c4   :  { %v967_v37 = vadd.f32 %v966_v14, %v7225_v2  ;;  %v152_v14 = vld [vmem:[%s6961_s1 + $0x28] sm:$0xff]  }
 0x2c5   :  { %v1115_v2 = vunpack.c.l.bf16 %v152_v14 }
 0x2c6   :  { %v1096_v48 = vadd.f32 %v5150_v60, %v967_v37 }
 0x2c8   :  { %4022 = vmatmul.msk.f32.gmra.mxu3 %vm1155_vm0, %v1096_v48  ;;  %v1116_v48 = vunpack.c.h.bf16 %v152_v14 }
 0x2cb   :  { %v968_v6 = vpop.f32.mrf.mxu1  ;;  %v5224_v34 = vpop.f32.mrf.mxu3 }
 0x2cc   :  { %v969_v11 = vadd.f32 %v968_v6, %v7226_v53 }
 0x2ce   :  { %v1098_v30 = vadd.f32 %v1097_v33, %v969_v11  ;;  %v154_v33 = vld [vmem:[%s6961_s1 + $0x30] sm:$0xff]  }
 0x2cf   :  { %v1117_v53 = vunpack.c.l.bf16 %v154_v33 }
 0x2d0   :  { %4023 = vmatmul.msk.f32.gmra.mxu3 %vm1155_vm0, %v1098_v30  ;;  %v1118_v30 = vunpack.c.h.bf16 %v154_v33 }
 0x2d3   :  { %v971_v41 = vpop.f32.mrf.mxu1  ;;  %v5228_v39 = vpop.f32.mrf.mxu3 }
 0x2d4   :  { %v972_v10 = vadd.f32 %v971_v41, %v7227_v19  ;;  %v156_v41 = vld [vmem:[%s6961_s1 + $0x38] sm:$0xff]  }
 0x2d6   :  { %v1101_v25 = vadd.f32 %v1100_v16, %v972_v10  ;;  %v5298_v16 = vpop.f32.mrf.mxu2  ;;  %v1119_v10 = vunpack.c.l.bf16 %v156_v41 }
 0x2d8   :  { %4024 = vmatmul.msk.f32.gmra.mxu3 %vm1155_vm0, %v1101_v25 }
 0x2db   :  { %v973_v60 = vpop.f32.mrf.mxu1  ;;  %v5232_v20 = vpop.f32.mrf.mxu3 }
 0x2dc   :  { %v974_v5 = vadd.f32 %v973_v60, %v7228_v61  ;;  %v1120_v61 = vunpack.c.h.bf16 %v156_v41 }
 0x2de   :  { %v1103_v32 = vadd.f32 %v1102_v52, %v974_v5  ;;  %v5306_v25 = vpop.f32.mrf.mxu2  ;;  %v158_v52 = vld [vmem:[%s6961_s1 + $0x40] sm:$0xff]  }
 0x2df   :  { %v1121_v12 = vunpack.c.l.bf16 %v158_v52  ;;  %v1122_v54 = vunpack.c.h.bf16 %v158_v52  ;;  %v166_v52 = vld [vmem:[%s6961_s1 + $0x60] sm:$0xff]  }
 0x2e0   :  { %4025 = vmatmul.msk.f32.gmra.mxu3 %vm1155_vm0, %v1103_v32 }
 0x2e3   :  { %v5239_v22 = vpop.f32.mrf.mxu3 }
 0x2e6   :  { %v5312_v5 = vpop.f32.mrf.mxu2 }
 0x2e8   :  { %4026 = vmatmul.msk.f32.vlgmr.msrb.gmra.mxu3 %vm1155_vm0, %v1105_v26 }
 0x2eb   :  { %v5242_v17 = vpop.f32.mrf.mxu3 }
 0x2ec   :  { %7229 = vst [vmem:[#allocation34_spill] sm:$0xff] %v5242_v17 }
 0x2ee   :  { %v5320_v26 = vpop.f32.mrf.mxu2 }
 0x2f0   :  { %4027 = vmatmul.msk.f32.gmra.mxu3 %vm1155_vm0, %v1106_v24 }
 0x2f3   :  { %v5248_v55 = vpop.f32.mrf.mxu3 }
 0x2f4   :  { %7230 = vst [vmem:[#allocation35_spill] sm:$0xff] %v5248_v55 }
 0x2f8   :  { %4028 = vmatmul.msk.f32.gmra.mxu3 %vm1155_vm0, %v1107_v44  ;;  %v160_v44 = vld [vmem:[%s6961_s1 + $0x48] sm:$0xff]  }
 0x2f9   :  { %v1123_v59 = vunpack.c.l.bf16 %v160_v44  ;;  %v1124_v63 = vunpack.c.h.bf16 %v160_v44 }
 0x2fb   :  { %v5251_v28 = vpop.f32.mrf.mxu3 }
 0x2fc   :  { %7231 = vst [vmem:[#allocation39_spill] sm:$0xff] %v5251_v28 }
 0x300   :  { %4029 = vmatmul.msk.f32.gmra.mxu3 %vm1155_vm0, %v1108_v4 }
 0x303   :  { %v5257_v31 = vpop.f32.mrf.mxu3 }
 0x304   :  { %7232 = vst [vmem:[#allocation40_spill] sm:$0xff] %v5257_v31 }
 0x308   :  { %4030 = vmatmul.msk.f32.gmra.mxu3 %vm1155_vm0, %v1109_v58  ;;  %v5330_v58 = vpop.f32.mrf.mxu2 }
 0x30b   :  { %v5260_v15 = vpop.f32.mrf.mxu3 }
 0x30c   :  { %7233 = vst [vmem:[#allocation44_spill] sm:$0xff] %v5260_v15 }
 0x310   :  { %4031 = vmatmul.msk.f32.gmra.mxu3 %vm1155_vm0, %v1110_v47 }
 0x313   :  { %v5266_v57 = vpop.f32.mrf.mxu3 }
 0x314   :  { %7234 = vst [vmem:[#allocation45_spill] sm:$0xff] %v5266_v57 }
 0x318   :  { %4032 = vmatmul.msk.f32.gmra.mxu3 %vm1155_vm0, %v1111_v38  ;;  %v5335_v38 = vpop.f32.mrf.mxu2 }
 0x31b   :  { %v5269_v7 = vpop.f32.mrf.mxu3 }
 0x320   :  { %4033 = vmatmul.msk.f32.gmra.mxu3 %vm1155_vm0, %v1112_v18  ;;  %v162_v18 = vld [vmem:[%s6961_s1 + $0x50] sm:$0xff]  }
 0x323   :  { %v5275_v46 = vpop.f32.mrf.mxu3 }
 0x328   :  { %4034 = vmatmul.msk.f32.gmra.mxu3 %vm1155_vm0, %v1113_v23  ;;  %v1125_v23 = vunpack.c.l.bf16 %v162_v18 }
 0x32b   :  { %v5278_v0 = vpop.f32.mrf.mxu3 }
 0x330   :  { %4035 = vmatmul.msk.f32.gmra.mxu3 %vm1155_vm0, %v1114_v40  ;;  %v5344_v40 = vpop.f32.mrf.mxu2 }
 0x333   :  { %v5284_v50 = vpop.f32.mrf.mxu3 }
 0x338   :  { %4036 = vmatmul.msk.f32.gmra.mxu3 %vm1155_vm0, %v1115_v2  ;;  %v1126_v2 = vunpack.c.h.bf16 %v162_v18  ;;  %v5352_v33 = vpop.f32.mrf.mxu2 }
 0x33b   :  { %v5287_v37 = vpop.f32.mrf.mxu3 }
 0x340   :  { %4037 = vmatmul.msk.f32.gmra.mxu3 %vm1155_vm0, %v1116_v48  ;;  %v164_v48 = vld [vmem:[%s6961_s1 + $0x58] sm:$0xff]  }
 0x343   :  { %v5293_v6 = vpop.f32.mrf.mxu3 }
 0x348   :  { %4038 = vmatmul.msk.f32.gmra.mxu3 %vm1155_vm0, %v1117_v53 }
 0x34b   :  { %v5296_v11 = vpop.f32.mrf.mxu3 }
 0x350   :  { %4039 = vmatmul.msk.f32.gmra.mxu3 %vm1155_vm0, %v1118_v30  ;;  %v1127_v30 = vunpack.c.l.bf16 %v164_v48 }
 0x353   :  { %v5304_v19 = vpop.f32.mrf.mxu3 }
 0x358   :  { %4040 = vmatmul.msk.f32.gmra.mxu3 %vm1155_vm0, %v1119_v10  ;;  %v1128_v10 = vunpack.c.h.bf16 %v164_v48 }
 0x35b   :  { %v5309_v60 = vpop.f32.mrf.mxu3 }
 0x360   :  { %4041 = vmatmul.msk.f32.gmra.mxu3 %vm1155_vm0, %v1120_v61  ;;  %v1341_v61 = vpop.f32.mrf.mxu2 }
 0x363   :  { %v5317_v32 = vpop.f32.mrf.mxu3 }
 0x368   :  { %4042 = vmatmul.msk.f32.gmra.mxu3 %vm1155_vm0, %v1121_v12  ;;  %v1344_v44 = vpop.f32.mrf.mxu2 }
 0x36b   :  { %v5322_v24 = vpop.f32.mrf.mxu3 }
 0x370   :  { %4043 = vmatmul.msk.f32.gmra.mxu3 %vm1155_vm0, %v1122_v54  ;;  %v1129_v54 = vunpack.c.l.bf16 %v166_v52  ;;  %v1347_v18 = vpop.f32.mrf.mxu2 }
 0x373   :  { %v5328_v4 = vpop.f32.mrf.mxu3 }
 0x378   :  { %4044 = vmatmul.msk.f32.gmra.mxu3 %vm1155_vm0, %v1123_v59 }
 0x37b   :  { %v5333_v47 = vpop.f32.mrf.mxu3 }
 0x380   :  { %4045 = vmatmul.msk.f32.gmra.mxu3 %vm1155_vm0, %v1124_v63  ;;  %v1130_v63 = vunpack.c.h.bf16 %v166_v52  ;;  %v170_v52 = vld [vmem:[%s6961_s1 + $0x70] sm:$0xff]  }
 0x381   :  { %v1134_v51 = vunpack.c.h.bf16 %v170_v52 }
 0x383   :  { %v5341_v49 = vpop.f32.mrf.mxu3 }
 0x388   :  { %4046 = vmatmul.msk.f32.gmra.mxu3 %vm1155_vm0, %v1125_v23  ;;  %v168_v23 = vld [vmem:[%s6961_s1 + $0x68] sm:$0xff]  }
 0x389   :  { %v1131_v48 = vunpack.c.l.bf16 %v168_v23  ;;  %v1132_v62 = vunpack.c.h.bf16 %v168_v23  ;;  %v172_v23 = vld [vmem:[%s6961_s1 + $0x78] sm:$0xff]  }
 0x38a   :  { %v1136_v42 = vunpack.c.h.bf16 %v172_v23 }
 0x38b   :  { %v5346_v14 = vpop.f32.mrf.mxu3 }
 0x390   :  { %4047 = vmatmul.msk.f32.gmra.mxu3 %vm1155_vm0, %v1126_v2 }
 0x393   :  { %v5354_v53 = vpop.f32.mrf.mxu3 }
 0x398   :  { %4048 = vmatmul.msk.f32.gmra.mxu3 %vm1155_vm0, %v1127_v30  ;;  %v1350_v30 = vpop.f32.mrf.mxu2 }
 0x39b   :  { %v5357_v41 = vpop.f32.mrf.mxu3 }
 0x3a0   :  { %4049 = vmatmul.msk.f32.gmra.mxu3 %vm1155_vm0, %v1128_v10  ;;  %v1353_v3 = vpop.f32.mrf.mxu2 }
 0x3a3   :  { %v1643_v12 = vpop.f32.mrf.mxu3 }
 0x3a8   :  { %4050 = vmatmul.msk.f32.gmra.mxu3 %vm1155_vm0, %v1129_v54  ;;  %v1356_v43 = vpop.f32.mrf.mxu2 }
 0x3ab   :  { %v1646_v59 = vpop.f32.mrf.mxu3 }
 0x3b0   :  { %4051 = vmatmul.msk.f32.gmra.mxu3 %vm1155_vm0, %v1130_v63  ;;  %v1133_v63 = vunpack.c.l.bf16 %v170_v52  ;;  %v1359_v36 = vpop.f32.mrf.mxu2  ;;  %v174_v52 = vld [vmem:[%s6961_s1 + $0x80] sm:$0xff]  }
 0x3b3   :  { %v1649_v2 = vpop.f32.mrf.mxu3 }
 0x3b8   :  { %4052 = vmatmul.msk.f32.gmra.mxu3 %vm1155_vm0, %v1131_v48  ;;  %v1362_v17 = vpop.f32.mrf.mxu2 }
 0x3bb   :  { %v1652_v10 = vpop.f32.mrf.mxu3 }
 0x3bc   :  { %v1653_v15 = vadd.f32 %v1652_v10, %v1347_v18  ;;  %v1138_v10 = vunpack.c.h.bf16 %v174_v52 }
 0x3c0   :  { %4053 = vmatmul.msk.f32.gmra.mxu3 %vm1155_vm0, %v1132_v62  ;;  %v1135_v62 = vunpack.c.l.bf16 %v172_v23 }
 0x3c3   :  { %v1655_v54 = vpop.f32.mrf.mxu3 }
 0x3c8   :  { %4054 = vmatmul.msk.f32.gmra.mxu3 %vm1155_vm0, %v1133_v63 }
 0x3cb   :  { %v1658_v56 = vpop.f32.mrf.mxu3 }
 0x3cc   :  { %v1659_v28 = vadd.f32 %v1658_v56, %v1353_v3  ;;  %v1650_v56 = vadd.f32 %v1649_v2, %v1344_v44  ;;  %v1644_v2 = vadd.f32 %v1643_v12, %v5352_v33  ;;  %v176_v12 = vld [vmem:[%s6961_s1 + $0x88] sm:$0xff]  }
 0x3d0   :  { %4055 = vmatmul.msk.f32.gmra.mxu3 %vm1155_vm0, %v1134_v51  ;;  %v5386_v51 = vld [vmem:[%s6964_s4] ss:$0 sm:$0xff] }
 0x3d1   :  { %v5398_v57 = vadd.f32 %v5386_v51, %v1659_v28  ;;  %v1647_v28 = vadd.f32 %v1646_v59, %v1341_v61  ;;  %v1638_v59 = vadd.f32 %v5354_v53, %v5335_v38  ;;  %v1139_v38 = vunpack.c.l.bf16 %v176_v12 }
 0x3d3   :  { %v1661_v48 = vpop.f32.mrf.mxu3  ;;  %v7044_v44 = vmax.f32 %v5398_v57, 0.0  ;;  %v5429_v61 = vadd.f32 %v5386_v51, %v1647_v28 }
 0x3d4   :  { %v1662_v63 = vadd.f32 %v1661_v48, %v1356_v43 }
 0x3d5   :  { %v7048_v53 = vmax.f32 %v5429_v61, 0.0 }
 0x3d8   :  { %4056 = vmatmul.msk.f32.gmra.mxu3 %vm1155_vm0, %v1135_v62 }
 0x3db   :  { %v1664_v27 = vpop.f32.mrf.mxu3 }
 0x3dc   :  { %v1665_v35 = vadd.f32 %v1664_v27, %v1359_v36  ;;  %v1137_v27 = vunpack.c.l.bf16 %v174_v52  ;;  %v1656_v36 = vadd.f32 %v1655_v54, %v1350_v30  ;;  %v5414_v30 = vadd.f32 %v5386_v51, %v1653_v15 }
 0x3dd   :  { %v5419_v54 = vadd.f32 %v5386_v51, %v1650_v56  ;;  %v1641_v15 = vadd.f32 %v5357_v41, %v5344_v40  ;;  %v5439_v52 = vadd.f32 %v5386_v51, %v1644_v2  ;;  %v1632_v56 = vadd.f32 %v5341_v49, %v5320_v26 }
 0x3de   :  { %v5389_v62 = vadd.f32 %v5386_v51, %v1665_v35  ;;  %v5404_v3 = vadd.f32 %v5386_v51, %v1656_v36  ;;  %v7046_v33 = vmax.f32 %v5414_v30, 0.0  ;;  %v1626_v49 = vadd.f32 %v5328_v4, %v5306_v25 }
 0x3df   :  { %v7047_v41 = vmax.f32 %v5419_v54, 0.0  ;;  %v5451_v36 = vadd.f32 %v5386_v51, %v1641_v15  ;;  %v5474_v2 = vadd.f32 %v5386_v51, %v1632_v56  ;;  %v1623_v15 = vadd.f32 %v5322_v24, %v5298_v16  ;;  %v178_v24 = vld [vmem:[%s6961_s1 + $0x90] sm:$0xff]  }
 0x3e0   :  { %4057 = vmatmul.msk.f32.gmra.mxu3 %vm1155_vm0, %v1136_v42  ;;  %7235 = vst [vmem:[#allocation49_spill] sm:$0xff] %v5389_v62  ;;  %v5392_v42 = vadd.f32 %v5386_v51, %v1662_v63  ;;  %v7042_v43 = vmax.f32 %v5389_v62, 0.0  ;;  %v7045_v63 = vmax.f32 %v5404_v3, 0.0  ;;  %v1140_v25 = vunpack.c.h.bf16 %v176_v12 }
 0x3e1   :  { %v1870_v28 = vpack.c.bf16 %v7047_v41, %v7048_v53  ;;  %v7050_v26 = vmax.f32 %v5451_v36, 0.0  ;;  %v5498_v56 = vadd.f32 %v5386_v51, %v1623_v15  ;;  %v7240_v53 = vld [vmem:[#allocation41_spill] sm:$0xff] }
 0x3e2   :  { %v1871_v40 = vpack.c.bf16 %v7045_v63, %v7046_v33  ;;  %v7239_v33 = vld [vmem:[#allocation36_spill] sm:$0xff] }
 0x3e3   :  { %v1667_v55 = vpop.f32.mrf.mxu3 }
 0x3e4   :  { %v1668_v23 = vadd.f32 %v1667_v55, %v1362_v17  ;;  %v7043_v55 = vmax.f32 %v5392_v42, 0.0 }
 0x3e6   :  { %v5395_v31 = vadd.f32 %v5386_v51, %v1668_v23  ;;  %v1872_v48 = vpack.c.bf16 %v7043_v55, %v7044_v44 }
 0x3e8   :  { %7236 = vst [vmem:[#allocation50_spill] sm:$0xff] %v5395_v31  ;;  %4058 = vmatmul.msk.f32.gmra.mxu3 %vm1155_vm0, %v1137_v27  ;;  %v7041_v35 = vmax.f32 %v5395_v31, 0.0  ;;  %v1635_v27 = vadd.f32 %v5346_v14, %v5330_v58  ;;  %v7049_v58 = vmax.f32 %v5439_v52, 0.0  ;;  %v1629_v14 = vadd.f32 %v5333_v47, %v5312_v5 }
 0x3ea   :  { %v1873_v17 = vpack.c.bf16 %v7041_v35, %v7042_v43  ;;  %v1142_v35 = vunpack.c.h.bf16 %v178_v24 }
 0x3eb   :  { %v5411_v18 = vpop.f32.mrf.mxu3 }
 0x3ec   :  { %1890 = vmatpush.bf16.msrb.mxu0 %v1873_v17  ;;  %v5457_v17 = vadd.f32 %v5386_v51, %v1638_v59  ;;  %v5486_v59 = vadd.f32 %v5386_v51, %v1629_v14 }
 0x3ee   :  { %v7051_v5 = vmax.f32 %v5457_v17, 0.0  ;;  %v7054_v16 = vmax.f32 %v5486_v59, 0.0 }
 0x3f0   :  { %4059 = vmatmul.msk.f32.gmra.mxu3 %vm1155_vm0, %v1138_v10  ;;  %1891 = vmatpush.bf16.msrb.mxu0 %v1872_v48  ;;  %v5467_v10 = vadd.f32 %v5386_v51, %v1635_v27  ;;  %v1869_v48 = vpack.c.bf16 %v7049_v58, %v7050_v26 }
 0x3f2   :  { %v7052_v4 = vmax.f32 %v5467_v10, 0.0 }
 0x3f3   :  { %v5446_v23 = vpop.f32.mrf.mxu3 }
 0x3f4   :  { %1892 = vmatpush.bf16.msrb.mxu0 %v1871_v40  ;;  %v5490_v40 = vadd.f32 %v5386_v51, %v1626_v49  ;;  %v1868_v27 = vpack.c.bf16 %v7051_v5, %v7052_v4  ;;  %v1141_v49 = vunpack.c.l.bf16 %v178_v24  ;;  %v7241_v5 = vld [vmem:[#allocation46_spill] sm:$0xff] }
 0x3f8   :  { %4060 = vmatmul.msk.f32.gmra.mxu3 %vm1155_vm0, %v1139_v38  ;;  %1893 = vmatpush.bf16.msrb.mxu0 %v1870_v28  ;;  %v7053_v38 = vmax.f32 %v5474_v2, 0.0  ;;  %v7055_v28 = vmax.f32 %v5490_v40, 0.0 }
 0x3fa   :  { %v1867_v12 = vpack.c.bf16 %v7053_v38, %v7054_v16  ;;  %v7242_v16 = vld [vmem:[#allocation51_spill] sm:$0xff] }
 0x3fb   :  { %v5481_v47 = vpop.f32.mrf.mxu3 }
 0x3fc   :  { %1894 = vmatpush.bf16.msrb.mxu0 %v1869_v48  ;;  %v7056_v48 = vmax.f32 %v5498_v56, 0.0 }
 0x3fe   :  { %v1866_v15 = vpack.c.bf16 %v7055_v28, %v7056_v48 }
 0x400   :  { %4061 = vmatmul.msk.f32.gmra.mxu3 %vm1155_vm0, %v1140_v25  ;;  %1895 = vmatpush.bf16.msrb.mxu0 %v1868_v27  ;;  %v7237_v27 = vld [vmem:[#allocation28_spill] sm:$0xff] }
 0x403   :  { %v5510_v14 = vpop.f32.mrf.mxu3 }
 0x404   :  { %1896 = vmatpush.bf16.msrb.mxu0 %v1867_v12  ;;  %v180_v12 = vld [vmem:[%s6961_s1 + $0x98] sm:$0xff]  }
 0x405   :  { %v1143_v55 = vunpack.c.l.bf16 %v180_v12 }
 0x408   :  { %4062 = vmatmul.msk.f32.gmra.mxu3 %vm1155_vm0, %v1141_v49  ;;  %1897 = vmatpush.bf16.msrb.mxu0 %v1866_v15  ;;  %v7238_v49 = vld [vmem:[#allocation31_spill] sm:$0xff]  ;;  %v1144_v15 = vunpack.c.h.bf16 %v180_v12 }
 0x40b   :  { %v5518_v25 = vpop.f32.mrf.mxu3  ;;  %1898 = vmatmul.bf16.vlgmr.msrb.gmra.mxu0 %v7237_v27 }
 0x410   :  { %4063 = vmatmul.msk.f32.gmra.mxu3 %vm1155_vm0, %v1142_v35  ;;  %v182_v35 = vld [vmem:[%s6961_s1 + $0xa0] sm:$0xff]  }
 0x411   :  { %v1145_v27 = vunpack.c.l.bf16 %v182_v35  ;;  %v1146_v41 = vunpack.c.h.bf16 %v182_v35 }
 0x413   :  { %v5525_v43 = vpop.f32.mrf.mxu3 }
 0x418   :  { %4064 = vmatmul.msk.f32.gmra.mxu3 %vm1155_vm0, %v1143_v55  ;;  %v184_v55 = vld [vmem:[%s6961_s1 + $0xa8] sm:$0xff]  }
 0x419   :  { %v1148_v58 = vunpack.c.h.bf16 %v184_v55 }
 0x41b   :  { %v5528_v44 = vpop.f32.mrf.mxu3  ;;  %1903 = vmatmul.bf16.gmra.mxu0 %v7238_v49  ;;  %v1147_v49 = vunpack.c.l.bf16 %v184_v55 }
 0x420   :  { %4065 = vmatmul.msk.f32.gmra.mxu3 %vm1155_vm0, %v1144_v15 }
 0x423   :  { %v1691_v24 = vpop.f32.mrf.mxu3 }
 0x428   :  { %4066 = vmatmul.msk.f32.gmra.mxu3 %vm1155_vm0, %v1145_v27  ;;  %v5548_v27 = vpop.f32.mrf.mxu2 }
 0x42b   :  { %v1694_v63 = vpop.f32.mrf.mxu3  ;;  %1908 = vmatmul.bf16.gmra.mxu0 %v7239_v33  ;;  %v186_v33 = vld [vmem:[%s6961_s1 + $0xb0] sm:$0xff]  }
 0x430   :  { %4067 = vmatmul.msk.f32.gmra.mxu3 %vm1155_vm0, %v1146_v41  ;;  %v1149_v41 = vunpack.c.l.bf16 %v186_v33  ;;  %v1368_v4 = vpop.f32.mrf.mxu2 }
 0x433   :  { %v1697_v12 = vpop.f32.mrf.mxu3 }
 0x438   :  { %4068 = vmatmul.msk.f32.gmra.mxu3 %vm1155_vm0, %v1147_v49  ;;  %v1150_v49 = vunpack.c.h.bf16 %v186_v33  ;;  %v1371_v28 = vpop.f32.mrf.mxu2 }
 0x43b   :  { %v1700_v15 = vpop.f32.mrf.mxu3  ;;  %1913 = vmatmul.bf16.gmra.mxu0 %v7240_v53  ;;  %v188_v53 = vld [vmem:[%s6961_s1 + $0xb8] sm:$0xff]  }
 0x43c   :  { %v1151_v55 = vunpack.c.l.bf16 %v188_v53 }
 0x440   :  { %4069 = vmatmul.msk.f32.gmra.mxu3 %vm1155_vm0, %v1148_v58 }
 0x443   :  { %v1703_v35 = vpop.f32.mrf.mxu3 }
 0x448   :  { %4070 = vmatmul.msk.f32.gmra.mxu3 %vm1155_vm0, %v1149_v41  ;;  %v1152_v41 = vunpack.c.h.bf16 %v188_v53 }
 0x44b   :  { %v1706_v26 = vpop.f32.mrf.mxu3  ;;  %1918 = vmatmul.bf16.gmra.mxu0 %v7241_v5 }
 0x450   :  { %4071 = vmatmul.msk.f32.gmra.mxu3 %vm1155_vm0, %v1150_v49  ;;  %v1707_v49 = vadd.f32 %v1706_v26, %v5224_v34 }
 0x453   :  { %v1709_v58 = vpop.f32.mrf.mxu3 }
 0x454   :  { %v1710_v5 = vadd.f32 %v1709_v58, %v5228_v39  ;;  %v5574_v39 = vadd.f32 %v5386_v51, %v1707_v49 }
 0x456   :  { %7246 = vst [vmem:[#allocation60_spill] sm:$0xff] %v5574_v39 }
 0x458   :  { %4072 = vmatmul.msk.f32.gmra.mxu3 %vm1155_vm0, %v1151_v55  ;;  %v1704_v55 = vadd.f32 %v1703_v35, %v5216_v21  ;;  %v1695_v35 = vadd.f32 %v1694_v63, %v5201_v45  ;;  %v1689_v45 = vadd.f32 %v5528_v44, %v5191_v1 }
 0x45a   :  { %v5580_v21 = vadd.f32 %v5386_v51, %v1704_v55  ;;  %v5607_v63 = vadd.f32 %v5386_v51, %v1695_v35 }
 0x45b   :  { %v1712_v38 = vpop.f32.mrf.mxu3  ;;  %1923 = vmatmul.bf16.gmra.mxu0 %v7242_v16  ;;  %v5567_v16 = vadd.f32 %v5386_v51, %v1710_v5 }
 0x45c   :  { %v1713_v48 = vadd.f32 %v1712_v38, %v5232_v20  ;;  %v1701_v20 = vadd.f32 %v1700_v15, %v5211_v8  ;;  %v1374_v38 = vpop.f32.mrf.mxu2  ;;  %7247 = vst [vmem:[#allocation64_spill] sm:$0xff] %v5580_v21  ;;  %v7248_v15 = vld [vmem:[#allocation56_spill] sm:$0xff]  ;;  %v7063_v5 = vmax.f32 %v5580_v21, 0.0 }
 0x45d   :  { %7244 = vst [vmem:[#allocation55_spill] sm:$0xff] %v5567_v16 }
 0x45e   :  { %v5562_v31 = vadd.f32 %v5386_v51, %v1713_v48  ;;  %v7061_v48 = vmax.f32 %v5567_v16, 0.0  ;;  %v5592_v58 = vadd.f32 %v5386_v51, %v1701_v20  ;;  %7251 = vst [vmem:[#allocation70_spill] sm:$0xff] %v5607_v63 }
 0x460   :  { %4073 = vmatmul.msk.f32.gmra.mxu3 %vm1155_vm0, %v1152_v41  ;;  %7243 = vst [vmem:[#allocation54_spill] sm:$0xff] %v5562_v31  ;;  %v7060_v34 = vmax.f32 %v5562_v31, 0.0  ;;  %v7064_v49 = vmax.f32 %v5592_v58, 0.0 }
 0x461   :  { %7249 = vst [vmem:[#allocation65_spill] sm:$0xff] %v5592_v58 }
 0x462   :  { %v1879_v20 = vpack.c.bf16 %v7063_v5, %v7064_v49 }
 0x463   :  { %v1715_v33 = vpop.f32.mrf.mxu3 }
 0x464   :  { %v1716_v62 = vadd.f32 %v1715_v33, %v5239_v22  ;;  %v1698_v22 = vadd.f32 %v1697_v12, %v5206_v9  ;;  %v7062_v9 = vmax.f32 %v5574_v39, 0.0  ;;  %v1692_v12 = vadd.f32 %v1691_v24, %v5196_v13  ;;  %v1377_v1 = vpop.f32.mrf.mxu2  ;;  %v7267_v39 = vld [vmem:[#allocation8_spill] sm:$0xff] }
 0x465   :  { %v1686_v13 = vadd.f32 %v5525_v43, %v5186_v29  ;;  %v7066_v29 = vmax.f32 %v5607_v63, 0.0  ;;  %v1680_v43 = vadd.f32 %v5510_v14, %v1374_v38  ;;  %v1674_v14 = vadd.f32 %v5446_v23, %v1368_v4  ;;  %v7270_v63 = vld [vmem:[#allocation62_spill] sm:$0xff] }
 0x466   :  { %v5570_v53 = vadd.f32 %v5386_v51, %v1716_v62  ;;  %v5597_v41 = vadd.f32 %v5386_v51, %v1698_v22  ;;  %v1880_v33 = vpack.c.bf16 %v7061_v48, %v7062_v9  ;;  %v5613_v24 = vadd.f32 %v5386_v51, %v1692_v12  ;;  %v7260_v48 = vld [vmem:[#allocation37_spill] sm:$0xff] }
 0x467   :  { %v1683_v22 = vadd.f32 %v5518_v25, %v1377_v1  ;;  %v1677_v25 = vadd.f32 %v5481_v47, %v1371_v28  ;;  %v5643_v38 = vadd.f32 %v5386_v51, %v1680_v43  ;;  %v7257_v47 = vld [vmem:[#allocation61_spill] sm:$0xff]  ;;  %v1671_v28 = vadd.f32 %v5411_v18, %v5548_v27 }
 0x468   :  { %7245 = vst [vmem:[#allocation59_spill] sm:$0xff] %v5570_v53  ;;  %v7059_v26 = vmax.f32 %v5570_v53, 0.0  ;;  %v7065_v55 = vmax.f32 %v5597_v41, 0.0  ;;  %v7067_v35 = vmax.f32 %v5613_v24, 0.0  ;;  %v5660_v4 = vadd.f32 %v5386_v51, %v1674_v14 }
 0x469   :  { %7250 = vst [vmem:[#allocation69_spill] sm:$0xff] %v5597_v41  ;;  %v7071_v43 = vmax.f32 %v5643_v38, 0.0  ;;  %v7269_v41 = vld [vmem:[#allocation10_spill] sm:$0xff] }
 0x46a   :  { %v1881_v8 = vpack.c.bf16 %v7059_v26, %v7060_v34  ;;  %7252 = vst [vmem:[#allocation74_spill] sm:$0xff] %v5613_v24  ;;  %v1878_v12 = vpack.c.bf16 %v7065_v55, %v7066_v29  ;;  %v7073_v27 = vmax.f32 %v5660_v4, 0.0  ;;  %v7259_v34 = vld [vmem:[#allocation66_spill] sm:$0xff]  ;;  %v7261_v55 = vld [vmem:[#allocation71_spill] sm:$0xff] }
 0x46b   :  { %v5587_v62 = vpop.f32.mrf.mxu3  ;;  %1928 = vmatmul.bf16.gmra.mxu0 %v7248_v15  ;;  %v5629_v15 = vadd.f32 %v5386_v51, %v1686_v13  ;;  %7256 = vst [vmem:[#allocation36_spill] sm:$0xff] %v5643_v38  ;;  %v7262_v29 = vld [vmem:[#allocation42_spill] sm:$0xff] }
 0x46c   :  { %2019 = vmatpush.bf16.msra.mxu1 %v1881_v8  ;;  %v5624_v8 = vadd.f32 %v5386_v51, %v1689_v45 }
 0x46d   :  { %7254 = vst [vmem:[#allocation28_spill] sm:$0xff] %v5629_v15  ;;  %v7069_v13 = vmax.f32 %v5629_v15, 0.0 }
 0x46e   :  { %7253 = vst [vmem:[#allocation75_spill] sm:$0xff] %v5624_v8  ;;  %v7068_v45 = vmax.f32 %v5624_v8, 0.0 }
 0x470   :  { %2020 = vmatpush.bf16.msra.mxu1 %v1880_v33  ;;  %v5638_v33 = vadd.f32 %v5386_v51, %v1683_v22  ;;  %v5656_v22 = vadd.f32 %v5386_v51, %v1677_v25 }
 0x472   :  { %7255 = vst [vmem:[#allocation31_spill] sm:$0xff] %v5638_v33  ;;  %v7070_v23 = vmax.f32 %v5638_v33, 0.0  ;;  %v7072_v18 = vmax.f32 %v5656_v22, 0.0 }
 0x473   :  { %v5620_v44 = vpop.f32.mrf.mxu3  ;;  %7258 = vst [vmem:[#allocation41_spill] sm:$0xff] %v5656_v22 }
 0x474   :  { %2021 = vmatpush.bf16.msra.mxu1 %v1879_v20  ;;  %v1877_v20 = vpack.c.bf16 %v7067_v35, %v7068_v45  ;;  %v1875_v25 = vpack.c.bf16 %v7071_v43, %v7072_v18 }
 0x478   :  { %2022 = vmatpush.bf16.msra.mxu1 %v1878_v12  ;;  %v1876_v12 = vpack.c.bf16 %v7069_v13, %v7070_v23 }
 0x47b   :  { %v5650_v1 = vpop.f32.mrf.mxu3  ;;  %1933 = vmatmul.bf16.gmra.mxu0 %v7257_v47  ;;  %v5668_v47 = vadd.f32 %v5386_v51, %v1671_v28 }
 0x47c   :  { %2023 = vmatpush.bf16.msra.mxu1 %v1877_v20 }
 0x47d   :  { %v7074_v20 = vmax.f32 %v5668_v47, 0.0 }
 0x47f   :  { %v1874_v28 = vpack.c.bf16 %v7073_v27, %v7074_v20  ;;  %v7265_v20 = vld [vmem:[#allocation79_spill] sm:$0xff] }
 0x480   :  { %2024 = vmatpush.bf16.msra.mxu1 %v1876_v12 }
 0x483   :  { %v5676_v14 = vpop.f32.mrf.mxu3 }
 0x484   :  { %2025 = vmatpush.bf16.msra.mxu1 %v1875_v25 }
 0x488   :  { %v5683_v26 = vpop.f32.mrf.mxu0  ;;  %2026 = vmatpush.bf16.msra.mxu1 %v1874_v28 }
 0x48b   :  { %v5685_v12 = vpop.f32.mrf.mxu3  ;;  %1938 = vmatmul.bf16.gmra.mxu0 %v7259_v34  ;;  %2027 = vmatmul.bf16.vlgmr.msra.gmra.mxu1 %v7260_v48  ;;  %v7263_v34 = vld [vmem:[#allocation76_spill] sm:$0xff]  ;;  %v7264_v48 = vld [vmem:[#allocation47_spill] sm:$0xff] }
 0x490   :  { %v5689_v9 = vpop.f32.mrf.mxu0 }
 0x493   :  { %v5691_v5 = vpop.f32.mrf.mxu3 }
 0x498   :  { %v5693_v49 = vpop.f32.mrf.mxu0 }
 0x49b   :  { %v1736_v25 = vpop.f32.mrf.mxu3  ;;  %1943 = vmatmul.bf16.gmra.mxu0 %v7261_v55  ;;  %2032 = vmatmul.bf16.gmra.mxu1 %v7262_v29  ;;  %v7266_v55 = vld [vmem:[#allocation52_spill] sm:$0xff] }
 0x4a0   :  { %v5697_v35 = vpop.f32.mrf.mxu0 }
 0x4a3   :  { %v1739_v28 = vpop.f32.mrf.mxu3 }
 0x4a8   :  { %v5699_v45 = vpop.f32.mrf.mxu0 }
 0x4ab   :  { %v1742_v13 = vpop.f32.mrf.mxu3  ;;  %1948 = vmatmul.bf16.gmra.mxu0 %v7263_v34  ;;  %2037 = vmatmul.bf16.gmra.mxu1 %v7264_v48  ;;  %v7268_v34 = vld [vmem:[#allocation57_spill] sm:$0xff]  ;;  %v2284_v48 = vld [vmem:[%s6966_s6 + $0x18] sm:$0xff] }
 0x4ac   :  { %2442 = vmatpush.msra.mxu3 %v2284_v48 }
 0x4b0   :  { %v5703_v23 = vpop.f32.mrf.mxu0 }
 0x4b3   :  { %v1745_v43 = vpop.f32.mrf.mxu3 }
 0x4b8   :  { %v5705_v18 = vpop.f32.mrf.mxu0 }
 0x4bb   :  { %v1748_v27 = vpop.f32.mrf.mxu3  ;;  %1953 = vmatmul.bf16.gmra.mxu0 %v7265_v20  ;;  %2042 = vmatmul.bf16.gmra.mxu1 %v7266_v55 }
 0x4c0   :  { %v5709_v29 = vpop.f32.mrf.mxu0 }
 0x4c3   :  { %v1751_v53 = vpop.f32.mrf.mxu3 }
 0x4c4   :  { %v1752_v33 = vadd.f32 %v1751_v53, %v5293_v6 }
 0x4c6   :  { %v5756_v6 = vadd.f32 %v5386_v51, %v1752_v33  ;;  %v1740_v33 = vadd.f32 %v1739_v28, %v5275_v46  ;;  %v7281_v46 = vld [vmem:[#allocation45_spill] sm:$0xff] }
 0x4c7   :  { %v1734_v28 = vadd.f32 %v5691_v5, %v7281_v46  ;;  %v7285_v5 = vld [vmem:[#allocation40_spill] sm:$0xff] }
 0x4c8   :  { %v5711_v31 = vpop.f32.mrf.mxu0  ;;  %7275 = vst [vmem:[#allocation66_spill] sm:$0xff] %v5756_v6 }
 0x4cb   :  { %v1754_v16 = vpop.f32.mrf.mxu3  ;;  %1958 = vmatmul.bf16.gmra.mxu0 %v7267_v39  ;;  %2047 = vmatmul.bf16.gmra.mxu1 %v7268_v34  ;;  %v5727_v39 = vld [vmem:[%s6965_s5 + $0x18] sm:$0xff] }
 0x4cc   :  { %2747 = vmatpush.msra.mxu0 %v5727_v39  ;;  %v1755_v15 = vadd.f32 %v1754_v16, %v5296_v11 }
 0x4d0   :  { %v5718_v21 = vpop.f32.mrf.mxu0 }
 0x4d3   :  { %v1757_v20 = vpop.f32.mrf.mxu3 }
 0x4d4   :  { %v1758_v24 = vadd.f32 %v1757_v20, %v5304_v19  ;;  %v5748_v19 = vadd.f32 %v5386_v51, %v1755_v15  ;;  %v1743_v15 = vadd.f32 %v1742_v13, %v5278_v0  ;;  %v1737_v0 = vadd.f32 %v1736_v25, %v5269_v7  ;;  %v7283_v25 = vld [vmem:[#allocation44_spill] sm:$0xff] }
 0x4d6   :  { %v5741_v38 = vadd.f32 %v5386_v51, %v1758_v24  ;;  %7274 = vst [vmem:[#allocation61_spill] sm:$0xff] %v5748_v19  ;;  %v7276_v24 = vld [vmem:[#allocation12_spill] sm:$0xff]  ;;  %v5781_v13 = vadd.f32 %v5386_v51, %v1743_v15 }
 0x4d8   :  { %v5720_v58 = vpop.f32.mrf.mxu0  ;;  %7272 = vst [vmem:[#allocation51_spill] sm:$0xff] %v5741_v38  ;;  %v7090_v53 = vmax.f32 %v5741_v38, 0.0  ;;  %v7095_v15 = vmax.f32 %v5781_v13, 0.0 }
 0x4d9   :  { %7280 = vst [vmem:[#allocation42_spill] sm:$0xff] %v5781_v13  ;;  %v7313_v13 = vld [vmem:[#allocation19_spill] sm:$0xff] }
 0x4db   :  { %v1760_v55 = vpop.f32.mrf.mxu3  ;;  %1963 = vmatmul.bf16.gmra.mxu0 %v7269_v41  ;;  %2052 = vmatmul.bf16.gmra.mxu1 %v7270_v63 }
 0x4dc   :  { %v1761_v34 = vadd.f32 %v1760_v55, %v5309_v60  ;;  %v1749_v60 = vadd.f32 %v1748_v27, %v5287_v37  ;;  %v7092_v55 = vmax.f32 %v5756_v6, 0.0  ;;  %v7309_v6 = vld [vmem:[#allocation24_spill] sm:$0xff] }
 0x4de   :  { %v5736_v41 = vadd.f32 %v5386_v51, %v1761_v34  ;;  %v5767_v27 = vadd.f32 %v5386_v51, %v1749_v60 }
 0x4e0   :  { %v5731_v48 = vpop.f32.mrf.mxu0  ;;  %7271 = vst [vmem:[#allocation46_spill] sm:$0xff] %v5736_v41  ;;  %v7089_v11 = vmax.f32 %v5736_v41, 0.0  ;;  %v7307_v41 = vld [vmem:[#allocation15_spill] sm:$0xff] }
 0x4e1   :  { %7278 = vst [vmem:[#allocation37_spill] sm:$0xff] %v5767_v27 }
 0x4e3   :  { %v1763_v8 = vpop.f32.mrf.mxu3 }
 0x4e4   :  { %v1764_v63 = vadd.f32 %v1763_v8, %v5317_v32  ;;  %v1746_v32 = vadd.f32 %v1745_v43, %v5284_v50  ;;  %v7277_v8 = vld [vmem:[#allocation67_spill] sm:$0xff]  ;;  %v7091_v50 = vmax.f32 %v5748_v19, 0.0 }
 0x4e6   :  { %v5744_v22 = vadd.f32 %v5386_v51, %v1764_v63  ;;  %v5772_v43 = vadd.f32 %v5386_v51, %v1746_v32  ;;  %v1888_v34 = vpack.c.bf16 %v7090_v53, %v7091_v50  ;;  %v7093_v63 = vmax.f32 %v5767_v27, 0.0 }
 0x4e7   :  { %v5789_v32 = vadd.f32 %v5386_v51, %v1740_v33  ;;  %v1728_v33 = vadd.f32 %v5676_v14, %v7285_v5  ;;  %v7289_v14 = vld [vmem:[#allocation35_spill] sm:$0xff] }
 0x4e8   :  { %7273 = vst [vmem:[#allocation56_spill] sm:$0xff] %v5744_v22  ;;  %v7103_v16 = vmax.f32 %v5744_v22, 0.0  ;;  %v5752_v20 = vpop.f32.mrf.mxu0  ;;  %v1887_v7 = vpack.c.bf16 %v7092_v55, %v7093_v63  ;;  %v7293_v55 = vld [vmem:[#allocation34_spill] sm:$0xff]  ;;  %v7324_v22 = vld [vmem:[#allocation89_spill] sm:$0xff] }
 0x4e9   :  { %7279 = vst [vmem:[#allocation71_spill] sm:$0xff] %v5772_v43  ;;  %v7096_v46 = vmax.f32 %v5789_v32, 0.0  ;;  %v5823_v5 = vadd.f32 %v5386_v51, %v1728_v33 }
 0x4ea   :  { %v1889_v37 = vpack.c.bf16 %v7103_v16, %v7089_v11  ;;  %7282 = vst [vmem:[#allocation76_spill] sm:$0xff] %v5789_v32 }
 0x4eb   :  { %1968 = vmatmul.bf16.gmra.mxu0 %v7276_v24  ;;  %2057 = vmatmul.bf16.gmra.mxu1 %v7277_v8  ;;  %v1731_v24 = vadd.f32 %v5685_v12, %v7283_v25  ;;  %v5799_v8 = vadd.f32 %v5386_v51, %v1737_v0  ;;  %v7287_v12 = vld [vmem:[#allocation39_spill] sm:$0xff]  ;;  %7290 = vst [vmem:[#allocation8_spill] sm:$0xff] %v5823_v5 }
 0x4ec   :  { %2148 = vmatpush.bf16.msra.mxu2 %v1889_v37  ;;  %v7094_v37 = vmax.f32 %v5772_v43, 0.0  ;;  %v1725_v0 = vadd.f32 %v5650_v1, %v7287_v12  ;;  %v7292_v12 = vld [vmem:[#allocation72_spill] sm:$0xff] }
 0x4ed   :  { %7284 = vst [vmem:[#allocation47_spill] sm:$0xff] %v5799_v8  ;;  %v5815_v25 = vadd.f32 %v5386_v51, %v1731_v24  ;;  %v7291_v24 = vld [vmem:[#allocation14_spill] sm:$0xff] }
 0x4ee   :  { %v1886_v11 = vpack.c.bf16 %v7094_v37, %v7095_v15  ;;  %v5835_v63 = vadd.f32 %v5386_v51, %v1725_v0  ;;  %v7298_v37 = vld [vmem:[#allocation9_spill] sm:$0xff] }
 0x4ef   :  { %7288 = vst [vmem:[#allocation52_spill] sm:$0xff] %v5815_v25  ;;  %v7299_v15 = vld [vmem:[#allocation77_spill] sm:$0xff] }
 0x4f0   :  { %v5784_v60 = vpop.f32.mrf.mxu0  ;;  %2149 = vmatpush.bf16.msra.mxu2 %v1888_v34  ;;  %v5805_v34 = vadd.f32 %v5386_v51, %v1734_v28  ;;  %v1722_v28 = vadd.f32 %v5620_v44, %v7289_v14  ;;  %7294 = vst [vmem:[#allocation57_spill] sm:$0xff] %v5835_v63  ;;  %v7099_v44 = vmax.f32 %v5815_v25, 0.0  ;;  %v7100_v14 = vmax.f32 %v5823_v5, 0.0  ;;  %v7318_v25 = vld [vmem:[#allocation21_spill] sm:$0xff] }
 0x4f1   :  { %v2282_v5 = vld [vmem:[%s6966_s6 + $0x8] sm:$0xff] }
 0x4f2   :  { %7286 = vst [vmem:[#allocation79_spill] sm:$0xff] %v5805_v34  ;;  %v7098_v50 = vmax.f32 %v5805_v34, 0.0  ;;  %v5839_v33 = vadd.f32 %v5386_v51, %v1722_v28 }
 0x4f4   :  { %2150 = vmatpush.bf16.msra.mxu2 %v1887_v7  ;;  %v7097_v7 = vmax.f32 %v5799_v8, 0.0  ;;  %7295 = vst [vmem:[#allocation10_spill] sm:$0xff] %v5839_v33  ;;  %v7102_v0 = vmax.f32 %v5839_v33, 0.0  ;;  %v7314_v8 = vld [vmem:[#allocation87_spill] sm:$0xff]  ;;  %v2281_v33 = vld [vmem:[%s6966_s6] sm:$0xff] }
 0x4f6   :  { %v1885_v1 = vpack.c.bf16 %v7096_v46, %v7097_v7 }
 0x4f8   :  { %v5818_v53 = vpop.f32.mrf.mxu0  ;;  %2151 = vmatpush.bf16.msra.mxu2 %v1886_v11  ;;  %v1719_v11 = vadd.f32 %v5587_v62, %v7293_v55  ;;  %v7101_v62 = vmax.f32 %v5835_v63, 0.0 }
 0x4fa   :  { %v1883_v28 = vpack.c.bf16 %v7100_v14, %v7101_v62  ;;  %v7302_v14 = vld [vmem:[#allocation80_spill] sm:$0xff]  ;;  %v7304_v62 = vld [vmem:[#allocation13_spill] sm:$0xff] }
 0x4fb   :  { %1973 = vmatmul.bf16.gmra.mxu0 %v7291_v24  ;;  %2062 = vmatmul.bf16.gmra.mxu1 %v7292_v12  ;;  %v1884_v24 = vpack.c.bf16 %v7098_v50, %v7099_v44  ;;  %v5847_v12 = vadd.f32 %v5386_v51, %v1719_v11  ;;  %v7300_v50 = vld [vmem:[#allocation18_spill] sm:$0xff]  ;;  %v7301_v44 = vld [vmem:[#allocation11_spill] sm:$0xff] }
 0x4fc   :  { %2152 = vmatpush.bf16.msra.mxu2 %v1885_v1 }
 0x4fd   :  { %7296 = vst [vmem:[#allocation62_spill] sm:$0xff] %v5847_v12  ;;  %v7104_v1 = vmax.f32 %v5847_v12, 0.0 }
 0x4ff   :  { %v1882_v51 = vpack.c.bf16 %v7102_v0, %v7104_v1  ;;  %v7306_v1 = vld [vmem:[#allocation22_spill] sm:$0xff] }
 0x500   :  { %v5850_v55 = vpop.f32.mrf.mxu0  ;;  %2153 = vmatpush.bf16.msra.mxu2 %v1884_v24  ;;  %v7297_v24 = vld [vmem:[#allocation16_spill] sm:$0xff] }
 0x504   :  { %2154 = vmatpush.bf16.msra.mxu2 %v1883_v28 }
 0x508   :  { %v5862_v11 = vpop.f32.mrf.mxu0  ;;  %2155 = vmatpush.bf16.msra.mxu2 %v1882_v51  ;;  %v5870_v7 = vpop.f32.mrf.mxu1 }
 0x50b   :  { %1978 = vmatmul.bf16.gmra.mxu0 %v7297_v24  ;;  %2156 = vmatmul.bf16.vlgmr.msra.gmra.mxu2 %v7298_v37 }
 0x50c   :  { %4275 = vmatpush.msrb.mxu2 %v5727_v39  ;;  %2067 = vmatmul.bf16.gmra.mxu1 %v7299_v15  ;;  %v7303_v15 = vld [vmem:[#allocation20_spill] sm:$0xff] }
 0x510   :  { %v5868_v46 = vpop.f32.mrf.mxu0  ;;  %v5879_v39 = vpop.f32.mrf.mxu1 }
 0x518   :  { %v5872_v28 = vpop.f32.mrf.mxu0  ;;  %v5883_v37 = vpop.f32.mrf.mxu1 }
 0x51b   :  { %1983 = vmatmul.bf16.gmra.mxu0 %v7300_v50  ;;  %2161 = vmatmul.bf16.gmra.mxu2 %v7301_v44  ;;  %v2283_v50 = vld [vmem:[%s6966_s6 + $0x10] sm:$0xff] }
 0x51c   :  { %2072 = vmatmul.bf16.gmra.mxu1 %v7302_v14  ;;  %2443 = vmatpush.msra.mxu3 %v2283_v50  ;;  %v7305_v44 = vld [vmem:[#allocation82_spill] sm:$0xff] }
 0x51e   :  { %2444 = vmatpush.msra.mxu3 %v2282_v5 }
 0x520   :  { %v5877_v51 = vpop.f32.mrf.mxu0  ;;  %v5893_v0 = vpop.f32.mrf.mxu1  ;;  %2445 = vmatpush.msra.mxu3 %v2281_v33  ;;  %v7328_v33 = vmax.f32 %v5498_v56, 0.0  ;;  %v2031_v56 = vadd.f32 %v5879_v39, %v5689_v9 }
 0x528   :  { %v5881_v24 = vpop.f32.mrf.mxu0  ;;  %v5903_v50 = vpop.f32.mrf.mxu1 }
 0x52b   :  { %1988 = vmatmul.bf16.gmra.mxu0 %v7303_v15  ;;  %2166 = vmatmul.bf16.gmra.mxu2 %v7304_v62  ;;  %v2279_v62 = vld [vmem:[%s6965_s5 + $0x10] sm:$0xff]  ;;  %v7308_v15 = vld [vmem:[#allocation84_spill] sm:$0xff] }
 0x52c   :  { %2077 = vmatmul.bf16.gmra.mxu1 %v7305_v44  ;;  %2748 = vmatpush.msra.mxu0 %v2279_v62 }
 0x52d   :  { %4276 = vmatpush.msrb.mxu2 %v2279_v62  ;;  %v7312_v62 = vld [vmem:[#allocation26_spill] sm:$0xff] }
 0x530   :  { %v5891_v14 = vpop.f32.mrf.mxu0  ;;  %v5909_v19 = vpop.f32.mrf.mxu1 }
 0x538   :  { %v5895_v16 = vpop.f32.mrf.mxu0  ;;  %v5916_v43 = vpop.f32.mrf.mxu1 }
 0x53b   :  { %1993 = vmatmul.bf16.gmra.mxu0 %v7306_v1  ;;  %2171 = vmatmul.bf16.gmra.mxu2 %v7307_v41  ;;  %v7310_v1 = vld [vmem:[#allocation17_spill] sm:$0xff]  ;;  %v7311_v41 = vld [vmem:[#allocation86_spill] sm:$0xff] }
 0x53c   :  { %2082 = vmatmul.bf16.gmra.mxu1 %v7308_v15 }
 0x540   :  { %v5905_v44 = vpop.f32.mrf.mxu0  ;;  %v5922_v32 = vpop.f32.mrf.mxu1 }
 0x548   :  { %v5907_v38 = vpop.f32.mrf.mxu0 }
 0x54b   :  { %1998 = vmatmul.bf16.gmra.mxu0 %v7309_v6  ;;  %2176 = vmatmul.bf16.gmra.mxu2 %v7310_v1  ;;  %v5927_v6 = vpop.f32.mrf.mxu1 }
 0x54c   :  { %2087 = vmatmul.bf16.gmra.mxu1 %v7311_v41  ;;  %v2278_v41 = vld [vmem:[%s6965_s5 + $0x8] sm:$0xff] }
 0x54d   :  { %2749 = vmatpush.msra.mxu0 %v2278_v41  ;;  %4277 = vmatpush.msrb.mxu2 %v2278_v41 }
 0x550   :  { %v5914_v27 = vpop.f32.mrf.mxu0 }
 0x553   :  { %v5948_v41 = vpop.f32.mrf.mxu1 }
 0x558   :  { %v5918_v15 = vpop.f32.mrf.mxu0 }
 0x55b   :  { %2003 = vmatmul.bf16.gmra.mxu0 %v7312_v62  ;;  %2181 = vmatmul.bf16.gmra.mxu2 %v7313_v13  ;;  %v2277_v62 = vld [vmem:[%s6965_s5] sm:$0xff]  ;;  %v7317_v13 = vld [vmem:[#allocation29_spill] sm:$0xff] }
 0x55c   :  { %2092 = vmatmul.bf16.gmra.mxu1 %v7314_v8  ;;  %2750 = vmatpush.msra.mxu0 %v2277_v62  ;;  %v7319_v8 = vld [vmem:[#allocation88_spill] sm:$0xff] }
 0x55d   :  { %4278 = vmatpush.msrb.mxu2 %v2277_v62  ;;  %v7323_v62 = vld [vmem:[#allocation23_spill] sm:$0xff] }
 0x560   :  { %v5925_v34 = vpop.f32.mrf.mxu0 }
 0x561   :  { %7315 = vst [vmem:[#allocation12_spill] sm:$0xff] %v5925_v34 }
 0x568   :  { %v5929_v1 = vpop.f32.mrf.mxu0 }
 0x569   :  { %7316 = vst [vmem:[#allocation67_spill] sm:$0xff] %v5929_v1  ;;  %v7327_v1 = vld [vmem:[#allocation25_spill] sm:$0xff] }
 0x56b   :  { %2008 = vmatmul.bf16.gmra.mxu0 %v7317_v13  ;;  %2186 = vmatmul.bf16.gmra.mxu2 %v7318_v25  ;;  %v5952_v25 = vpop.f32.mrf.mxu1 }
 0x56c   :  { %2097 = vmatmul.bf16.gmra.mxu1 %v7319_v8  ;;  %v7322_v8 = vld [vmem:[#allocation32_spill] sm:$0xff] }
 0x570   :  { %v5943_v63 = vpop.f32.mrf.mxu0 }
 0x571   :  { %7320 = vst [vmem:[#allocation45_spill] sm:$0xff] %v5943_v63 }
 0x573   :  { %v5959_v12 = vpop.f32.mrf.mxu1 }
 0x578   :  { %v5950_v13 = vpop.f32.mrf.mxu0 }
 0x579   :  { %7321 = vst [vmem:[#allocation44_spill] sm:$0xff] %v5950_v13  ;;  %v7329_v13 = vld [vmem:[#allocation90_spill] sm:$0xff] }
 0x57b   :  { %2013 = vmatmul.bf16.gmra.mxu0 %v7322_v8  ;;  %2191 = vmatmul.bf16.gmra.mxu2 %v7323_v62  ;;  %v2029_v8 = vadd.f32 %v5870_v7, %v5683_v26  ;;  %v7331_v7 = vld [vmem:[#allocation27_spill] sm:$0xff] }
 0x57c   :  { %2102 = vmatmul.bf16.gmra.mxu1 %v7324_v22  ;;  %v5970_v22 = vpop.f32.mrf.mxu1 }
 0x580   :  { %v5957_v5 = vpop.f32.mrf.mxu0 }
 0x581   :  { %7325 = vst [vmem:[#allocation40_spill] sm:$0xff] %v5957_v5 }
 0x584   :  { %v5982_v26 = vpop.f32.mrf.mxu1 }
 0x588   :  { %v5961_v63 = vpop.f32.mrf.mxu0 }
 0x589   :  { %7326 = vst [vmem:[#allocation39_spill] sm:$0xff] %v5961_v63  ;;  %v7330_v63 = vmax.f32 %v5490_v40, 0.0  ;;  %v7333_v40 = vld [vmem:[#allocation91_spill] sm:$0xff] }
 0x58b   :  { %2196 = vmatmul.bf16.gmra.mxu2 %v7327_v1  ;;  %4122 = vmatmul.msk.f32.vlgmr.msra.gmra.mxu0 %vm2285_vm1, %v7328_v33 }
 0x58c   :  { %2107 = vmatmul.bf16.gmra.mxu1 %v7329_v13 }
 0x58e   :  { %v2157_v62 = vpop.f32.mrf.mxu2 }
 0x58f   :  { %v2158_v5 = vadd.f32 %v2157_v62, %v2029_v8  ;;  %v7332_v8 = vmax.f32 %v5486_v59, 0.0  ;;  %v5995_v62 = vpop.f32.mrf.mxu1  ;;  %v2036_v59 = vadd.f32 %v5893_v0, %v5697_v35 }
 0x590   :  { %v5972_v34 = vpop.f32.mrf.mxu0 }
 0x591   :  { %4074 = vmatmul.msk.f32.vlgmr.msra.gmra.mxu3 %vm2285_vm1, %v2158_v5 }
 0x593   :  { %4123 = vmatmul.msk.f32.gmra.mxu0 %vm2285_vm1, %v7330_v63  ;;  %v2034_v63 = vadd.f32 %v5883_v37, %v5693_v49  ;;  %v7335_v49 = vld [vmem:[#allocation30_spill] sm:$0xff]  ;;  %v7336_v37 = vmax.f32 %v5467_v10, 0.0  ;;  %v2041_v10 = vadd.f32 %v5909_v19, %v5703_v23 }
 0x596   :  { %v2159_v1 = vpop.f32.mrf.mxu2 }
 0x597   :  { %v2160_v13 = vadd.f32 %v2159_v1, %v2031_v56  ;;  %v7334_v56 = vmax.f32 %v5474_v2, 0.0  ;;  %v7337_v2 = vld [vmem:[#allocation92_spill] sm:$0xff] }
 0x598   :  { %v5980_v33 = vpop.f32.mrf.mxu0 }
 0x599   :  { %4075 = vmatmul.msk.f32.gmra.mxu3 %vm2285_vm1, %v2160_v13 }
 0x59b   :  { %2201 = vmatmul.bf16.gmra.mxu2 %v7331_v7  ;;  %4124 = vmatmul.msk.f32.gmra.mxu0 %vm2285_vm1, %v7332_v8  ;;  %v6009_v8 = vpop.f32.mrf.mxu1 }
 0x59c   :  { %2112 = vmatmul.bf16.gmra.mxu1 %v7333_v40  ;;  %v2039_v40 = vadd.f32 %v5903_v50, %v5699_v45  ;;  %v7339_v45 = vld [vmem:[#allocation33_spill] sm:$0xff]  ;;  %v7340_v50 = vmax.f32 %v5451_v36, 0.0  ;;  %v2046_v36 = vadd.f32 %v5922_v32, %v5709_v29 }
 0x59e   :  { %v2162_v9 = vpop.f32.mrf.mxu2 }
 0x59f   :  { %v2163_v39 = vadd.f32 %v2162_v9, %v2034_v63  ;;  %v7338_v9 = vmax.f32 %v5457_v17, 0.0  ;;  %v7341_v17 = vld [vmem:[#allocation93_spill] sm:$0xff] }
 0x5a0   :  { %v5992_v5 = vpop.f32.mrf.mxu0 }
 0x5a1   :  { %4076 = vmatmul.msk.f32.gmra.mxu3 %vm2285_vm1, %v2163_v39 }
 0x5a3   :  { %4125 = vmatmul.msk.f32.gmra.mxu0 %vm2285_vm1, %v7334_v56  ;;  %v6022_v56 = vpop.f32.mrf.mxu1 }
 0x5a6   :  { %v2164_v1 = vpop.f32.mrf.mxu2 }
 0x5a7   :  { %v2165_v13 = vadd.f32 %v2164_v1, %v2036_v59 }
 0x5a8   :  { %v6002_v7 = vpop.f32.mrf.mxu0 }
 0x5a9   :  { %4077 = vmatmul.msk.f32.gmra.mxu3 %vm2285_vm1, %v2165_v13  ;;  %v2044_v13 = vadd.f32 %v5916_v43, %v5705_v18  ;;  %v7343_v43 = vld [vmem:[#allocation38_spill] sm:$0xff] }
 0x5ab   :  { %2206 = vmatmul.bf16.gmra.mxu2 %v7335_v49  ;;  %4126 = vmatmul.msk.f32.gmra.mxu0 %vm2285_vm1, %v7336_v37  ;;  %v6036_v37 = vpop.f32.mrf.mxu1 }
 0x5ac   :  { %2117 = vmatmul.bf16.gmra.mxu1 %v7337_v2  ;;  %v7342_v2 = vmax.f32 %v5439_v52, 0.0  ;;  %v7345_v52 = vld [vmem:[#allocation94_spill] sm:$0xff] }
 0x5ae   :  { %v2167_v35 = vpop.f32.mrf.mxu2 }
 0x5af   :  { %v2168_v0 = vadd.f32 %v2167_v35, %v2039_v40 }
 0x5b0   :  { %v6014_v63 = vpop.f32.mrf.mxu0 }
 0x5b1   :  { %4078 = vmatmul.msk.f32.gmra.mxu3 %vm2285_vm1, %v2168_v0 }
 0x5b3   :  { %4127 = vmatmul.msk.f32.gmra.mxu0 %vm2285_vm1, %v7338_v9  ;;  %v6047_v18 = vpop.f32.mrf.mxu1  ;;  %v7344_v9 = vmax.f32 %v5429_v61, 0.0  ;;  %v2051_v61 = vadd.f32 %v5948_v41, %v5718_v21 }
 0x5b6   :  { %v2169_v39 = vpop.f32.mrf.mxu2 }
 0x5b7   :  { %v2170_v59 = vadd.f32 %v2169_v39, %v2041_v10  ;;  %v2049_v10 = vadd.f32 %v5927_v6, %v5711_v31  ;;  %v7347_v31 = vld [vmem:[#allocation43_spill] sm:$0xff]  ;;  %v7348_v6 = vmax.f32 %v5414_v30, 0.0  ;;  %v2056_v30 = vadd.f32 %v5959_v12, %v5731_v48 }
 0x5b8   :  { %v6024_v1 = vpop.f32.mrf.mxu0 }
 0x5b9   :  { %4079 = vmatmul.msk.f32.gmra.mxu3 %vm2285_vm1, %v2170_v59  ;;  %v7346_v59 = vmax.f32 %v5419_v54, 0.0  ;;  %v7349_v54 = vld [vmem:[#allocation95_spill] sm:$0xff] }
 0x5bb   :  { %2211 = vmatmul.bf16.gmra.mxu2 %v7339_v45  ;;  %4128 = vmatmul.msk.f32.gmra.mxu0 %vm2285_vm1, %v7340_v50  ;;  %v6062_v45 = vpop.f32.mrf.mxu1 }
 0x5bc   :  { %2122 = vmatmul.bf16.gmra.mxu1 %v7341_v17 }
 0x5be   :  { %v2172_v23 = vpop.f32.mrf.mxu2 }
 0x5bf   :  { %v2173_v19 = vadd.f32 %v2172_v23, %v2044_v13  ;;  %v2054_v23 = vadd.f32 %v5952_v25, %v5720_v58  ;;  %v7351_v25 = vld [vmem:[#allocation48_spill] sm:$0xff] }
 0x5c0   :  { %v6034_v49 = vpop.f32.mrf.mxu0 }
 0x5c1   :  { %4080 = vmatmul.msk.f32.gmra.mxu3 %vm2285_vm1, %v2173_v19 }
 0x5c3   :  { %4129 = vmatmul.msk.f32.gmra.mxu0 %vm2285_vm1, %v7342_v2  ;;  %v6076_v2 = vpop.f32.mrf.mxu1 }
 0x5c6   :  { %v2174_v40 = vpop.f32.mrf.mxu2 }
 0x5c7   :  { %v2175_v35 = vadd.f32 %v2174_v40, %v2046_v36  ;;  %v7350_v36 = vmax.f32 %v5404_v3, 0.0  ;;  %v7353_v3 = vld [vmem:[#allocation96_spill] sm:$0xff] }
 0x5c8   :  { %v6044_v0 = vpop.f32.mrf.mxu0 }
 0x5c9   :  { %4081 = vmatmul.msk.f32.gmra.mxu3 %vm2285_vm1, %v2175_v35 }
 0x5cb   :  { %2216 = vmatmul.bf16.gmra.mxu2 %v7343_v43  ;;  %4130 = vmatmul.msk.f32.gmra.mxu0 %vm2285_vm1, %v7344_v9  ;;  %v6088_v58 = vpop.f32.mrf.mxu1  ;;  %v7352_v9 = vmax.f32 %v5398_v57, 0.0  ;;  %v2061_v57 = vadd.f32 %v5982_v26, %v5784_v60 }
 0x5cc   :  { %2127 = vmatmul.bf16.gmra.mxu1 %v7345_v52  ;;  %v2059_v52 = vadd.f32 %v5970_v22, %v5752_v20  ;;  %v7355_v20 = vld [vmem:[#allocation53_spill] sm:$0xff] }
 0x5cd   :  { %v7356_v22 = vld [vmem:[#allocation49_spill] sm:$0xff] }
 0x5ce   :  { %v2177_v29 = vpop.f32.mrf.mxu2 }
 0x5cf   :  { %v2178_v32 = vadd.f32 %v2177_v29, %v2049_v10 }
 0x5d0   :  { %v6056_v39 = vpop.f32.mrf.mxu0 }
 0x5d1   :  { %4082 = vmatmul.msk.f32.gmra.mxu3 %vm2285_vm1, %v2178_v32  ;;  %v7354_v32 = vmax.f32 %v5392_v42, 0.0  ;;  %v7358_v42 = vld [vmem:[#allocation97_spill] sm:$0xff] }
 0x5d3   :  { %4131 = vmatmul.msk.f32.gmra.mxu0 %vm2285_vm1, %v7346_v59  ;;  %v6101_v29 = vpop.f32.mrf.mxu1 }
 0x5d6   :  { %v2179_v50 = vpop.f32.mrf.mxu2 }
 0x5d7   :  { %v2180_v17 = vadd.f32 %v2179_v50, %v2051_v61 }
 0x5d8   :  { %v6066_v13 = vpop.f32.mrf.mxu0 }
 0x5d9   :  { %4083 = vmatmul.msk.f32.gmra.mxu3 %vm2285_vm1, %v2180_v17  ;;  %v7357_v17 = vmax.f32 %v7356_v22, 0.0 }
 0x5db   :  { %2221 = vmatmul.bf16.gmra.mxu2 %v7347_v31  ;;  %4132 = vmatmul.msk.f32.gmra.mxu0 %vm2285_vm1, %v7348_v6  ;;  %v6115_v31 = vpop.f32.mrf.mxu1  ;;  %v2064_v6 = vadd.f32 %v5995_v62, %v5818_v53  ;;  %v7362_v53 = vmax.f32 %v5668_v47, 0.0  ;;  %v2069_v62 = vadd.f32 %v6022_v56, %v5862_v11  ;;  %v6144_v47 = vld [vmem:[%s6967_s7] ss:$0 sm:$0xff]  ;;  %v2071_v11 = vadd.f32 %v6036_v37, %v5868_v46 }
 0x5dc   :  { %2132 = vmatmul.bf16.gmra.mxu1 %v7349_v54 }
 0x5de   :  { %v2182_v19 = vpop.f32.mrf.mxu2 }
 0x5df   :  { %v2183_v21 = vadd.f32 %v2182_v19, %v2054_v23  ;;  %v7359_v23 = vld [vmem:[#allocation50_spill] sm:$0xff] }
 0x5e0   :  { %v6078_v41 = vpop.f32.mrf.mxu0  ;;  %v7360_v19 = vmax.f32 %v7359_v23, 0.0 }
 0x5e1   :  { %4084 = vmatmul.msk.f32.gmra.mxu3 %vm2285_vm1, %v2183_v21  ;;  %v2066_v21 = vadd.f32 %v6009_v8, %v5850_v55  ;;  %v7363_v8 = vmax.f32 %v5660_v4, 0.0 }
 0x5e3   :  { %4133 = vmatmul.msk.f32.gmra.mxu0 %vm2285_vm1, %v7350_v36  ;;  %v6160_v22 = vpop.f32.mrf.mxu1 }
 0x5e6   :  { %v2184_v40 = vpop.f32.mrf.mxu2 }
 0x5e7   :  { %v2185_v35 = vadd.f32 %v2184_v40, %v2056_v30 }
 0x5e8   :  { %v6086_v43 = vpop.f32.mrf.mxu0 }
 0x5e9   :  { %4085 = vmatmul.msk.f32.gmra.mxu3 %vm2285_vm1, %v2185_v35  ;;  %v7361_v35 = vld [vmem:[#allocation58_spill] sm:$0xff] }
 0x5eb   :  { %2226 = vmatmul.bf16.gmra.mxu2 %v7351_v25  ;;  %4134 = vmatmul.msk.f32.gmra.mxu0 %vm2285_vm1, %v7352_v9  ;;  %v2948_v9 = vlaneseq }
 0x5ec   :  { %2137 = vmatmul.bf16.gmra.mxu1 %v7353_v3 }
 0x5ed   :  { %v6136_v55 = vand.u32 127, %v2948_v9 }
 0x5ee   :  { %v2187_v48 = vpop.f32.mrf.mxu2 }
 0x5ef   :  { %v2188_v12 = vadd.f32 %v2187_v48, %v2059_v52  ;;  %vm2950_vm2 = vcmp.lt.s32.totalorder %v6136_v55, 4 }
 0x5f0   :  { %v6098_v10 = vpop.f32.mrf.mxu0 }
 0x5f1   :  { %4086 = vmatmul.msk.f32.gmra.mxu3 %vm2285_vm1, %v2188_v12 }
 0x5f3   :  { %4135 = vmatmul.msk.f32.gmra.mxu0 %vm2285_vm1, %v7354_v32 }
 0x5f6   :  { %v2189_v59 = vpop.f32.mrf.mxu2 }
 0x5f7   :  { %v2190_v61 = vadd.f32 %v2189_v59, %v2061_v57 }
 0x5f8   :  { %v6108_v50 = vpop.f32.mrf.mxu0 }
 0x5f9   :  { %4087 = vmatmul.msk.f32.gmra.mxu3 %vm2285_vm1, %v2190_v61  ;;  %v7364_v61 = vld [vmem:[#allocation63_spill] sm:$0xff] }
 0x5fb   :  { %2231 = vmatmul.bf16.gmra.mxu2 %v7355_v20  ;;  %4136 = vmatmul.msk.f32.gmra.mxu0 %vm2285_vm1, %v7357_v17  ;;  %v7365_v20 = vld [vmem:[#allocation41_spill] sm:$0xff]  ;;  %v2074_v17 = vadd.f32 %v6047_v18, %v5872_v28  ;;  %v2076_v28 = vadd.f32 %v6062_v45, %v5877_v51 }
 0x5fc   :  { %2142 = vmatmul.bf16.gmra.mxu1 %v7358_v42  ;;  %v7366_v46 = vmax.f32 %v7365_v20, 0.0 }
 0x5fe   :  { %v2192_v60 = vpop.f32.mrf.mxu2 }
 0x5ff   :  { %v2193_v26 = vadd.f32 %v2192_v60, %v2064_v6 }
 0x600   :  { %v6120_v54 = vpop.f32.mrf.mxu0 }
 0x601   :  { %4088 = vmatmul.msk.f32.gmra.mxu3 %vm2285_vm1, %v2193_v26 }
 0x603   :  { %4137 = vmatmul.msk.f32.gmra.mxu0 %vm2285_vm1, %v7360_v19 }
 0x606   :  { %v2194_v36 = vpop.f32.mrf.mxu2 }
 0x607   :  { %v2195_v30 = vadd.f32 %v2194_v36, %v2066_v21  ;;  %v7367_v21 = vld [vmem:[#allocation36_spill] sm:$0xff] }
 0x608   :  { %v2752_v40 = vpop.f32.mrf.mxu0  ;;  %v7368_v36 = vmax.f32 %v7367_v21, 0.0  ;;  %v7375_v21 = vld [vmem:[#allocation75_spill] sm:$0xff] }
 0x609   :  { %4089 = vmatmul.msk.f32.gmra.mxu3 %vm2285_vm1, %v2195_v30 }
 0x60b   :  { %2236 = vmatmul.bf16.gmra.mxu2 %v7361_v35  ;;  %4138 = vmatmul.msk.f32.gmra.mxu0 %vm2285_vm1, %v7362_v53  ;;  %v6176_v35 = vpop.f32.mrf.mxu1 }
 0x60e   :  { %v2197_v25 = vpop.f32.mrf.mxu2 }
 0x60f   :  { %v2198_v3 = vadd.f32 %v2197_v25, %v2069_v62 }
 0x610   :  { %v2755_v52 = vpop.f32.mrf.mxu0 }
 0x611   :  { %4090 = vmatmul.msk.f32.gmra.mxu3 %vm2285_vm1, %v2198_v3  ;;  %v7369_v3 = vld [vmem:[#allocation68_spill] sm:$0xff] }
 0x613   :  { %4139 = vmatmul.msk.f32.gmra.mxu0 %vm2285_vm1, %v7363_v8  ;;  %v2079_v8 = vadd.f32 %v6076_v2, %v5881_v24  ;;  %v2081_v2 = vadd.f32 %v6088_v58, %v5891_v14  ;;  %v7376_v14 = vmax.f32 %v7375_v21, 0.0 }
 0x614   :  { %v2447_v48 = vpop.f32.mrf.mxu3 }
 0x615   :  { %v2753_v56 = vadd.f32 %v2752_v40, %v2447_v48 }
 0x616   :  { %v2199_v12 = vpop.f32.mrf.mxu2 }
 0x617   :  { %v2200_v32 = vadd.f32 %v2199_v12, %v2071_v11  ;;  %v6150_v57 = vadd.f32 %v6144_v47, %v2753_v56 }
 0x618   :  { %v2758_v4 = vpop.f32.mrf.mxu0 }
 0x619   :  { %4091 = vmatmul.msk.f32.gmra.mxu3 %vm2285_vm1, %v2200_v32  ;;  %v2951_v59 = vsel %vm2950_vm2, %v6150_v57, -inf }
 0x61a   :  { %2999 = vmax.xlane.f32.xlu0 %v2951_v59 }
 0x61b   :  { %2241 = vmatmul.bf16.gmra.mxu2 %v7364_v61  ;;  %4140 = vmatmul.msk.f32.gmra.mxu0 %vm2285_vm1, %v7366_v46  ;;  %v7372_v61 = vld [vmem:[#allocation28_spill] sm:$0xff] }
 0x61c   :  { %v2450_v37 = vpop.f32.mrf.mxu3  ;;  %v7373_v20 = vmax.f32 %v7372_v61, 0.0 }
 0x61d   :  { %v2756_v42 = vadd.f32 %v2755_v52, %v2450_v37  ;;  %v7370_v52 = vld [vmem:[#allocation31_spill] sm:$0xff] }
 0x61e   :  { %v2202_v6 = vpop.f32.mrf.mxu2  ;;  %v7371_v51 = vmax.f32 %v7370_v52, 0.0 }
 0x61f   :  { %v2203_v60 = vadd.f32 %v2202_v6, %v2074_v17  ;;  %v6165_v26 = vadd.f32 %v6144_v47, %v2756_v42 }
 0x620   :  { %v2761_v23 = vpop.f32.mrf.mxu0 }
 0x621   :  { %4092 = vmatmul.msk.f32.gmra.mxu3 %vm2285_vm1, %v2203_v60  ;;  %v2952_v19 = vsel %vm2950_vm2, %v6165_v26, -inf }
 0x622   :  { %3001 = vmax.xlane.f32.xlu0 %v2952_v19  ;;  %v7374_v19 = vld [vmem:[#allocation73_spill] sm:$0xff] }
 0x623   :  { %4141 = vmatmul.msk.f32.gmra.mxu0 %vm2285_vm1, %v7368_v36  ;;  %v2084_v36 = vadd.f32 %v6101_v29, %v5895_v16  ;;  %v2086_v29 = vadd.f32 %v6115_v31, %v5905_v44  ;;  %v2089_v31 = vadd.f32 %v6160_v22, %v5907_v38  ;;  %v2091_v22 = vadd.f32 %v6176_v35, %v5914_v27 }
 0x624   :  { %v2453_v30 = vpop.f32.mrf.mxu3 }
 0x625   :  { %v2759_v18 = vadd.f32 %v2758_v4, %v2453_v30  ;;  %v6194_v4 = vpop.f32.mrf.mxu1 }
 0x626   :  { %v2204_v40 = vpop.f32.mrf.mxu2  ;;  %v2094_v35 = vadd.f32 %v6194_v4, %v5918_v15  ;;  %v7389_v4 = vld [vmem:[#allocation12_spill] sm:$0xff] }
 0x627   :  { %v2205_v53 = vadd.f32 %v2204_v40, %v2076_v28  ;;  %v6179_v62 = vadd.f32 %v6144_v47, %v2759_v18 }
 0x628   :  { %v2764_v25 = vpop.f32.mrf.mxu0 }
 0x629   :  { %4093 = vmatmul.msk.f32.gmra.mxu3 %vm2285_vm1, %v2205_v53  ;;  %v2953_v9 = vsel %vm2950_vm2, %v6179_v62, -inf }
 0x62a   :  { %3003 = vmax.xlane.f32.xlu1 %v2953_v9  ;;  %v7377_v9 = vld [vmem:[#allocation74_spill] sm:$0xff] }
 0x62b   :  { %2246 = vmatmul.bf16.gmra.mxu2 %v7369_v3  ;;  %4142 = vmatmul.msk.f32.gmra.mxu0 %vm2285_vm1, %v7371_v51  ;;  %v7378_v3 = vmax.f32 %v7377_v9, 0.0 }
 0x62c   :  { %v2456_v45 = vpop.f32.mrf.mxu3 }
 0x62d   :  { %v2762_v48 = vadd.f32 %v2761_v23, %v2456_v45  ;;  %v6212_v23 = vpop.f32.mrf.mxu1 }
 0x62e   :  { %v2207_v11 = vpop.f32.mrf.mxu2 }
 0x62f   :  { %v2208_v56 = vadd.f32 %v2207_v11, %v2079_v8  ;;  %v6192_v12 = vadd.f32 %v6144_v47, %v2762_v48 }
 0x630   :  { %v2767_v32 = vpop.f32.mrf.mxu0 }
 0x631   :  { %4094 = vmatmul.msk.f32.gmra.mxu3 %vm2285_vm1, %v2208_v56  ;;  %v2954_v59 = vsel %vm2950_vm2, %v6192_v12, -inf }
 0x632   :  { %3005 = vmax.xlane.f32.xlu1 %v2954_v59  ;;  %v7380_v59 = vld [vmem:[#allocation70_spill] sm:$0xff] }
 0x633   :  { %4143 = vmatmul.msk.f32.gmra.mxu0 %vm2285_vm1, %v7373_v20  ;;  %v7381_v61 = vmax.f32 %v7380_v59, 0.0  ;;  %v2096_v59 = vadd.f32 %v6212_v23, %v7389_v4  ;;  %v7398_v4 = vld [vmem:[#allocation54_spill] sm:$0xff] }
 0x634   :  { %v2459_v24 = vpop.f32.mrf.mxu3 }
 0x635   :  { %v2765_v46 = vadd.f32 %v2764_v25, %v2459_v24  ;;  %v6230_v16 = vpop.f32.mrf.mxu1 }
 0x636   :  { %v2209_v37 = vpop.f32.mrf.mxu2 }
 0x637   :  { %v2210_v17 = vadd.f32 %v2209_v37, %v2081_v2  ;;  %v6206_v42 = vadd.f32 %v6144_v47, %v2765_v46 }
 0x638   :  { %v2770_v6 = vpop.f32.mrf.mxu0 }
 0x639   :  { %4095 = vmatmul.msk.f32.gmra.mxu3 %vm2285_vm1, %v2210_v17  ;;  %v2955_v60 = vsel %vm2950_vm2, %v6206_v42, -inf }
 0x63a   :  { %3007 = vmax.xlane.f32.xlu2 %v2955_v60  ;;  %v7382_v60 = vld [vmem:[#allocation69_spill] sm:$0xff] }
 0x63b   :  { %2251 = vmatmul.bf16.gmra.mxu2 %v7374_v19  ;;  %4144 = vmatmul.msk.f32.gmra.mxu0 %vm2285_vm1, %v7376_v14  ;;  %v7383_v19 = vmax.f32 %v7382_v60, 0.0 }
 0x63c   :  { %v2462_v58 = vpop.f32.mrf.mxu3 }
 0x63d   :  { %v2768_v30 = vadd.f32 %v2767_v32, %v2462_v58  ;;  %v7379_v32 = vld [vmem:[#allocation78_spill] sm:$0xff]  ;;  %v2100_v2 = vpop.f32.mrf.mxu1 }
 0x63e   :  { %v2212_v28 = vpop.f32.mrf.mxu2 }
 0x63f   :  { %v2213_v18 = vadd.f32 %v2212_v28, %v2084_v36  ;;  %v6221_v40 = vadd.f32 %v6144_v47, %v2768_v30 }
 0x640   :  { %v2773_v53 = vpop.f32.mrf.mxu0 }
 0x641   :  { %4096 = vmatmul.msk.f32.gmra.mxu3 %vm2285_vm1, %v2213_v18  ;;  %v2956_v25 = vsel %vm2950_vm2, %v6221_v40, -inf }
 0x642   :  { %3009 = vmax.xlane.f32.xlu2 %v2956_v25  ;;  %v7385_v25 = vld [vmem:[#allocation65_spill] sm:$0xff] }
 0x643   :  { %4145 = vmatmul.msk.f32.gmra.mxu0 %vm2285_vm1, %v7378_v3  ;;  %v7386_v9 = vmax.f32 %v7385_v25, 0.0  ;;  %v7394_v25 = vld [vmem:[#allocation55_spill] sm:$0xff] }
 0x644   :  { %v2465_v52 = vpop.f32.mrf.mxu3 }
 0x645   :  { %v2771_v51 = vadd.f32 %v2770_v6, %v2465_v52  ;;  %v2103_v28 = vpop.f32.mrf.mxu1 }
 0x646   :  { %v2214_v45 = vpop.f32.mrf.mxu2 }
 0x647   :  { %v2215_v8 = vadd.f32 %v2214_v45, %v2086_v29  ;;  %v6235_v48 = vadd.f32 %v6144_v47, %v2771_v51 }
 0x648   :  { %v2776_v11 = vpop.f32.mrf.mxu0 }
 0x649   :  { %4097 = vmatmul.msk.f32.gmra.mxu3 %vm2285_vm1, %v2215_v8  ;;  %v2957_v56 = vsel %vm2950_vm2, %v6235_v48, -inf }
 0x64a   :  { %3011 = vmax.xlane.f32.xlu0 %v2957_v56  ;;  %v7387_v56 = vld [vmem:[#allocation64_spill] sm:$0xff] }
 0x64b   :  { %2256 = vmatmul.bf16.gmra.mxu2 %v7379_v32  ;;  %4146 = vmatmul.msk.f32.gmra.mxu0 %vm2285_vm1, %v7381_v61  ;;  %v7388_v32 = vmax.f32 %v7387_v56, 0.0 }
 0x64c   :  { %v2468_v44 = vpop.f32.mrf.mxu3 }
 0x64d   :  { %v2774_v20 = vadd.f32 %v2773_v53, %v2468_v44  ;;  %v7384_v53 = vld [vmem:[#allocation81_spill] sm:$0xff] }
 0x64e   :  { %v2217_v24 = vpop.f32.mrf.mxu2 }
 0x64f   :  { %v2218_v46 = vadd.f32 %v2217_v24, %v2089_v31  ;;  %v6248_v37 = vadd.f32 %v6144_v47, %v2774_v20 }
 0x650   :  { %v2779_v17 = vpop.f32.mrf.mxu0 }
 0x651   :  { %4098 = vmatmul.msk.f32.gmra.mxu3 %vm2285_vm1, %v2218_v46  ;;  %v2958_v6 = vsel %vm2950_vm2, %v6248_v37, -inf }
 0x652   :  { %3013 = vmax.xlane.f32.xlu1 %v2958_v6  ;;  %v7391_v6 = vld [vmem:[#allocation60_spill] sm:$0xff] }
 0x653   :  { %4147 = vmatmul.msk.f32.gmra.mxu0 %vm2285_vm1, %v7383_v19  ;;  %v7392_v60 = vmax.f32 %v7391_v6, 0.0 }
 0x654   :  { %v2471_v38 = vpop.f32.mrf.mxu3 }
 0x655   :  { %v2777_v21 = vadd.f32 %v2776_v11, %v2471_v38  ;;  %v2105_v11 = vpop.f32.mrf.mxu1  ;;  %v7393_v38 = vld [vmem:[#allocation67_spill] sm:$0xff] }
 0x656   :  { %v2219_v14 = vpop.f32.mrf.mxu2 }
 0x657   :  { %v2220_v58 = vadd.f32 %v2219_v14, %v2091_v22  ;;  %v6260_v36 = vadd.f32 %v6144_v47, %v2777_v21  ;;  %v2099_v22 = vadd.f32 %v6230_v16, %v7393_v38  ;;  %v7396_v16 = vld [vmem:[#allocation45_spill] sm:$0xff]  ;;  %v7401_v38 = vld [vmem:[#allocation59_spill] sm:$0xff] }
 0x658   :  { %v2782_v30 = vpop.f32.mrf.mxu0 }
 0x659   :  { %4099 = vmatmul.msk.f32.gmra.mxu3 %vm2285_vm1, %v2220_v58  ;;  %v2959_v18 = vsel %vm2950_vm2, %v6260_v36, -inf }
 0x65a   :  { %3015 = vmax.xlane.f32.xlu2 %v2959_v18 }
 0x65b   :  { %2261 = vmatmul.bf16.gmra.mxu2 %v7384_v53  ;;  %4148 = vmatmul.msk.f32.gmra.mxu0 %vm2285_vm1, %v7386_v9  ;;  %v7395_v9 = vmax.f32 %v7394_v25, 0.0 }
 0x65c   :  { %v2474_v27 = vpop.f32.mrf.mxu3 }
 0x65d   :  { %v2780_v3 = vadd.f32 %v2779_v17, %v2474_v27  ;;  %v7390_v17 = vld [vmem:[#allocation83_spill] sm:$0xff]  ;;  %v2108_v19 = vpop.f32.mrf.mxu1 }
 0x65e   :  { %v2222_v52 = vpop.f32.mrf.mxu2 }
 0x65f   :  { %v2223_v29 = vadd.f32 %v2222_v52, %v2094_v35  ;;  %v6273_v51 = vadd.f32 %v6144_v47, %v2780_v3  ;;  %v2101_v35 = vadd.f32 %v2100_v2, %v7396_v16 }
 0x660   :  { %v2785_v45 = vpop.f32.mrf.mxu0 }
 0x661   :  { %4100 = vmatmul.msk.f32.gmra.mxu3 %vm2285_vm1, %v2223_v29  ;;  %v2960_v8 = vsel %vm2950_vm2, %v6273_v51, -inf }
 0x662   :  { %3017 = vmax.xlane.f32.xlu0 %v2960_v8 }
 0x663   :  { %4149 = vmatmul.msk.f32.gmra.mxu0 %vm2285_vm1, %v7388_v32 }
 0x664   :  { %v2477_v15 = vpop.f32.mrf.mxu3 }
 0x665   :  { %v2783_v61 = vadd.f32 %v2782_v30, %v2477_v15  ;;  %v2110_v29 = vpop.f32.mrf.mxu1  ;;  %v7397_v15 = vld [vmem:[#allocation85_spill] sm:$0xff] }
 0x666   :  { %v2224_v44 = vpop.f32.mrf.mxu2 }
 0x667   :  { %v2225_v31 = vadd.f32 %v2224_v44, %v2096_v59  ;;  %v6285_v20 = vadd.f32 %v6144_v47, %v2783_v61  ;;  %v7399_v59 = vmax.f32 %v7398_v4, 0.0  ;;  %v7400_v61 = vld [vmem:[#allocation44_spill] sm:$0xff] }
 0x668   :  { %v2788_v24 = vpop.f32.mrf.mxu0  ;;  %v2104_v44 = vadd.f32 %v2103_v28, %v7400_v61 }
 0x669   :  { %4101 = vmatmul.msk.f32.gmra.mxu3 %vm2285_vm1, %v2225_v31  ;;  %v2961_v46 = vsel %vm2950_vm2, %v6285_v20, -inf }
 0x66a   :  { %3019 = vmax.xlane.f32.xlu1 %v2961_v46 }
 0x66b   :  { %2266 = vmatmul.bf16.gmra.mxu2 %v7390_v17  ;;  %4150 = vmatmul.msk.f32.gmra.mxu0 %vm2285_vm1, %v7392_v60 }
 0x66c   :  { %v2480_v23 = vpop.f32.mrf.mxu3 }
 0x66d   :  { %v2786_v21 = vadd.f32 %v2785_v45, %v2480_v23  ;;  %v2113_v60 = vpop.f32.mrf.mxu1 }
 0x66e   :  { %v2227_v14 = vpop.f32.mrf.mxu2 }
 0x66f   :  { %v2228_v58 = vadd.f32 %v2227_v14, %v2099_v22  ;;  %v6298_v30 = vadd.f32 %v6144_v47, %v2786_v21  ;;  %v7402_v22 = vmax.f32 %v7401_v38, 0.0  ;;  %v7403_v21 = vld [vmem:[#allocation40_spill] sm:$0xff]  ;;  %v2111_v38 = vadd.f32 %v2110_v29, %v5972_v34 }
 0x670   :  { %v2791_v18 = vpop.f32.mrf.mxu0  ;;  %v2106_v14 = vadd.f32 %v2105_v11, %v7403_v21  ;;  %v7406_v11 = vld [vmem:[#allocation56_spill] sm:$0xff] }
 0x671   :  { %4102 = vmatmul.msk.f32.gmra.mxu3 %vm2285_vm1, %v2228_v58  ;;  %v2962_v53 = vsel %vm2950_vm2, %v6298_v30, -inf }
 0x672   :  { %3021 = vmax.xlane.f32.xlu2 %v2962_v53 }
 0x673   :  { %4151 = vmatmul.msk.f32.gmra.mxu0 %vm2285_vm1, %v7395_v9 }
 0x674   :  { %v2483_v27 = vpop.f32.mrf.mxu3 }
 0x675   :  { %v2789_v3 = vadd.f32 %v2788_v24, %v2483_v27  ;;  %v2115_v16 = vpop.f32.mrf.mxu1 }
 0x676   :  { %v2229_v52 = vpop.f32.mrf.mxu2 }
 0x677   :  { %v2230_v45 = vadd.f32 %v2229_v52, %v2101_v35  ;;  %v6309_v8 = vadd.f32 %v6144_v47, %v2789_v3  ;;  %v7404_v35 = vld [vmem:[#allocation62_spill] sm:$0xff]  ;;  %v7407_v52 = vmax.f32 %v7406_v11, 0.0  ;;  %v2114_v11 = vadd.f32 %v2113_v60, %v5980_v33 }
 0x678   :  { %v2794_v56 = vpop.f32.mrf.mxu0  ;;  %v7405_v3 = vmax.f32 %v7404_v35, 0.0 }
 0x679   :  { %4103 = vmatmul.msk.f32.gmra.mxu3 %vm2285_vm1, %v2230_v45  ;;  %v2963_v32 = vsel %vm2950_vm2, %v6309_v8, -inf }
 0x67a   :  { %3023 = vmax.xlane.f32.xlu0 %v2963_v32 }
 0x67b   :  { %2271 = vmatmul.bf16.gmra.mxu2 %v7397_v15  ;;  %4152 = vmatmul.msk.f32.gmra.mxu0 %vm2285_vm1, %v7399_v59 }
 0x67c   :  { %v2486_v2 = vpop.f32.mrf.mxu3 }
 0x67d   :  { %v2792_v31 = vadd.f32 %v2791_v18, %v2486_v2 }
 0x67e   :  { %v2232_v24 = vpop.f32.mrf.mxu2 }
 0x67f   :  { %v2233_v46 = vadd.f32 %v2232_v24, %v2104_v44  ;;  %v6321_v17 = vadd.f32 %v6144_v47, %v2792_v31 }
 0x680   :  { %v2797_v6 = vpop.f32.mrf.mxu0 }
 0x681   :  { %4104 = vmatmul.msk.f32.gmra.mxu3 %vm2285_vm1, %v2233_v46  ;;  %v2964_v23 = vsel %vm2950_vm2, %v6321_v17, -inf }
 0x682   :  { %3025 = vmax.xlane.f32.xlu1 %v2964_v23 }
 0x683   :  { %4153 = vmatmul.msk.f32.gmra.mxu0 %vm2285_vm1, %v7402_v22 }
 0x684   :  { %v2489_v28 = vpop.f32.mrf.mxu3 }
 0x685   :  { %v2795_v58 = vadd.f32 %v2794_v56, %v2489_v28  ;;  %v7408_v56 = vld [vmem:[#allocation39_spill] sm:$0xff] }
 0x686   :  { %v2234_v18 = vpop.f32.mrf.mxu2  ;;  %v2109_v32 = vadd.f32 %v2108_v19, %v7408_v56  ;;  %v7409_v19 = vld [vmem:[#allocation10_spill] sm:$0xff] }
 0x687   :  { %v2235_v53 = vadd.f32 %v2234_v18, %v2106_v14  ;;  %v6332_v25 = vadd.f32 %v6144_v47, %v2795_v58 }
 0x688   :  { %v2800_v9 = vpop.f32.mrf.mxu0 }
 0x689   :  { %4105 = vmatmul.msk.f32.gmra.mxu3 %vm2285_vm1, %v2235_v53  ;;  %v2965_v27 = vsel %vm2950_vm2, %v6332_v25, -inf }
 0x68a   :  { %3027 = vmax.xlane.f32.xlu2 %v2965_v27 }
 0x68b   :  { %4154 = vmatmul.msk.f32.gmra.mxu0 %vm2285_vm1, %v7405_v3  ;;  %4169 = vmatmul.msk.f32.vlgmr.msrb.gmra.mxu2 %vm2285_vm1, %v7407_v52 }
 0x68c   :  { %v2492_v45 = vpop.f32.mrf.mxu3 }
 0x68d   :  { %v2798_v15 = vadd.f32 %v2797_v6, %v2492_v45  ;;  %v3000_v4 = vpop.xlane.xlu0 %2999  ;;  %v7410_v6 = vmax.f32 %v7409_v19, 0.0 }
 0x68e   :  { %v6346_v59 = vsub.f32 %v6150_v57, %v3000_v4  ;;  %v2237_v2 = vpop.f32.mrf.mxu2  ;;  %v2118_v57 = vpop.f32.mrf.mxu1 }
 0x68f   :  { %v2238_v61 = vadd.f32 %v2237_v2, %v2109_v32  ;;  %v6349_v44 = vadd.f32 %v6144_v47, %v2798_v15 }
 0x690   :  { %v3143_v31 = vmul.f32 1.442695, %v6346_v59  ;;  %v2803_v24 = vpop.f32.mrf.mxu0 }
 0x691   :  { %4106 = vmatmul.msk.f32.gmra.mxu3 %vm2285_vm1, %v2238_v61  ;;  %v2966_v46 = vsel %vm2950_vm2, %v6349_v44, -inf }
 0x692   :  { %4287 = vpow2.f32 %v3143_v31  ;;  %3029 = vmax.xlane.f32.xlu0 %v2966_v46 }
 0x693   :  { %4155 = vmatmul.msk.f32.gmra.mxu0 %vm2285_vm1, %v7410_v6  ;;  %v2116_v6 = vadd.f32 %v2115_v16, %v5992_v5  ;;  %v7415_v16 = vld [vmem:[#allocation52_spill] sm:$0xff] }
 0x694   :  { %v2495_v23 = vpop.f32.mrf.mxu3 }
 0x695   :  { %v2801_v22 = vadd.f32 %v2800_v9, %v2495_v23  ;;  %v3002_v28 = vpop.xlane.xlu0 %3001 }
 0x696   :  { %v6361_v21 = vsub.f32 %v6165_v26, %v3002_v28  ;;  %v2239_v14 = vpop.f32.mrf.mxu2  ;;  %v7411_v26 = vld [vmem:[#allocation57_spill] sm:$0xff]  ;;  %v2120_v56 = vpop.f32.mrf.mxu1 }
 0x697   :  { %v2240_v58 = vadd.f32 %v2239_v14, %v2111_v38  ;;  %v6364_v18 = vadd.f32 %v6144_v47, %v2801_v22  ;;  %v7412_v29 = vmax.f32 %v7411_v26, 0.0 }
 0x698   :  { %v4288_v53 = vpop.eup %4287  ;;  %v3145_v27 = vmul.f32 1.442695, %v6361_v21  ;;  %v2806_v35 = vpop.f32.mrf.mxu0 }
 0x699   :  { %4107 = vmatmul.msk.f32.gmra.mxu3 %vm2285_vm1, %v2240_v58  ;;  %v3239_v3 = vsel %vm2950_vm2, %v4288_v53, 0.0  ;;  %v2967_v34 = vsel %vm2950_vm2, %v6364_v18, -inf }
 0x69a   :  { %4289 = vpow2.f32 %v3145_v27  ;;  %3287 = vadd.xlane.f32.xlu0 %v3239_v3  ;;  %3031 = vmax.xlane.f32.xlu1 %v2967_v34 }
 0x69b   :  { %4156 = vmatmul.msk.f32.gmra.mxu0 %vm2285_vm1, %v7412_v29  ;;  %v2119_v29 = vadd.f32 %v2118_v57, %v6002_v7  ;;  %v7417_v57 = vld [vmem:[#allocation79_spill] sm:$0xff] }
 0x69c   :  { %v2498_v9 = vpop.f32.mrf.mxu3 }
 0x69d   :  { %v2804_v52 = vadd.f32 %v2803_v24, %v2498_v9  ;;  %v3004_v45 = vpop.xlane.xlu1 %3003 }
 0x69e   :  { %v6378_v32 = vsub.f32 %v6179_v62, %v3004_v45  ;;  %v2242_v15 = vpop.f32.mrf.mxu2  ;;  %v7413_v62 = vld [vmem:[#allocation8_spill] sm:$0xff]  ;;  %v2123_v27 = vpop.f32.mrf.mxu1 }
 0x69f   :  { %v2243_v4 = vadd.f32 %v2242_v15, %v2114_v11  ;;  %v6381_v2 = vadd.f32 %v6144_v47, %v2804_v52  ;;  %v7414_v24 = vmax.f32 %v7413_v62, 0.0 }
 0x6a0   :  { %v4290_v61 = vpop.eup %4289  ;;  %v3147_v31 = vmul.f32 1.442695, %v6378_v32  ;;  %v2809_v46 = vpop.f32.mrf.mxu0 }
 0x6a1   :  { %4108 = vmatmul.msk.f32.gmra.mxu3 %vm2285_vm1, %v2243_v4  ;;  %v3240_v33 = vsel %vm2950_vm2, %v4290_v61, 0.0  ;;  %v2968_v60 = vsel %vm2950_vm2, %v6381_v2, -inf }
 0x6a2   :  { %4291 = vpow2.f32 %v3147_v31  ;;  %3289 = vadd.xlane.f32.xlu1 %v3240_v33  ;;  %3033 = vmax.xlane.f32.xlu2 %v2968_v60 }
 0x6a3   :  { %4157 = vmatmul.msk.f32.gmra.mxu0 %vm2285_vm1, %v7414_v24  ;;  %v2121_v24 = vadd.f32 %v2120_v56, %v6014_v63 }
 0x6a4   :  { %v2501_v19 = vpop.f32.mrf.mxu3 }
 0x6a5   :  { %v2807_v23 = vadd.f32 %v2806_v35, %v2501_v19  ;;  %v3006_v38 = vpop.xlane.xlu1 %3005  ;;  %v7416_v35 = vmax.f32 %v7415_v16, 0.0 }
 0x6a6   :  { %v6395_v22 = vsub.f32 %v6192_v12, %v3006_v38  ;;  %v2244_v28 = vpop.f32.mrf.mxu2 }
 0x6a7   :  { %v2245_v14 = vadd.f32 %v2244_v28, %v2116_v6  ;;  %v6398_v58 = vadd.f32 %v6144_v47, %v2807_v23 }
 0x6a8   :  { %v4292_v53 = vpop.eup %4291  ;;  %v3149_v3 = vmul.f32 1.442695, %v6395_v22  ;;  %v2812_v34 = vpop.f32.mrf.mxu0 }
 0x6a9   :  { %4109 = vmatmul.msk.f32.gmra.mxu3 %vm2285_vm1, %v2245_v14  ;;  %v3241_v5 = vsel %vm2950_vm2, %v4292_v53, 0.0  ;;  %v2969_v12 = vsel %vm2950_vm2, %v6398_v58, -inf }
 0x6aa   :  { %4293 = vpow2.f32 %v3149_v3  ;;  %3291 = vadd.xlane.f32.xlu2 %v3241_v5  ;;  %3035 = vmax.xlane.f32.xlu0 %v2969_v12 }
 0x6ab   :  { %4158 = vmatmul.msk.f32.gmra.mxu0 %vm2285_vm1, %v7416_v35  ;;  %v2124_v35 = vadd.f32 %v2123_v27, %v6024_v1 }
 0x6ac   :  { %v2504_v26 = vpop.f32.mrf.mxu3 }
 0x6ad   :  { %v2810_v9 = vadd.f32 %v2809_v46, %v2504_v26  ;;  %v3008_v11 = vpop.xlane.xlu2 %3007  ;;  %v7418_v46 = vmax.f32 %v7417_v57, 0.0 }
 0x6ae   :  { %v6412_v52 = vsub.f32 %v6206_v42, %v3008_v11  ;;  %v2247_v45 = vpop.f32.mrf.mxu2  ;;  %v2125_v42 = vpop.f32.mrf.mxu1 }
 0x6af   :  { %v2248_v15 = vadd.f32 %v2247_v45, %v2119_v29  ;;  %v6415_v4 = vadd.f32 %v6144_v47, %v2810_v9  ;;  %v2126_v57 = vadd.f32 %v2125_v42, %v6034_v49 }
 0x6b0   :  { %v4294_v61 = vpop.eup %4293  ;;  %v3151_v31 = vmul.f32 1.442695, %v6412_v52  ;;  %v2815_v33 = vpop.f32.mrf.mxu0 }
 0x6b1   :  { %4110 = vmatmul.msk.f32.gmra.mxu3 %vm2285_vm1, %v2248_v15  ;;  %v3242_v60 = vsel %vm2950_vm2, %v4294_v61, 0.0  ;;  %v2970_v7 = vsel %vm2950_vm2, %v6415_v4, -inf }
 0x6b2   :  { %4295 = vpow2.f32 %v3151_v31  ;;  %3293 = vadd.xlane.f32.xlu0 %v3242_v60  ;;  %3037 = vmax.xlane.f32.xlu1 %v2970_v7 }
 0x6b3   :  { %4159 = vmatmul.msk.f32.gmra.mxu0 %vm2285_vm1, %v7418_v46 }
 0x6b4   :  { %v2507_v62 = vpop.f32.mrf.mxu3 }
 0x6b5   :  { %v2813_v19 = vadd.f32 %v2812_v34, %v2507_v62  ;;  %v3010_v6 = vpop.xlane.xlu2 %3009 }
 0x6b6   :  { %v6429_v23 = vsub.f32 %v6221_v40, %v3010_v6  ;;  %v2249_v38 = vpop.f32.mrf.mxu2  ;;  %v7419_v40 = vld [vmem:[#allocation47_spill] sm:$0xff]  ;;  %v2128_v34 = vpop.f32.mrf.mxu1 }
 0x6b7   :  { %v2250_v28 = vadd.f32 %v2249_v38, %v2121_v24  ;;  %v6432_v14 = vadd.f32 %v6144_v47, %v2813_v19  ;;  %v7420_v56 = vmax.f32 %v7419_v40, 0.0  ;;  %v2129_v40 = vadd.f32 %v2128_v34, %v6044_v0  ;;  %v7425_v34 = vld [vmem:[#allocation71_spill] sm:$0xff] }
 0x6b8   :  { %v4296_v53 = vpop.eup %4295  ;;  %v3153_v3 = vmul.f32 1.442695, %v6429_v23  ;;  %v2818_v5 = vpop.f32.mrf.mxu0 }
 0x6b9   :  { %4111 = vmatmul.msk.f32.gmra.mxu3 %vm2285_vm1, %v2250_v28  ;;  %v3243_v12 = vsel %vm2950_vm2, %v4296_v53, 0.0  ;;  %v2971_v63 = vsel %vm2950_vm2, %v6432_v14, -inf }
 0x6ba   :  { %4297 = vpow2.f32 %v3153_v3  ;;  %3295 = vadd.xlane.f32.xlu1 %v3243_v12  ;;  %3039 = vmax.xlane.f32.xlu2 %v2971_v63 }
 0x6bb   :  { %4160 = vmatmul.msk.f32.gmra.mxu0 %vm2285_vm1, %v7420_v56 }
 0x6bc   :  { %v2510_v16 = vpop.f32.mrf.mxu3 }
 0x6bd   :  { %v2816_v26 = vadd.f32 %v2815_v33, %v2510_v16  ;;  %v3012_v29 = vpop.xlane.xlu0 %3011 }
 0x6be   :  { %v6446_v9 = vsub.f32 %v6235_v48, %v3012_v29  ;;  %v2252_v11 = vpop.f32.mrf.mxu2  ;;  %v7421_v48 = vld [vmem:[#allocation76_spill] sm:$0xff]  ;;  %v2130_v24 = vpop.f32.mrf.mxu1 }
 0x6bf   :  { %v2253_v45 = vadd.f32 %v2252_v11, %v2124_v35  ;;  %v6449_v15 = vadd.f32 %v6144_v47, %v2816_v26  ;;  %v7422_v27 = vmax.f32 %v7421_v48, 0.0  ;;  %v2131_v48 = vadd.f32 %v2130_v24, %v6056_v39  ;;  %v7427_v24 = vld [vmem:[#allocation37_spill] sm:$0xff] }
 0x6c0   :  { %v4298_v61 = vpop.eup %4297  ;;  %v3155_v31 = vmul.f32 1.442695, %v6446_v9  ;;  %v2821_v60 = vpop.f32.mrf.mxu0 }
 0x6c1   :  { %4112 = vmatmul.msk.f32.gmra.mxu3 %vm2285_vm1, %v2253_v45  ;;  %v3244_v7 = vsel %vm2950_vm2, %v4298_v61, 0.0  ;;  %v2972_v1 = vsel %vm2950_vm2, %v6449_v15, -inf }
 0x6c2   :  { %4299 = vpow2.f32 %v3155_v31  ;;  %3297 = vadd.xlane.f32.xlu2 %v3244_v7  ;;  %3041 = vmax.xlane.f32.xlu0 %v2972_v1 }
 0x6c3   :  { %4161 = vmatmul.msk.f32.gmra.mxu0 %vm2285_vm1, %v7422_v27 }
 0x6c4   :  { %v2513_v33 = vpop.f32.mrf.mxu3 }
 0x6c5   :  { %v2819_v46 = vadd.f32 %v2818_v5, %v2513_v33  ;;  %v3014_v62 = vpop.xlane.xlu1 %3013 }
 0x6c6   :  { %v6463_v19 = vsub.f32 %v6248_v37, %v3014_v62  ;;  %v2254_v6 = vpop.f32.mrf.mxu2  ;;  %v7423_v37 = vld [vmem:[#allocation42_spill] sm:$0xff]  ;;  %v2133_v61 = vpop.f32.mrf.mxu1 }
 0x6c7   :  { %v2255_v38 = vadd.f32 %v2254_v6, %v2126_v57  ;;  %v6466_v28 = vadd.f32 %v6144_v47, %v2819_v46  ;;  %v7424_v5 = vmax.f32 %v7423_v37, 0.0  ;;  %v2134_v37 = vadd.f32 %v2133_v61, %v6066_v13 }
 0x6c8   :  { %v4300_v53 = vpop.eup %4299  ;;  %v3157_v3 = vmul.f32 1.442695, %v6463_v19  ;;  %v2824_v12 = vpop.f32.mrf.mxu0 }
 0x6c9   :  { %4113 = vmatmul.msk.f32.gmra.mxu3 %vm2285_vm1, %v2255_v38  ;;  %v3245_v49 = vsel %vm2950_vm2, %v4300_v53, 0.0  ;;  %v2973_v42 = vsel %vm2950_vm2, %v6466_v28, -inf }
 0x6ca   :  { %4301 = vpow2.f32 %v3157_v3  ;;  %3299 = vadd.xlane.f32.xlu0 %v3245_v49  ;;  %3043 = vmax.xlane.f32.xlu1 %v2973_v42 }
 0x6cb   :  { %4162 = vmatmul.msk.f32.gmra.mxu0 %vm2285_vm1, %v7424_v5 }
 0x6cc   :  { %v2516_v63 = vpop.f32.mrf.mxu3 }
 0x6cd   :  { %v2822_v56 = vadd.f32 %v2821_v60, %v2516_v63  ;;  %v3016_v16 = vpop.xlane.xlu2 %3015  ;;  %v7426_v60 = vmax.f32 %v7425_v34, 0.0 }
 0x6ce   :  { %v6480_v35 = vsub.f32 %v6260_v36, %v3016_v16  ;;  %v2257_v26 = vpop.f32.mrf.mxu2 }
 0x6cf   :  { %v2258_v29 = vadd.f32 %v2257_v26, %v2129_v40  ;;  %v6483_v11 = vadd.f32 %v6144_v47, %v2822_v56 }
 0x6d0   :  { %v4302_v45 = vpop.eup %4301  ;;  %v3159_v31 = vmul.f32 1.442695, %v6480_v35  ;;  %v2827_v7 = vpop.f32.mrf.mxu0 }
 0x6d1   :  { %4114 = vmatmul.msk.f32.gmra.mxu3 %vm2285_vm1, %v2258_v29  ;;  %v3246_v0 = vsel %vm2950_vm2, %v4302_v45, 0.0  ;;  %v2974_v36 = vsel %vm2950_vm2, %v6483_v11, -inf }
 0x6d2   :  { %4303 = vpow2.f32 %v3159_v31  ;;  %3301 = vadd.xlane.f32.xlu1 %v3246_v0  ;;  %3045 = vmax.xlane.f32.xlu2 %v2974_v36 }
 0x6d3   :  { %4163 = vmatmul.msk.f32.gmra.mxu0 %vm2285_vm1, %v7426_v60 }
 0x6d4   :  { %v2519_v1 = vpop.f32.mrf.mxu3 }
 0x6d5   :  { %v2825_v27 = vadd.f32 %v2824_v12, %v2519_v1  ;;  %v3018_v33 = vpop.xlane.xlu0 %3017  ;;  %v7428_v12 = vmax.f32 %v7427_v24, 0.0 }
 0x6d6   :  { %v6497_v57 = vsub.f32 %v6273_v51, %v3018_v33  ;;  %v2259_v46 = vpop.f32.mrf.mxu2  ;;  %v2135_v51 = vpop.f32.mrf.mxu1 }
 0x6d7   :  { %v2260_v62 = vadd.f32 %v2259_v46, %v2131_v48  ;;  %v6500_v6 = vadd.f32 %v6144_v47, %v2825_v27  ;;  %v2136_v34 = vadd.f32 %v2135_v51, %v6078_v41 }
 0x6d8   :  { %v4304_v38 = vpop.eup %4303  ;;  %v3161_v53 = vmul.f32 1.442695, %v6497_v57  ;;  %v2830_v3 = vpop.f32.mrf.mxu0 }
 0x6d9   :  { %4115 = vmatmul.msk.f32.gmra.mxu3 %vm2285_vm1, %v2260_v62  ;;  %v3247_v49 = vsel %vm2950_vm2, %v4304_v38, 0.0  ;;  %v2975_v39 = vsel %vm2950_vm2, %v6500_v6, -inf }
 0x6da   :  { %4305 = vpow2.f32 %v3161_v53  ;;  %3303 = vadd.xlane.f32.xlu2 %v3247_v49  ;;  %3047 = vmax.xlane.f32.xlu0 %v2975_v39 }
 0x6db   :  { %4164 = vmatmul.msk.f32.gmra.mxu0 %vm2285_vm1, %v7428_v12 }
 0x6dc   :  { %v2522_v42 = vpop.f32.mrf.mxu3 }
 0x6dd   :  { %v2828_v5 = vadd.f32 %v2827_v7, %v2522_v42  ;;  %v3020_v63 = vpop.xlane.xlu1 %3019 }
 0x6de   :  { %v6514_v40 = vsub.f32 %v6285_v20, %v3020_v63  ;;  %v2262_v56 = vpop.f32.mrf.mxu2  ;;  %v7429_v20 = vld [vmem:[#allocation66_spill] sm:$0xff]  ;;  %v2138_v7 = vpop.f32.mrf.mxu1 }
 0x6df   :  { %v2263_v16 = vadd.f32 %v2262_v56, %v2134_v37  ;;  %v6517_v26 = vadd.f32 %v6144_v47, %v2828_v5  ;;  %v7430_v61 = vmax.f32 %v7429_v20, 0.0  ;;  %v2139_v51 = vadd.f32 %v2138_v7, %v6086_v43 }
 0x6e0   :  { %v4306_v29 = vpop.eup %4305  ;;  %v3163_v45 = vmul.f32 1.442695, %v6514_v40  ;;  %v2833_v31 = vpop.f32.mrf.mxu0 }
 0x6e1   :  { %4116 = vmatmul.msk.f32.gmra.mxu3 %vm2285_vm1, %v2263_v16  ;;  %v3248_v0 = vsel %vm2950_vm2, %v4306_v29, 0.0  ;;  %v2976_v13 = vsel %vm2950_vm2, %v6517_v26, -inf }
 0x6e2   :  { %4307 = vpow2.f32 %v3163_v45  ;;  %3305 = vadd.xlane.f32.xlu0 %v3248_v0  ;;  %3049 = vmax.xlane.f32.xlu1 %v2976_v13 }
 0x6e3   :  { %4165 = vmatmul.msk.f32.gmra.mxu0 %vm2285_vm1, %v7430_v61 }
 0x6e4   :  { %v2525_v36 = vpop.f32.mrf.mxu3 }
 0x6e5   :  { %v2831_v60 = vadd.f32 %v2830_v3, %v2525_v36  ;;  %v3022_v1 = vpop.xlane.xlu2 %3021 }
 0x6e6   :  { %v6531_v48 = vsub.f32 %v6298_v30, %v3022_v1  ;;  %v2264_v27 = vpop.f32.mrf.mxu2  ;;  %v7431_v30 = vld [vmem:[#allocation61_spill] sm:$0xff]  ;;  %v2140_v42 = vpop.f32.mrf.mxu1 }
 0x6e7   :  { %v2265_v33 = vadd.f32 %v2264_v27, %v2136_v34  ;;  %v6534_v46 = vadd.f32 %v6144_v47, %v2831_v60  ;;  %v7432_v3 = vmax.f32 %v7431_v30, 0.0  ;;  %v2141_v20 = vadd.f32 %v2140_v42, %v6098_v10 }
 0x6e8   :  { %v4308_v62 = vpop.eup %4307  ;;  %v3165_v38 = vmul.f32 1.442695, %v6531_v48  ;;  %v2836_v53 = vpop.f32.mrf.mxu0 }
 0x6e9   :  { %4117 = vmatmul.msk.f32.gmra.mxu3 %vm2285_vm1, %v2265_v33  ;;  %v3249_v49 = vsel %vm2950_vm2, %v4308_v62, 0.0  ;;  %v2977_v41 = vsel %vm2950_vm2, %v6534_v46, -inf }
 0x6ea   :  { %4309 = vpow2.f32 %v3165_v38  ;;  %3307 = vadd.xlane.f32.xlu1 %v3249_v49  ;;  %3051 = vmax.xlane.f32.xlu2 %v2977_v41 }
 0x6eb   :  { %4166 = vmatmul.msk.f32.gmra.mxu0 %vm2285_vm1, %v7432_v3 }
 0x6ec   :  { %v2528_v39 = vpop.f32.mrf.mxu3 }
 0x6ed   :  { %v2834_v24 = vadd.f32 %v2833_v31, %v2528_v39  ;;  %v3024_v12 = vpop.xlane.xlu0 %3023 }
 0x6ee   :  { %v6548_v37 = vsub.f32 %v6309_v8, %v3024_v12  ;;  %v2267_v5 = vpop.f32.mrf.mxu2  ;;  %v7433_v8 = vld [vmem:[#allocation51_spill] sm:$0xff]  ;;  %v2143_v33 = vpop.f32.mrf.mxu1 }
 0x6ef   :  { %v2268_v63 = vadd.f32 %v2267_v5, %v2139_v51  ;;  %v6551_v56 = vadd.f32 %v6144_v47, %v2834_v24  ;;  %v7434_v0 = vmax.f32 %v7433_v8, 0.0  ;;  %v2144_v30 = vadd.f32 %v2143_v33, %v6108_v50 }
 0x6f0   :  { %v4310_v16 = vpop.eup %4309  ;;  %v3167_v29 = vmul.f32 1.442695, %v6548_v37  ;;  %v2839_v45 = vpop.f32.mrf.mxu0 }
 0x6f1   :  { %4118 = vmatmul.msk.f32.gmra.mxu3 %vm2285_vm1, %v2268_v63  ;;  %v3250_v43 = vsel %vm2950_vm2, %v4310_v16, 0.0  ;;  %v2978_v31 = vsel %vm2950_vm2, %v6551_v56, -inf }
 0x6f2   :  { %4311 = vpow2.f32 %v3167_v29  ;;  %3309 = vadd.xlane.f32.xlu2 %v3250_v43  ;;  %3053 = vmax.xlane.f32.xlu0 %v2978_v31 }
 0x6f3   :  { %4167 = vmatmul.msk.f32.gmra.mxu0 %vm2285_vm1, %v7434_v0 }
 0x6f4   :  { %v2531_v13 = vpop.f32.mrf.mxu3 }
 0x6f5   :  { %v2837_v61 = vadd.f32 %v2836_v53, %v2531_v13  ;;  %v3026_v7 = vpop.xlane.xlu1 %3025  ;;  %v7435_v53 = vld [vmem:[#allocation46_spill] sm:$0xff] }
 0x6f6   :  { %v6565_v36 = vsub.f32 %v6321_v17, %v3026_v7  ;;  %v2269_v34 = vpop.f32.mrf.mxu2  ;;  %v7436_v49 = vmax.f32 %v7435_v53, 0.0 }
 0x6f7   :  { %v2270_v60 = vadd.f32 %v2269_v34, %v2141_v20  ;;  %v6568_v1 = vadd.f32 %v6144_v47, %v2837_v61 }
 0x6f8   :  { %v4312_v27 = vpop.eup %4311  ;;  %v3169_v62 = vmul.f32 1.442695, %v6565_v36  ;;  %v2842_v38 = vpop.f32.mrf.mxu0 }
 0x6f9   :  { %4119 = vmatmul.msk.f32.gmra.mxu3 %vm2285_vm1, %v2270_v60  ;;  %v3251_v10 = vsel %vm2950_vm2, %v4312_v27, 0.0  ;;  %v2979_v17 = vsel %vm2950_vm2, %v6568_v1, -inf }
 0x6fa   :  { %4313 = vpow2.f32 %v3169_v62  ;;  %3311 = vadd.xlane.f32.xlu0 %v3251_v10  ;;  %3055 = vmax.xlane.f32.xlu1 %v2979_v17 }
 0x6fb   :  { %4168 = vmatmul.msk.f32.gmra.mxu0 %vm2285_vm1, %v7436_v49 }
 0x6fc   :  { %v2534_v41 = vpop.f32.mrf.mxu3 }
 0x6fd   :  { %v2840_v3 = vadd.f32 %v2839_v45, %v2534_v41  ;;  %v3028_v39 = vpop.xlane.xlu2 %3027 }
 0x6fe   :  { %v6582_v51 = vsub.f32 %v6332_v25, %v3028_v39  ;;  %v2272_v24 = vpop.f32.mrf.mxu2  ;;  %v2145_v25 = vpop.f32.mrf.mxu1 }
 0x6ff   :  { %v2273_v12 = vadd.f32 %v2272_v24, %v2144_v30  ;;  %v6585_v42 = vadd.f32 %v6144_v47, %v2840_v3  ;;  %v2146_v43 = vadd.f32 %v2145_v25, %v6120_v54 }
 0x700   :  { %v4314_v5 = vpop.eup %4313  ;;  %v3171_v63 = vmul.f32 1.442695, %v6582_v51  ;;  %v2845_v16 = vpop.f32.mrf.mxu0 }
 0x701   :  { %4120 = vmatmul.msk.f32.gmra.mxu3 %vm2285_vm1, %v2273_v12  ;;  %v3252_v29 = vsel %vm2950_vm2, %v4314_v5, 0.0  ;;  %v2980_v50 = vsel %vm2950_vm2, %v6585_v42, -inf }
 0x702   :  { %4315 = vpow2.f32 %v3171_v63  ;;  %3313 = vadd.xlane.f32.xlu1 %v3252_v29  ;;  %3057 = vmax.xlane.f32.xlu2 %v2980_v50 }
 0x704   :  { %v2537_v45 = vpop.f32.mrf.mxu3 }
 0x705   :  { %v2843_v31 = vadd.f32 %v2842_v38, %v2537_v45  ;;  %v3030_v8 = vpop.xlane.xlu0 %3029 }
 0x706   :  { %v6596_v0 = vsub.f32 %v6349_v44, %v3030_v8  ;;  %v2274_v13 = vpop.f32.mrf.mxu2 }
 0x707   :  { %v2275_v20 = vadd.f32 %v2274_v13, %v2146_v43  ;;  %v6599_v61 = vadd.f32 %v6144_v47, %v2843_v31 }
 0x708   :  { %v4316_v7 = vpop.eup %4315  ;;  %v3173_v34 = vmul.f32 1.442695, %v6596_v0  ;;  %v2848_v60 = vpop.f32.mrf.mxu0 }
 0x709   :  { %4121 = vmatmul.msk.f32.gmra.mxu3 %vm2285_vm1, %v2275_v20  ;;  %v3253_v27 = vsel %vm2950_vm2, %v4316_v7, 0.0  ;;  %v2981_v54 = vsel %vm2950_vm2, %v6599_v61, -inf }
 0x70a   :  { %4317 = vpow2.f32 %v3173_v34  ;;  %3315 = vadd.xlane.f32.xlu2 %v3253_v27  ;;  %3059 = vmax.xlane.f32.xlu0 %v2981_v54  ;;  %v6640_v27 = vld [vmem:[%s6967_s7] ss:$0 sm:$0xff]  ;;  %s4535_s7 = smov [#allocation5]  }
 0x70b   :  { %s3579_s30 = sshll.u32 %s4535_s7, 4  ;;  %s3580_s30 = int_to_ptr.vmem [resolvable:$true] %s3579_s30 }
 0x70c   :  { %v2540_v44 = vpop.f32.mrf.mxu3 }
 0x70d   :  { %v2846_v33 = vadd.f32 %v2845_v16, %v2540_v44  ;;  %v3288_v62 = vpop.xlane.xlu0 %3287  ;;  %v3032_v38 = vpop.xlane.xlu1 %3031 }
 0x70e   :  { %4319 = vlog2.f32 %v3288_v62  ;;  %v6609_v10 = vsub.f32 %v6364_v18, %v3032_v38 }
 0x70f   :  { %v6612_v17 = vadd.f32 %v6144_v47, %v2846_v33 }
 0x710   :  { %v4318_v53 = vpop.eup %4317  ;;  %v3175_v49 = vmul.f32 1.442695, %v6609_v10  ;;  %v2851_v41 = vpop.f32.mrf.mxu0 }
 0x711   :  { %v3254_v30 = vsel %vm2950_vm2, %v4318_v53, 0.0  ;;  %v2982_v3 = vsel %vm2950_vm2, %v6612_v17, -inf }
 0x712   :  { %4321 = vpow2.f32 %v3175_v49  ;;  %3317 = vadd.xlane.f32.xlu0 %v3254_v30  ;;  %3061 = vmax.xlane.f32.xlu1 %v2982_v3 }
 0x714   :  { %v4320_v39 = vpop.eup %4319  ;;  %v2543_v18 = vpop.f32.mrf.mxu3 }
 0x715   :  { %v3384_v24 = vmul.f32 0.6931472, %v4320_v39  ;;  %v2849_v12 = vadd.f32 %v2848_v60, %v2543_v18  ;;  %v3290_v5 = vpop.xlane.xlu1 %3289  ;;  %v3034_v63 = vpop.xlane.xlu2 %3033 }
 0x716   :  { %4323 = vlog2.f32 %v3290_v5  ;;  %v6621_v16 = vsub.f32 %v6381_v2, %v3034_v63 }
 0x717   :  { %v3479_v29 = vsub.f32 %v6346_v59, %v3384_v24  ;;  %v6625_v50 = vadd.f32 %v6144_v47, %v2849_v12 }
 0x718   :  { %v4322_v25 = vpop.eup %4321  ;;  %v3177_v45 = vmul.f32 1.442695, %v6621_v16  ;;  %v2854_v43 = vpop.f32.mrf.mxu0 }
 0x719   :  { %3527 = vst [vmem:[#allocation5] sm:$0xff] %v3479_v29  ;;  %v3255_v31 = vsel %vm2950_vm2, %v4322_v25, 0.0  ;;  %v2983_v8 = vsel %vm2950_vm2, %v6625_v50, -inf }
 0x71a   :  { %4325 = vpow2.f32 %v3177_v45  ;;  %3319 = vadd.xlane.f32.xlu1 %v3255_v31  ;;  %3063 = vmax.xlane.f32.xlu2 %v2983_v8 }
 0x71c   :  { %v4324_v2 = vpop.eup %4323  ;;  %v2546_v59 = vpop.f32.mrf.mxu3 }
 0x71d   :  { %v3386_v13 = vmul.f32 0.6931472, %v4324_v2  ;;  %v2852_v47 = vadd.f32 %v2851_v41, %v2546_v59  ;;  %v3292_v20 = vpop.xlane.xlu2 %3291  ;;  %v3036_v7 = vpop.xlane.xlu0 %3035 }
 0x71e   :  { %4327 = vlog2.f32 %v3292_v20  ;;  %v6634_v34 = vsub.f32 %v6398_v58, %v3036_v7 }
 0x71f   :  { %v3480_v60 = vsub.f32 %v6361_v21, %v3386_v13  ;;  %v6643_v54 = vadd.f32 %v6640_v27, %v2852_v47 }
 0x720   :  { %v4326_v44 = vpop.eup %4325  ;;  %v3179_v33 = vmul.f32 1.442695, %v6634_v34  ;;  %v2857_v62 = vpop.f32.mrf.mxu0 }
 0x721   :  { %3528 = vst [vmem:[#allocation5 + $0x8] sm:$0xff] %v3480_v60  ;;  %v3256_v38 = vsel %vm2950_vm2, %v4326_v44, 0.0  ;;  %v2984_v21 = vsel %vm2950_vm2, %v6643_v54, -inf }
 0x722   :  { %4329 = vpow2.f32 %v3179_v33  ;;  %3321 = vadd.xlane.f32.xlu2 %v3256_v38  ;;  %3065 = vmax.xlane.f32.xlu0 %v2984_v21 }
 0x724   :  { %v4328_v58 = vpop.eup %4327  ;;  %v2549_v53 = vpop.f32.mrf.mxu3 }
 0x725   :  { %v3388_v49 = vmul.f32 0.6931472, %v4328_v58  ;;  %v2855_v41 = vadd.f32 %v2854_v43, %v2549_v53  ;;  %v3294_v30 = vpop.xlane.xlu0 %3293  ;;  %v3038_v3 = vpop.xlane.xlu1 %3037 }
 0x726   :  { %4331 = vlog2.f32 %v3294_v30  ;;  %v6652_v39 = vsub.f32 %v6415_v4, %v3038_v3 }
 0x727   :  { %v3481_v18 = vsub.f32 %v6378_v32, %v3388_v49  ;;  %v6656_v24 = vadd.f32 %v6640_v27, %v2855_v41 }
 0x728   :  { %v4330_v12 = vpop.eup %4329  ;;  %v3181_v5 = vmul.f32 1.442695, %v6652_v39  ;;  %v2860_v63 = vpop.f32.mrf.mxu0 }
 0x729   :  { %3529 = vst [vmem:[#allocation5 + $0x10] sm:$0xff] %v3481_v18  ;;  %v3257_v29 = vsel %vm2950_vm2, %v4330_v12, 0.0  ;;  %v2985_v25 = vsel %vm2950_vm2, %v6656_v24, -inf }
 0x72a   :  { %4333 = vpow2.f32 %v3181_v5  ;;  %3323 = vadd.xlane.f32.xlu0 %v3257_v29  ;;  %3067 = vmax.xlane.f32.xlu1 %v2985_v25 }
 0x72c   :  { %v4332_v4 = vpop.eup %4331  ;;  %v2552_v32 = vpop.f32.mrf.mxu3 }
 0x72d   :  { %v3390_v45 = vmul.f32 0.6931472, %v4332_v4  ;;  %v2858_v43 = vadd.f32 %v2857_v62, %v2552_v32  ;;  %v3296_v31 = vpop.xlane.xlu1 %3295  ;;  %v3040_v8 = vpop.xlane.xlu2 %3039 }
 0x72e   :  { %4335 = vlog2.f32 %v3296_v31  ;;  %v6665_v2 = vsub.f32 %v6432_v14, %v3040_v8 }
 0x72f   :  { %v3482_v59 = vsub.f32 %v6395_v22, %v3390_v45  ;;  %v6669_v13 = vadd.f32 %v6640_v27, %v2858_v43 }
 0x730   :  { %v4334_v47 = vpop.eup %4333  ;;  %v3183_v20 = vmul.f32 1.442695, %v6665_v2  ;;  %v2863_v7 = vpop.f32.mrf.mxu0 }
 0x731   :  { %3530 = vst [vmem:[#allocation5 + $0x18] sm:$0xff] %v3482_v59  ;;  %v3258_v60 = vsel %vm2950_vm2, %v4334_v47, 0.0  ;;  %v2986_v44 = vsel %vm2950_vm2, %v6669_v13, -inf }
 0x732   :  { %4337 = vpow2.f32 %v3183_v20  ;;  %3325 = vadd.xlane.f32.xlu1 %v3258_v60  ;;  %3069 = vmax.xlane.f32.xlu2 %v2986_v44 }
 0x734   :  { %v4336_v14 = vpop.eup %4335  ;;  %v2555_v22 = vpop.f32.mrf.mxu3 }
 0x735   :  { %v3392_v33 = vmul.f32 0.6931472, %v4336_v14  ;;  %v2861_v62 = vadd.f32 %v2860_v63, %v2555_v22  ;;  %v3298_v38 = vpop.xlane.xlu2 %3297  ;;  %v3042_v21 = vpop.xlane.xlu0 %3041 }
 0x736   :  { %4339 = vlog2.f32 %v3298_v38  ;;  %v6678_v58 = vsub.f32 %v6449_v15, %v3042_v21 }
 0x737   :  { %v3483_v53 = vsub.f32 %v6412_v52, %v3392_v33  ;;  %v6682_v49 = vadd.f32 %v6640_v27, %v2861_v62 }
 0x738   :  { %v4338_v41 = vpop.eup %4337  ;;  %v3185_v30 = vmul.f32 1.442695, %v6678_v58  ;;  %v2866_v3 = vpop.f32.mrf.mxu0 }
 0x739   :  { %3531 = vst [vmem:[#allocation5 + $0x20] sm:$0xff] %v3483_v53  ;;  %v3259_v18 = vsel %vm2950_vm2, %v4338_v41, 0.0  ;;  %v2987_v12 = vsel %vm2950_vm2, %v6682_v49, -inf }
 0x73a   :  { %4341 = vpow2.f32 %v3185_v30  ;;  %3327 = vadd.xlane.f32.xlu2 %v3259_v18  ;;  %3071 = vmax.xlane.f32.xlu0 %v2987_v12 }
 0x73c   :  { %v4340_v15 = vpop.eup %4339  ;;  %v2558_v52 = vpop.f32.mrf.mxu3 }
 0x73d   :  { %v3394_v5 = vmul.f32 0.6931472, %v4340_v15  ;;  %v2864_v63 = vadd.f32 %v2863_v7, %v2558_v52  ;;  %v3300_v29 = vpop.xlane.xlu0 %3299  ;;  %v3044_v25 = vpop.xlane.xlu1 %3043 }
 0x73e   :  { %4343 = vlog2.f32 %v3300_v29  ;;  %v6691_v4 = vsub.f32 %v6466_v28, %v3044_v25 }
 0x73f   :  { %v3484_v32 = vsub.f32 %v6429_v23, %v3394_v5  ;;  %v6695_v45 = vadd.f32 %v6640_v27, %v2864_v63 }
 0x740   :  { %v4342_v43 = vpop.eup %4341  ;;  %v3187_v31 = vmul.f32 1.442695, %v6691_v4  ;;  %v2869_v8 = vpop.f32.mrf.mxu0 }
 0x741   :  { %3532 = vst [vmem:[#allocation5 + $0x28] sm:$0xff] %v3484_v32  ;;  %v3260_v59 = vsel %vm2950_vm2, %v4342_v43, 0.0  ;;  %v2988_v47 = vsel %vm2950_vm2, %v6695_v45, -inf }
 0x742   :  { %4345 = vpow2.f32 %v3187_v31  ;;  %3329 = vadd.xlane.f32.xlu0 %v3260_v59  ;;  %3073 = vmax.xlane.f32.xlu1 %v2988_v47 }
 0x744   :  { %v4344_v28 = vpop.eup %4343  ;;  %v2561_v23 = vpop.f32.mrf.mxu3 }
 0x745   :  { %v3396_v20 = vmul.f32 0.6931472, %v4344_v28  ;;  %v2867_v7 = vadd.f32 %v2866_v3, %v2561_v23  ;;  %v3302_v60 = vpop.xlane.xlu1 %3301  ;;  %v3046_v44 = vpop.xlane.xlu2 %3045 }
 0x746   :  { %4347 = vlog2.f32 %v3302_v60  ;;  %v6704_v14 = vsub.f32 %v6483_v11, %v3046_v44 }
 0x747   :  { %v3485_v22 = vsub.f32 %v6446_v9, %v3396_v20  ;;  %v6708_v33 = vadd.f32 %v6640_v27, %v2867_v7 }
 0x748   :  { %v4346_v62 = vpop.eup %4345  ;;  %v3189_v38 = vmul.f32 1.442695, %v6704_v14  ;;  %v2872_v21 = vpop.f32.mrf.mxu0 }
 0x749   :  { %3533 = vst [vmem:[#allocation5 + $0x30] sm:$0xff] %v3485_v22  ;;  %v3261_v53 = vsel %vm2950_vm2, %v4346_v62, 0.0  ;;  %v2989_v41 = vsel %vm2950_vm2, %v6708_v33, -inf }
 0x74a   :  { %4349 = vpow2.f32 %v3189_v38  ;;  %3331 = vadd.xlane.f32.xlu1 %v3261_v53  ;;  %3075 = vmax.xlane.f32.xlu2 %v2989_v41 }
 0x74c   :  { %v4348_v11 = vpop.eup %4347  ;;  %v2564_v9 = vpop.f32.mrf.mxu3 }
 0x74d   :  { %v3398_v30 = vmul.f32 0.6931472, %v4348_v11  ;;  %v2870_v3 = vadd.f32 %v2869_v8, %v2564_v9  ;;  %v3304_v18 = vpop.xlane.xlu2 %3303  ;;  %v3048_v12 = vpop.xlane.xlu0 %3047 }
 0x74e   :  { %4351 = vlog2.f32 %v3304_v18  ;;  %v6717_v15 = vsub.f32 %v6500_v6, %v3048_v12 }
 0x74f   :  { %v3486_v52 = vsub.f32 %v6463_v19, %v3398_v30  ;;  %v6721_v5 = vadd.f32 %v6640_v27, %v2870_v3 }
 0x750   :  { %v4350_v63 = vpop.eup %4349  ;;  %v3191_v29 = vmul.f32 1.442695, %v6717_v15  ;;  %v2875_v43 = vpop.f32.mrf.mxu0 }
 0x751   :  { %3534 = vst [vmem:[#allocation5 + $0x38] sm:$0xff] %v3486_v52  ;;  %v3262_v25 = vsel %vm2950_vm2, %v4350_v63, 0.0  ;;  %v2990_v32 = vsel %vm2950_vm2, %v6721_v5, -inf }
 0x752   :  { %4353 = vpow2.f32 %v3191_v29  ;;  %3333 = vadd.xlane.f32.xlu2 %v3262_v25  ;;  %3077 = vmax.xlane.f32.xlu0 %v2990_v32 }
 0x754   :  { %v4352_v6 = vpop.eup %4351  ;;  %v2567_v19 = vpop.f32.mrf.mxu3 }
 0x755   :  { %v3400_v31 = vmul.f32 0.6931472, %v4352_v6  ;;  %v2873_v8 = vadd.f32 %v2872_v21, %v2567_v19  ;;  %v3306_v59 = vpop.xlane.xlu0 %3305  ;;  %v3050_v47 = vpop.xlane.xlu1 %3049 }
 0x756   :  { %4355 = vlog2.f32 %v3306_v59  ;;  %v6730_v28 = vsub.f32 %v6517_v26, %v3050_v47 }
 0x757   :  { %v3487_v23 = vsub.f32 %v6480_v35, %v3400_v31  ;;  %v6734_v20 = vadd.f32 %v6640_v27, %v2873_v8 }
 0x758   :  { %v4354_v7 = vpop.eup %4353  ;;  %v3193_v60 = vmul.f32 1.442695, %v6730_v28  ;;  %v2878_v62 = vpop.f32.mrf.mxu0 }
 0x759   :  { %3535 = vst [vmem:[#allocation5 + $0x40] sm:$0xff] %v3487_v23  ;;  %v3263_v44 = vsel %vm2950_vm2, %v4354_v7, 0.0  ;;  %v2991_v22 = vsel %vm2950_vm2, %v6734_v20, -inf }
 0x75a   :  { %4357 = vpow2.f32 %v3193_v60  ;;  %3335 = vadd.xlane.f32.xlu0 %v3263_v44  ;;  %3079 = vmax.xlane.f32.xlu1 %v2991_v22 }
 0x75c   :  { %v4356_v26 = vpop.eup %4355  ;;  %v2570_v35 = vpop.f32.mrf.mxu3 }
 0x75d   :  { %v3402_v38 = vmul.f32 0.6931472, %v4356_v26  ;;  %v2876_v21 = vadd.f32 %v2875_v43, %v2570_v35  ;;  %v3308_v53 = vpop.xlane.xlu1 %3307  ;;  %v3052_v41 = vpop.xlane.xlu2 %3051 }
 0x75e   :  { %4359 = vlog2.f32 %v3308_v53  ;;  %v6743_v11 = vsub.f32 %v6534_v46, %v3052_v41 }
 0x75f   :  { %v3488_v9 = vsub.f32 %v6497_v57, %v3402_v38  ;;  %v6747_v30 = vadd.f32 %v6640_v27, %v2876_v21 }
 0x760   :  { %v4358_v3 = vpop.eup %4357  ;;  %v3195_v18 = vmul.f32 1.442695, %v6743_v11  ;;  %v2881_v43 = vpop.f32.mrf.mxu0 }
 0x761   :  { %3536 = vst [vmem:[#allocation5 + $0x48] sm:$0xff] %v3488_v9  ;;  %v3264_v12 = vsel %vm2950_vm2, %v4358_v3, 0.0  ;;  %v2992_v52 = vsel %vm2950_vm2, %v6747_v30, -inf }
 0x762   :  { %4361 = vpow2.f32 %v3195_v18  ;;  %3337 = vadd.xlane.f32.xlu1 %v3264_v12  ;;  %3081 = vmax.xlane.f32.xlu2 %v2992_v52 }
 0x764   :  { %v4360_v46 = vpop.eup %4359  ;;  %v2573_v63 = vpop.f32.mrf.mxu3 }
 0x765   :  { %v3404_v57 = vmul.f32 0.6931472, %v4360_v46  ;;  %v2879_v29 = vadd.f32 %v2878_v62, %v2573_v63  ;;  %v3310_v25 = vpop.xlane.xlu2 %3309  ;;  %v3054_v32 = vpop.xlane.xlu0 %3053 }
 0x766   :  { %4363 = vlog2.f32 %v3310_v25  ;;  %v6776_v12 = vsub.f32 %v6551_v56, %v3054_v32 }
 0x767   :  { %v3489_v6 = vsub.f32 %v6514_v40, %v3404_v57  ;;  %v6757_v19 = vadd.f32 %v6640_v27, %v2879_v29 }
 0x768   :  { %v4362_v31 = vpop.eup %4361  ;;  %v2884_v62 = vpop.f32.mrf.mxu0  ;;  %v3197_v57 = vmul.f32 1.442695, %v6776_v12 }
 0x769   :  { %3537 = vst [vmem:[#allocation5 + $0x50] sm:$0xff] %v3489_v6  ;;  %v3265_v8 = vsel %vm2950_vm2, %v4362_v31, 0.0  ;;  %v2993_v59 = vsel %vm2950_vm2, %v6757_v19, -inf }
 0x76a   :  { %3339 = vadd.xlane.f32.xlu2 %v3265_v8  ;;  %3083 = vmax.xlane.f32.xlu0 %v2993_v59 }
 0x76c   :  { %v4364_v47 = vpop.eup %4363  ;;  %v2576_v23 = vpop.f32.mrf.mxu3 }
 0x76d   :  { %v3406_v7 = vmul.f32 0.6931472, %v4364_v47  ;;  %v2882_v60 = vadd.f32 %v2881_v43, %v2576_v23  ;;  %v3312_v44 = vpop.xlane.xlu0 %3311  ;;  %v3056_v40 = vpop.xlane.xlu1 %3055 }
 0x76e   :  { %4365 = vlog2.f32 %v3312_v44  ;;  %v6783_v31 = vsub.f32 %v6568_v1, %v3056_v40 }
 0x76f   :  { %v3490_v22 = vsub.f32 %v6531_v48, %v3406_v7  ;;  %v6766_v26 = vadd.f32 %v6640_v27, %v2882_v60 }
 0x770   :  { %v2887_v46 = vpop.f32.mrf.mxu0  ;;  %v3199_v47 = vmul.f32 1.442695, %v6783_v31 }
 0x771   :  { %3538 = vst [vmem:[#allocation5 + $0x58] sm:$0xff] %v3490_v22  ;;  %v2994_v35 = vsel %vm2950_vm2, %v6766_v26, -inf }
 0x772   :  { %3085 = vmax.xlane.f32.xlu1 %v2994_v35 }
 0x774   :  { %v4366_v38 = vpop.eup %4365  ;;  %v2579_v21 = vpop.f32.mrf.mxu3 }
 0x775   :  { %v3408_v53 = vmul.f32 0.6931472, %v4366_v38  ;;  %v2885_v41 = vadd.f32 %v2884_v62, %v2579_v21  ;;  %v3314_v9 = vpop.xlane.xlu1 %3313  ;;  %v3058_v3 = vpop.xlane.xlu2 %3057 }
 0x776   :  { %4367 = vlog2.f32 %v3314_v9  ;;  %v6805_v21 = vsub.f32 %v6585_v42, %v3058_v3  ;;  %v2893_v9 = vpop.f32.mrf.mxu2 }
 0x777   :  { %v3491_v18 = vsub.f32 %v6548_v37, %v3408_v53  ;;  %v6773_v48 = vadd.f32 %v6640_v27, %v2885_v41 }
 0x778   :  { %v2890_v1 = vpop.f32.mrf.mxu0 }
 0x779   :  { %3539 = vst [vmem:[#allocation5 + $0x60] sm:$0xff] %v3491_v18  ;;  %v2995_v52 = vsel %vm2950_vm2, %v6773_v48, -inf }
 0x77a   :  { %3087 = vmax.xlane.f32.xlu2 %v2995_v52 }
 0x77c   :  { %v4368_v63 = vpop.eup %4367  ;;  %v2582_v29 = vpop.f32.mrf.mxu3 }
 0x77d   :  { %v3410_v25 = vmul.f32 0.6931472, %v4368_v63  ;;  %v2888_v43 = vadd.f32 %v2887_v46, %v2582_v29  ;;  %v3316_v37 = vpop.xlane.xlu2 %3315  ;;  %v3060_v6 = vpop.xlane.xlu0 %3059  ;;  %v3201_v46 = vmul.f32 1.442695, %v6805_v21 }
 0x77e   :  { %4369 = vlog2.f32 %v3316_v37  ;;  %v6790_v8 = vsub.f32 %v6599_v61, %v3060_v6 }
 0x77f   :  { %v3492_v56 = vsub.f32 %v6565_v36, %v3410_v25  ;;  %v6787_v32 = vadd.f32 %v6640_v27, %v2888_v43  ;;  %4371 = vpow2.f32 %v3197_v57 }
 0x780   :  { %v3203_v7 = vmul.f32 1.442695, %v6790_v8 }
 0x781   :  { %3540 = vst [vmem:[#allocation5 + $0x68] sm:$0xff] %v3492_v56  ;;  %v2996_v59 = vsel %vm2950_vm2, %v6787_v32, -inf }
 0x782   :  { %3089 = vmax.xlane.f32.xlu0 %v2996_v59 }
 0x784   :  { %v4370_v23 = vpop.eup %4369  ;;  %v2585_v36 = vpop.f32.mrf.mxu3 }
 0x785   :  { %v3412_v60 = vmul.f32 0.6931472, %v4370_v23  ;;  %v2891_v44 = vadd.f32 %v2890_v1, %v2585_v36  ;;  %v3318_v40 = vpop.xlane.xlu0 %3317  ;;  %v3062_v22 = vpop.xlane.xlu1 %3061 }
 0x786   :  { %v4372_v62 = vpop.eup %4371  ;;  %4373 = vlog2.f32 %v3318_v40  ;;  %v6802_v38 = vsub.f32 %v6612_v17, %v3062_v22 }
 0x787   :  { %4375 = vpow2.f32 %v3199_v47  ;;  %v3493_v61 = vsub.f32 %v6582_v51, %v3412_v60  ;;  %v6799_v35 = vadd.f32 %v6640_v27, %v2891_v44  ;;  %v3266_v53 = vsel %vm2950_vm2, %v4372_v62, 0.0 }
 0x788   :  { %4377 = vpow2.f32 %v3203_v7  ;;  %v3205_v18 = vmul.f32 1.442695, %v6802_v38 }
 0x789   :  { %3541 = vst [vmem:[#allocation5 + $0x70] sm:$0xff] %v3493_v61  ;;  %v2997_v41 = vsel %vm2950_vm2, %v6799_v35, -inf }
 0x78a   :  { %3341 = vadd.xlane.f32.xlu0 %v3266_v53  ;;  %3091 = vmax.xlane.f32.xlu1 %v2997_v41 }
 0x78c   :  { %v4374_v51 = vpop.eup %4373  ;;  %v2588_v52 = vpop.f32.mrf.mxu3 }
 0x78d   :  { %v4376_v17 = vpop.eup %4375  ;;  %v3414_v42 = vmul.f32 0.6931472, %v4374_v51  ;;  %v2894_v3 = vadd.f32 %v2893_v9, %v2588_v52  ;;  %v3320_v63 = vpop.xlane.xlu1 %3319 }
 0x78e   :  { %v3064_v57 = vpop.xlane.xlu2 %3063  ;;  %v4378_v29 = vpop.eup %4377  ;;  %4379 = vlog2.f32 %v3320_v63  ;;  %v3267_v37 = vsel %vm2950_vm2, %v4376_v17, 0.0 }
 0x78f   :  { %v3494_v25 = vsub.f32 %v6596_v0, %v3414_v42  ;;  %v6816_v43 = vadd.f32 %v6640_v27, %v2894_v3  ;;  %4381 = vpow2.f32 %v3205_v18  ;;  %v6821_v6 = vsub.f32 %v6625_v50, %v3064_v57 }
 0x790   :  { %4383 = vpow2.f32 %v3201_v46  ;;  %v3269_v56 = vsel %vm2950_vm2, %v4378_v29, 0.0 }
 0x791   :  { %3542 = vst [vmem:[#allocation5 + $0x78] sm:$0xff] %v3494_v25  ;;  %v2998_v59 = vsel %vm2950_vm2, %v6816_v43, -inf  ;;  %v3207_v47 = vmul.f32 1.442695, %v6821_v6 }
 0x792   :  { %3347 = vadd.xlane.f32.xlu0 %v3269_v56  ;;  %3343 = vadd.xlane.f32.xlu1 %v3267_v37 }
 0x793   :  { %3093 = vmax.xlane.f32.xlu2 %v2998_v59 }
 0x794   :  { %v4380_v0 = vpop.eup %4379 }
 0x795   :  { %v3416_v27 = vmul.f32 0.6931472, %v4380_v0  ;;  %v3066_v1 = vpop.xlane.xlu0 %3065  ;;  %v4382_v7 = vpop.eup %4381 }
 0x796   :  { %v3322_v23 = vpop.xlane.xlu2 %3321  ;;  %v6830_v50 = vsub.f32 %v6643_v54, %v3066_v1  ;;  %v4384_v36 = vpop.eup %4383  ;;  %v3270_v40 = vsel %vm2950_vm2, %v4382_v7, 0.0 }
 0x797   :  { %4385 = vlog2.f32 %v3322_v23  ;;  %v3495_v60 = vsub.f32 %v6609_v10, %v3416_v27  ;;  %v3268_v22 = vsel %vm2950_vm2, %v4384_v36, 0.0 }
 0x798   :  { %v3209_v44 = vmul.f32 1.442695, %v6830_v50  ;;  %4387 = vpow2.f32 %v3207_v47 }
 0x799   :  { %3543 = vst [vmem:[#allocation5 + $0x80] sm:$0xff] %v3495_v60 }
 0x79a   :  { %4389 = vpow2.f32 %v3209_v44  ;;  %3349 = vadd.xlane.f32.xlu1 %v3270_v40 }
 0x79b   :  { %3345 = vadd.xlane.f32.xlu2 %v3268_v22 }
 0x79d   :  { %v4386_v62 = vpop.eup %4385  ;;  %v3324_v54 = vpop.xlane.xlu0 %3323 }
 0x79e   :  { %v3418_v61 = vmul.f32 0.6931472, %v4386_v62  ;;  %v3068_v53 = vpop.xlane.xlu1 %3067  ;;  %4391 = vlog2.f32 %v3324_v54  ;;  %v4388_v41 = vpop.eup %4387 }
 0x79f   :  { %v6839_v10 = vsub.f32 %v6656_v24, %v3068_v53  ;;  %v3271_v17 = vsel %vm2950_vm2, %v4388_v41, 0.0 }
 0x7a0   :  { %v3496_v51 = vsub.f32 %v6621_v16, %v3418_v61  ;;  %v4390_v9 = vpop.eup %4389 }
 0x7a1   :  { %v3211_v18 = vmul.f32 1.442695, %v6839_v10  ;;  %v3272_v52 = vsel %vm2950_vm2, %v4390_v9, 0.0 }
 0x7a2   :  { %3544 = vst [vmem:[#allocation5 + $0x88] sm:$0xff] %v3496_v51  ;;  %3353 = vadd.xlane.f32.xlu0 %v3272_v52 }
 0x7a3   :  { %4393 = vpow2.f32 %v3211_v18  ;;  %3351 = vadd.xlane.f32.xlu2 %v3271_v17 }
 0x7a4   :  { %v4392_v46 = vpop.eup %4391 }
 0x7a5   :  { %v3420_v42 = vmul.f32 0.6931472, %v4392_v46  ;;  %v3070_v3 = vpop.xlane.xlu2 %3069 }
 0x7a6   :  { %v3326_v24 = vpop.xlane.xlu1 %3325  ;;  %v6848_v16 = vsub.f32 %v6669_v13, %v3070_v3 }
 0x7a7   :  { %4395 = vlog2.f32 %v3326_v24  ;;  %v3497_v63 = vsub.f32 %v6634_v34, %v3420_v42 }
 0x7a8   :  { %v3213_v29 = vmul.f32 1.442695, %v6848_v16 }
 0x7a9   :  { %v4394_v57 = vpop.eup %4393  ;;  %3545 = vst [vmem:[#allocation5 + $0x90] sm:$0xff] %v3497_v63 }
 0x7aa   :  { %v3273_v25 = vsel %vm2950_vm2, %v4394_v57, 0.0  ;;  %4397 = vpow2.f32 %v3213_v29 }
 0x7ab   :  { %3355 = vadd.xlane.f32.xlu1 %v3273_v25 }
 0x7ad   :  { %v4396_v37 = vpop.eup %4395  ;;  %v3328_v59 = vpop.xlane.xlu2 %3327 }
 0x7ae   :  { %v3422_v56 = vmul.f32 0.6931472, %v4396_v37  ;;  %v3072_v0 = vpop.xlane.xlu0 %3071  ;;  %4399 = vlog2.f32 %v3328_v59 }
 0x7af   :  { %v6855_v27 = vsub.f32 %v6682_v49, %v3072_v0 }
 0x7b0   :  { %v3498_v13 = vsub.f32 %v6652_v39, %v3422_v56  ;;  %v4398_v34 = vpop.eup %4397 }
 0x7b1   :  { %v3215_v47 = vmul.f32 1.442695, %v6855_v27  ;;  %v3274_v23 = vsel %vm2950_vm2, %v4398_v34, 0.0 }
 0x7b2   :  { %3546 = vst [vmem:[#allocation5 + $0x98] sm:$0xff] %v3498_v13  ;;  %3357 = vadd.xlane.f32.xlu2 %v3274_v23 }
 0x7b3   :  { %4401 = vpow2.f32 %v3215_v47 }
 0x7b4   :  { %v4400_v1 = vpop.eup %4399 }
 0x7b5   :  { %v3424_v7 = vmul.f32 0.6931472, %v4400_v1  ;;  %v3074_v60 = vpop.xlane.xlu1 %3073 }
 0x7b6   :  { %v3330_v36 = vpop.xlane.xlu0 %3329  ;;  %v6862_v44 = vsub.f32 %v6695_v45, %v3074_v60 }
 0x7b7   :  { %4403 = vlog2.f32 %v3330_v36  ;;  %v3499_v49 = vsub.f32 %v6665_v2, %v3424_v7 }
 0x7b8   :  { %v3217_v40 = vmul.f32 1.442695, %v6862_v44 }
 0x7b9   :  { %v4402_v39 = vpop.eup %4401  ;;  %3547 = vst [vmem:[#allocation5 + $0xa0] sm:$0xff] %v3499_v49 }
 0x7ba   :  { %v3275_v22 = vsel %vm2950_vm2, %v4402_v39, 0.0  ;;  %4405 = vpow2.f32 %v3217_v40 }
 0x7bb   :  { %3359 = vadd.xlane.f32.xlu0 %v3275_v22 }
 0x7bd   :  { %v4404_v62 = vpop.eup %4403  ;;  %v3332_v54 = vpop.xlane.xlu1 %3331 }
 0x7be   :  { %v3426_v61 = vmul.f32 0.6931472, %v4404_v62  ;;  %v3076_v53 = vpop.xlane.xlu2 %3075  ;;  %4407 = vlog2.f32 %v3332_v54 }
 0x7bf   :  { %v6869_v41 = vsub.f32 %v6708_v33, %v3076_v53 }
 0x7c0   :  { %v3500_v45 = vsub.f32 %v6678_v58, %v3426_v61  ;;  %v4406_v2 = vpop.eup %4405 }
 0x7c1   :  { %v3219_v51 = vmul.f32 1.442695, %v6869_v41  ;;  %v3276_v9 = vsel %vm2950_vm2, %v4406_v2, 0.0 }
 0x7c2   :  { %3548 = vst [vmem:[#allocation5 + $0xa8] sm:$0xff] %v3500_v45  ;;  %3361 = vadd.xlane.f32.xlu1 %v3276_v9 }
 0x7c3   :  { %4409 = vpow2.f32 %v3219_v51 }
 0x7c4   :  { %v4408_v18 = vpop.eup %4407 }
 0x7c5   :  { %v3428_v52 = vmul.f32 0.6931472, %v4408_v18  ;;  %v3078_v46 = vpop.xlane.xlu0 %3077 }
 0x7c6   :  { %v3334_v17 = vpop.xlane.xlu2 %3333  ;;  %v6876_v42 = vsub.f32 %v6721_v5, %v3078_v46 }
 0x7c7   :  { %4411 = vlog2.f32 %v3334_v17  ;;  %v3501_v33 = vsub.f32 %v6691_v4, %v3428_v52 }
 0x7c8   :  { %v3221_v24 = vmul.f32 1.442695, %v6876_v42 }
 0x7c9   :  { %v4410_v58 = vpop.eup %4409  ;;  %3549 = vst [vmem:[#allocation5 + $0xb0] sm:$0xff] %v3501_v33 }
 0x7ca   :  { %v3277_v3 = vsel %vm2950_vm2, %v4410_v58, 0.0  ;;  %4413 = vpow2.f32 %v3221_v24 }
 0x7cb   :  { %3363 = vadd.xlane.f32.xlu2 %v3277_v3 }
 0x7cd   :  { %v4412_v63 = vpop.eup %4411  ;;  %v3336_v29 = vpop.xlane.xlu0 %3335 }
 0x7ce   :  { %v3430_v57 = vmul.f32 0.6931472, %v4412_v63  ;;  %v3080_v25 = vpop.xlane.xlu1 %3079  ;;  %4415 = vlog2.f32 %v3336_v29 }
 0x7cf   :  { %v6883_v37 = vsub.f32 %v6734_v20, %v3080_v25 }
 0x7d0   :  { %v3502_v5 = vsub.f32 %v6704_v14, %v3430_v57  ;;  %v4414_v4 = vpop.eup %4413 }
 0x7d1   :  { %v3223_v56 = vmul.f32 1.442695, %v6883_v37  ;;  %v3278_v59 = vsel %vm2950_vm2, %v4414_v4, 0.0 }
 0x7d2   :  { %3550 = vst [vmem:[#allocation5 + $0xb8] sm:$0xff] %v3502_v5  ;;  %3365 = vadd.xlane.f32.xlu0 %v3278_v59 }
 0x7d3   :  { %4417 = vpow2.f32 %v3223_v56 }
 0x7d4   :  { %v4416_v0 = vpop.eup %4415 }
 0x7d5   :  { %v3432_v13 = vmul.f32 0.6931472, %v4416_v0  ;;  %v3082_v47 = vpop.xlane.xlu2 %3081 }
 0x7d6   :  { %v3338_v34 = vpop.xlane.xlu1 %3337  ;;  %v6890_v23 = vsub.f32 %v6747_v30, %v3082_v47 }
 0x7d7   :  { %4419 = vlog2.f32 %v3338_v34  ;;  %v3503_v20 = vsub.f32 %v6717_v15, %v3432_v13 }
 0x7d8   :  { %v3225_v1 = vmul.f32 1.442695, %v6890_v23 }
 0x7d9   :  { %v4418_v14 = vpop.eup %4417  ;;  %3551 = vst [vmem:[#allocation5 + $0xc0] sm:$0xff] %v3503_v20 }
 0x7da   :  { %v3279_v7 = vsel %vm2950_vm2, %v4418_v14, 0.0  ;;  %4421 = vpow2.f32 %v3225_v1 }
 0x7db   :  { %3367 = vadd.xlane.f32.xlu1 %v3279_v7 }
 0x7dd   :  { %v4420_v36 = vpop.eup %4419  ;;  %v3340_v49 = vpop.xlane.xlu2 %3339 }
 0x7de   :  { %v3434_v60 = vmul.f32 0.6931472, %v4420_v36  ;;  %v3084_v39 = vpop.xlane.xlu0 %3083  ;;  %4423 = vlog2.f32 %v3340_v49 }
 0x7df   :  { %v6897_v40 = vsub.f32 %v6757_v19, %v3084_v39 }
 0x7e0   :  { %v3504_v30 = vsub.f32 %v6730_v28, %v3434_v60  ;;  %v4422_v15 = vpop.eup %4421 }
 0x7e1   :  { %v3227_v22 = vmul.f32 1.442695, %v6897_v40  ;;  %v3280_v62 = vsel %vm2950_vm2, %v4422_v15, 0.0 }
 0x7e2   :  { %3552 = vst [vmem:[#allocation5 + $0xc8] sm:$0xff] %v3504_v30  ;;  %3369 = vadd.xlane.f32.xlu2 %v3280_v62 }
 0x7e3   :  { %4425 = vpow2.f32 %v3227_v22 }
 0x7e4   :  { %v4424_v61 = vpop.eup %4423 }
 0x7e5   :  { %v3436_v54 = vmul.f32 0.6931472, %v4424_v61  ;;  %v3086_v53 = vpop.xlane.xlu1 %3085 }
 0x7e6   :  { %v6904_v45 = vsub.f32 %v6766_v26, %v3086_v53 }
 0x7e7   :  { %v3505_v19 = vsub.f32 %v6743_v11, %v3436_v54 }
 0x7e8   :  { %v3229_v28 = vmul.f32 1.442695, %v6904_v45 }
 0x7e9   :  { %v4426_v2 = vpop.eup %4425  ;;  %3553 = vst [vmem:[#allocation5 + $0xd0] sm:$0xff] %v3505_v19 }
 0x7ea   :  { %v3281_v51 = vsel %vm2950_vm2, %v4426_v2, 0.0  ;;  %4427 = vpow2.f32 %v3229_v28 }
 0x7eb   :  { %3371 = vadd.xlane.f32.xlu0 %v3281_v51 }
 0x7ed   :  { %v3088_v9 = vpop.xlane.xlu2 %3087 }
 0x7ee   :  { %v6911_v18 = vsub.f32 %v6773_v48, %v3088_v9 }
 0x7f0   :  { %v4428_v52 = vpop.eup %4427  ;;  %v3231_v17 = vmul.f32 1.442695, %v6911_v18 }
 0x7f1   :  { %v3282_v26 = vsel %vm2950_vm2, %v4428_v52, 0.0 }
 0x7f2   :  { %4429 = vpow2.f32 %v3231_v17  ;;  %3373 = vadd.xlane.f32.xlu1 %v3282_v26 }
 0x7f5   :  { %v3090_v11 = vpop.xlane.xlu0 %3089 }
 0x7f6   :  { %v6917_v46 = vsub.f32 %v6787_v32, %v3090_v11 }
 0x7f8   :  { %v4430_v33 = vpop.eup %4429  ;;  %v3233_v58 = vmul.f32 1.442695, %v6917_v46 }
 0x7f9   :  { %v3283_v24 = vsel %vm2950_vm2, %v4430_v33, 0.0 }
 0x7fa   :  { %4431 = vpow2.f32 %v3233_v58  ;;  %3375 = vadd.xlane.f32.xlu2 %v3283_v24 }
 0x7fd   :  { %v3342_v48 = vpop.xlane.xlu0 %3341  ;;  %v3092_v3 = vpop.xlane.xlu1 %3091 }
 0x7fe   :  { %4433 = vlog2.f32 %v3342_v48  ;;  %v6923_v63 = vsub.f32 %v6799_v35, %v3092_v3 }
 0x800   :  { %v4432_v57 = vpop.eup %4431  ;;  %v3235_v29 = vmul.f32 1.442695, %v6923_v63 }
 0x801   :  { %v3284_v32 = vsel %vm2950_vm2, %v4432_v57, 0.0 }
 0x802   :  { %4435 = vpow2.f32 %v3235_v29  ;;  %3377 = vadd.xlane.f32.xlu0 %v3284_v32 }
 0x804   :  { %v4434_v25 = vpop.eup %4433 }
 0x805   :  { %v3438_v5 = vmul.f32 0.6931472, %v4434_v25  ;;  %v3348_v4 = vpop.xlane.xlu0 %3347  ;;  %v3344_v56 = vpop.xlane.xlu1 %3343 }
 0x806   :  { %4437 = vlog2.f32 %v3348_v4  ;;  %v3094_v59 = vpop.xlane.xlu2 %3093 }
 0x807   :  { %v3506_v0 = vsub.f32 %v6776_v12, %v3438_v5  ;;  %4439 = vlog2.f32 %v3344_v56  ;;  %v6930_v35 = vsub.f32 %v6816_v43, %v3094_v59 }
 0x808   :  { %v4436_v13 = vpop.eup %4435 }
 0x809   :  { %3554 = vst [vmem:[#allocation5 + $0xd8] sm:$0xff] %v3506_v0  ;;  %v3237_v34 = vmul.f32 1.442695, %v6930_v35  ;;  %v3285_v47 = vsel %vm2950_vm2, %v4436_v13, 0.0 }
 0x80a   :  { %3379 = vadd.xlane.f32.xlu1 %v3285_v47 }
 0x80b   :  { %4441 = vpow2.f32 %v3237_v34 }
 0x80c   :  { %v4438_v20 = vpop.eup %4437 }
 0x80d   :  { %v4440_v14 = vpop.eup %4439  ;;  %v3444_v1 = vmul.f32 0.6931472, %v4438_v20  ;;  %v3350_v7 = vpop.xlane.xlu1 %3349 }
 0x80e   :  { %v3440_v36 = vmul.f32 0.6931472, %v4440_v14  ;;  %4443 = vlog2.f32 %v3350_v7  ;;  %v3346_v12 = vpop.xlane.xlu2 %3345 }
 0x80f   :  { %v3509_v60 = vsub.f32 %v6790_v8, %v3444_v1  ;;  %4445 = vlog2.f32 %v3346_v12 }
 0x810   :  { %v3507_v43 = vsub.f32 %v6783_v31, %v3440_v36 }
 0x811   :  { %v4442_v49 = vpop.eup %4441  ;;  %3557 = vst [vmem:[#allocation5 + $0xf0] sm:$0xff] %v3509_v60 }
 0x812   :  { %3555 = vst [vmem:[#allocation5 + $0xe0] sm:$0xff] %v3507_v43  ;;  %v3286_v39 = vsel %vm2950_vm2, %v4442_v49, 0.0 }
 0x813   :  { %3381 = vadd.xlane.f32.xlu2 %v3286_v39 }
 0x814   :  { %v4444_v30 = vpop.eup %4443 }
 0x815   :  { %v4446_v15 = vpop.eup %4445  ;;  %v3446_v22 = vmul.f32 0.6931472, %v4444_v30  ;;  %v3354_v62 = vpop.xlane.xlu0 %3353 }
 0x816   :  { %v3442_v61 = vmul.f32 0.6931472, %v4446_v15  ;;  %4447 = vlog2.f32 %v3354_v62  ;;  %v3352_v54 = vpop.xlane.xlu2 %3351 }
 0x817   :  { %v3510_v53 = vsub.f32 %v6802_v38, %v3446_v22  ;;  %4449 = vlog2.f32 %v3352_v54 }
 0x818   :  { %v3508_v8 = vsub.f32 %v6805_v21, %v3442_v61 }
 0x819   :  { %3558 = vst [vmem:[#allocation5 + $0xf8] sm:$0xff] %v3510_v53 }
 0x81a   :  { %3556 = vst [vmem:[#allocation5 + $0xe8] sm:$0xff] %v3508_v8 }
 0x81c   :  { %v4448_v31 = vpop.eup %4447 }
 0x81d   :  { %v4450_v19 = vpop.eup %4449  ;;  %v3450_v2 = vmul.f32 0.6931472, %v4448_v31 }
 0x81e   :  { %v3356_v55 = vpop.xlane.xlu1 %3355  ;;  %v3448_v28 = vmul.f32 0.6931472, %v4450_v19 }
 0x81f   :  { %4451 = vlog2.f32 %v3356_v55  ;;  %v3512_v51 = vsub.f32 %v6830_v50, %v3450_v2 }
 0x820   :  { %v3511_v9 = vsub.f32 %v6821_v6, %v3448_v28 }
 0x821   :  { %3560 = vst [vmem:[#allocation5 + $0x108] sm:$0xff] %v3512_v51 }
 0x822   :  { %3559 = vst [vmem:[#allocation5 + $0x100] sm:$0xff] %v3511_v9 }
 0x825   :  { %v4452_v52 = vpop.eup %4451  ;;  %v3358_v38 = vpop.xlane.xlu2 %3357 }
 0x826   :  { %v3452_v17 = vmul.f32 0.6931472, %v4452_v52  ;;  %4453 = vlog2.f32 %v3358_v38 }
 0x828   :  { %v3513_v21 = vsub.f32 %v6839_v10, %v3452_v17 }
 0x82a   :  { %3561 = vst [vmem:[#allocation5 + $0x110] sm:$0xff] %v3513_v21 }
 0x82c   :  { %v4454_v26 = vpop.eup %4453 }
 0x82d   :  { %v3454_v11 = vmul.f32 0.6931472, %v4454_v26 }
 0x82e   :  { %v3360_v33 = vpop.xlane.xlu0 %3359 }
 0x82f   :  { %4455 = vlog2.f32 %v3360_v33  ;;  %v3514_v58 = vsub.f32 %v6848_v16, %v3454_v11 }
 0x831   :  { %3562 = vst [vmem:[#allocation5 + $0x118] sm:$0xff] %v3514_v58 }
 0x835   :  { %v4456_v24 = vpop.eup %4455  ;;  %v3362_v48 = vpop.xlane.xlu1 %3361 }
 0x836   :  { %v3456_v50 = vmul.f32 0.6931472, %v4456_v24  ;;  %4457 = vlog2.f32 %v3362_v48 }
 0x838   :  { %v3515_v6 = vsub.f32 %v6855_v27, %v3456_v50 }
 0x83a   :  { %3563 = vst [vmem:[#allocation5 + $0x120] sm:$0xff] %v3515_v6 }
 0x83c   :  { %v4458_v3 = vpop.eup %4457 }
 0x83d   :  { %v3458_v57 = vmul.f32 0.6931472, %v4458_v3 }
 0x83e   :  { %v3364_v29 = vpop.xlane.xlu2 %3363 }
 0x83f   :  { %4459 = vlog2.f32 %v3364_v29  ;;  %v3516_v10 = vsub.f32 %v6862_v44, %v3458_v57 }
 0x841   :  { %3564 = vst [vmem:[#allocation5 + $0x128] sm:$0xff] %v3516_v10 }
 0x845   :  { %v4460_v32 = vpop.eup %4459  ;;  %v3366_v5 = vpop.xlane.xlu0 %3365 }
 0x846   :  { %v3460_v25 = vmul.f32 0.6931472, %v4460_v32  ;;  %4461 = vlog2.f32 %v3366_v5 }
 0x848   :  { %v3517_v16 = vsub.f32 %v6869_v41, %v3460_v25 }
 0x84a   :  { %3565 = vst [vmem:[#allocation5 + $0x130] sm:$0xff] %v3517_v16 }
 0x84c   :  { %v4462_v4 = vpop.eup %4461 }
 0x84d   :  { %v3462_v56 = vmul.f32 0.6931472, %v4462_v4 }
 0x84e   :  { %v3368_v59 = vpop.xlane.xlu1 %3367 }
 0x84f   :  { %4463 = vlog2.f32 %v3368_v59  ;;  %v3518_v27 = vsub.f32 %v6876_v42, %v3462_v56 }
 0x851   :  { %3566 = vst [vmem:[#allocation5 + $0x138] sm:$0xff] %v3518_v27 }
 0x855   :  { %v4464_v0 = vpop.eup %4463  ;;  %v3370_v34 = vpop.xlane.xlu2 %3369 }
 0x856   :  { %v3464_v13 = vmul.f32 0.6931472, %v4464_v0  ;;  %4465 = vlog2.f32 %v3370_v34 }
 0x858   :  { %v3519_v44 = vsub.f32 %v6883_v37, %v3464_v13 }
 0x85a   :  { %3567 = vst [vmem:[#allocation5 + $0x140] sm:$0xff] %v3519_v44 }
 0x85c   :  { %v4466_v47 = vpop.eup %4465 }
 0x85d   :  { %v3466_v20 = vmul.f32 0.6931472, %v4466_v47 }
 0x85e   :  { %v3372_v14 = vpop.xlane.xlu0 %3371 }
 0x85f   :  { %4467 = vlog2.f32 %v3372_v14  ;;  %v3520_v41 = vsub.f32 %v6890_v23, %v3466_v20 }
 0x861   :  { %3568 = vst [vmem:[#allocation5 + $0x148] sm:$0xff] %v3520_v41 }
 0x865   :  { %v4468_v1 = vpop.eup %4467  ;;  %v3374_v36 = vpop.xlane.xlu1 %3373 }
 0x866   :  { %v3468_v7 = vmul.f32 0.6931472, %v4468_v1  ;;  %4469 = vlog2.f32 %v3374_v36 }
 0x868   :  { %v3521_v42 = vsub.f32 %v6897_v40, %v3468_v7 }
 0x86a   :  { %3569 = vst [vmem:[#allocation5 + $0x150] sm:$0xff] %v3521_v42 }
 0x86c   :  { %v4470_v12 = vpop.eup %4469 }
 0x86d   :  { %v3470_v60 = vmul.f32 0.6931472, %v4470_v12  ;;  %v3376_v43 = vpop.xlane.xlu2 %3375 }
 0x86e   :  { %4471 = vlog2.f32 %v3376_v43 }
 0x86f   :  { %v3522_v37 = vsub.f32 %v6904_v45, %v3470_v60 }
 0x871   :  { %3570 = vst [vmem:[#allocation5 + $0x158] sm:$0xff] %v3522_v37 }
 0x874   :  { %v4472_v49 = vpop.eup %4471 }
 0x875   :  { %v3472_v39 = vmul.f32 0.6931472, %v4472_v49  ;;  %v3378_v30 = vpop.xlane.xlu0 %3377 }
 0x876   :  { %4473 = vlog2.f32 %v3378_v30 }
 0x877   :  { %v3523_v23 = vsub.f32 %v6911_v18, %v3472_v39 }
 0x879   :  { %3571 = vst [vmem:[#allocation5 + $0x160] sm:$0xff] %v3523_v23 }
 0x87c   :  { %v4474_v15 = vpop.eup %4473 }
 0x87d   :  { %v3474_v22 = vmul.f32 0.6931472, %v4474_v15  ;;  %v3380_v62 = vpop.xlane.xlu1 %3379 }
 0x87e   :  { %4475 = vlog2.f32 %v3380_v62 }
 0x87f   :  { %v3524_v40 = vsub.f32 %v6917_v46, %v3474_v22 }
 0x881   :  { %3572 = vst [vmem:[#allocation5 + $0x168] sm:$0xff] %v3524_v40 }
 0x884   :  { %v4476_v61 = vpop.eup %4475 }
 0x885   :  { %v3476_v54 = vmul.f32 0.6931472, %v4476_v61 }
 0x886   :  { %v3382_v53 = vpop.xlane.xlu2 %3381 }
 0x887   :  { %v3525_v45 = vsub.f32 %v6923_v63, %v3476_v54  ;;  %4477 = vlog2.f32 %v3382_v53 }
 0x889   :  { %3573 = vst [vmem:[#allocation5 + $0x170] sm:$0xff] %v3525_v45 }
 0x88d   :  { %v4478_v18 = vpop.eup %4477 }
 0x88e   :  { %v3478_v8 = vmul.f32 0.6931472, %v4478_v18 }
 0x890   :  { %v3526_v46 = vsub.f32 %v6930_v35, %v3478_v8 }
 0x892   :  { %3574 = vst [vmem:[#allocation5 + $0x178] sm:$0xff] %v3526_v46 }
 0x893   :  { %3587 = dma.vmem_to_hbm [thread:$0]  %s3580_s30, 6144, %s3582_s11, [#allocation4], %s4536_s12, %s4536_s12, %s4537_s13  }
 0x894   :  { %4530 = dma.done.wait [#allocation4], 6144  }
 0x895   :  { %4531 = vsyncadd [#allocation4], 4294961152 }
 0x896   :  { %3592 = vsyncpa [#allocation3], 1 }
 0x897   :  { %3593 = vsyncpa [#allocation4], 1 }

</bundles_post_ra>
